<compile_context>
chip_gen: v7x
topology: tpu7x:2x2x1
jax: 0.10.0
libtpu: 0.0.40
codegen_flags: <defaults>
</compile_context>

<pallas_src>
import jax
import jax.numpy as jnp
from jax import lax
from jax.experimental import pallas as pl
from jax.experimental.pallas import tpu as pltpu


# --------------------------------------------------------------------------
# Packing helpers
# --------------------------------------------------------------------------
def _round_up(x, m):
    return (x + m - 1) // m * m


def _pack_rows(mats, dtype):
    """Pack 2-D weights into one slab along sublanes (8-aligned row ranges)."""
    C = max(m.shape[1] for m in mats)
    offs, r = [], 0
    for m in mats:
        offs.append(r)
        r += _round_up(m.shape[0], 8)
    slab = jnp.zeros((r, C), dtype)
    for m, o in zip(mats, offs):
        slab = slab.at[o:o + m.shape[0], :m.shape[1]].set(m.astype(dtype))
    return slab, offs


def _pack_vecs(vecs, dtype):
    """Pack 1-row vectors as rows of one slab (each row starts at lane 0)."""
    C = max(int(v.reshape(-1).shape[0]) for v in vecs)
    R = _round_up(len(vecs), 8)
    slab = jnp.zeros((R, C), dtype)
    for i, v in enumerate(vecs):
        v = v.reshape(-1)
        slab = slab.at[i, :v.shape[0]].set(v.astype(dtype))
    return slab


# --------------------------------------------------------------------------
# Wrapper + kernel
# --------------------------------------------------------------------------
def pos_update(h_node, h_edge, edge_index, relative_vec, distance, edge_time,
               params, *, tile_e=None):
    N, node_dim = h_node.shape
    E, edge_dim = h_edge.shape
    f32, bf16 = jnp.float32, jnp.bfloat16

    (lW1, lb1, lg1, lB1, lW2, lb2,
     rW1, rb1, rg1, rB1, rW2, rb2,
     Wb, Wn,
     iW1, ib1, ig1, iB1, iW2, ib2,
     gW1e, gW1n, gW1t, gb1, gg1, gB1, gW2, gb2) = params

    hidden = lW1.shape[1]
    inter_dim = Wb.shape[1]            # BondFFN inter dim (= module node_dim)
    gate_dim = gW1e.shape[1]           # gate MLP hidden (32)

    if tile_e is None:                 # keep edge padding below one tile
        tile_e = 128 if E <= 512 else 256

    n_pad = _round_up(max(N, 8), 8)
    e_pad = _round_up(max(E, 1), tile_e)
    num_tiles = e_pad // tile_e

    # ---- per-node pre-projection: first Linear of both MLPs, bias folded ----
    proj_l = h_node.astype(f32) @ lW1.astype(f32) + lb1.astype(f32)   # [N, hd]
    proj_r = h_node.astype(f32) @ rW1.astype(f32) + rb1.astype(f32)
    proj = jnp.zeros((2 * n_pad, hidden), bf16)
    proj = proj.at[:N].set(proj_l.astype(bf16))
    proj = proj.at[n_pad:n_pad + N].set(proj_r.astype(bf16))

    # ---- bf16 matmul-weight slab (static 8-aligned row offsets) ----
    W_bg = jnp.concatenate([Wb, gW1e], axis=1)     # [ed, inter+gate]
    W_ng = jnp.concatenate([Wn, gW1n], axis=1)     # [ed, inter+gate]
    w_slab, (o_lW2, o_rW2, o_bg, o_ng, o_iW1) = _pack_rows(
        [lW2, rW2, W_bg, W_ng, iW1], bf16)

    # ---- f32 vector slab: all biases / gammas / betas / 1-wide head weights --
    vec_list = [lg1, lB1, rg1, rB1, lb2, rb2,
                gW1t, gb1, gg1, gB1,
                ib1, ig1, iB1,
                iW2.reshape(1, -1), gW2.reshape(1, -1),
                ib2, gb2]
    v_slab = _pack_vecs(vec_list, f32)
    (V_lg1, V_lB1, V_rg1, V_rB1, V_lb2, V_rb2,
     V_gW1t, V_gb1, V_gg1, V_gB1,
     V_ib1, V_ig1, V_iB1,
     V_iW2, V_gW2, V_ib2, V_gb2) = range(len(vec_list))

    # ---- padded per-edge arrays ----
    idx_l = jnp.zeros((e_pad,), jnp.int32).at[:E].set(edge_index[0].astype(jnp.int32))
    idx_r = jnp.zeros((e_pad,), jnp.int32).at[:E].set(edge_index[1].astype(jnp.int32))
    idx2 = jnp.zeros((e_pad, 8), jnp.int32).at[:, 0].set(idx_l).at[:, 1].set(idx_r)
    idx_l_row = idx_l.reshape(1, e_pad)            # lane-major copy for scatter

    h_edge_p = jnp.zeros((e_pad, edge_dim), bf16).at[:E].set(h_edge.astype(bf16))

    # per-edge scalars packed in one 8-lane slab: rel_xyz | dist | time | 0s
    es = jnp.zeros((e_pad, 8), f32)
    es = es.at[:, 3].set(1.0)                      # padded edges: dist=1 (finite recip)
    es = es.at[:E, 0:3].set(relative_vec.astype(f32))
    es = es.at[:E, 3].set(distance.astype(f32).reshape(E))
    es = es.at[:E, 4].set(edge_time.astype(f32).reshape(E))

    # ---------------------------- kernel ------------------------------------
    def kernel(idx2_ref, idxrow_ref, h_edge_ref, es_ref,
               proj_ref, wm_ref, vf_ref, out_ref):
        t = pl.program_id(0)

        @pl.when(t == 0)
        def _():
            out_ref[...] = jnp.zeros_like(out_ref)

        def ln(x, g, b):
            mu = jnp.mean(x, axis=-1, keepdims=True)
            var = jnp.mean((x - mu) ** 2, axis=-1, keepdims=True)
            return (x - mu) * lax.rsqrt(var + 1e-5) * g + b

        def vec(row, d):
            return vf_ref[row:row + 1, :d]         # [1, d] f32

        idx = idx2_ref[...]                        # [T, 8] int32
        il = idx[:, 0:1]
        ir = idx[:, 1:2]

        # -- one-hot MXU gather of the pre-projected node rows ----------------
        lane_n = lax.broadcasted_iota(jnp.int32, (tile_e, n_pad), 1)
        oh_l = (lane_n == il).astype(bf16)         # [T, n_pad]
        oh_r = (lane_n == ir).astype(bf16)
        h1_l = jnp.dot(oh_l, proj_ref[0:n_pad, :], preferred_element_type=f32)
        h1_r = jnp.dot(oh_r, proj_ref[n_pad:2 * n_pad, :], preferred_element_type=f32)

        # -- left / right MLP tails (LN -> ReLU -> Linear), kept separate -----
        hl = jnp.maximum(ln(h1_l, vec(V_lg1, hidden), vec(V_lB1, hidden)), 0.0)
        hr = jnp.maximum(ln(h1_r, vec(V_rg1, hidden), vec(V_rB1, hidden)), 0.0)
        feat_l = jnp.dot(hl.astype(bf16), wm_ref[o_lW2:o_lW2 + hidden, :edge_dim],
                         preferred_element_type=f32) + vec(V_lb2, edge_dim)
        feat_r = jnp.dot(hr.astype(bf16), wm_ref[o_rW2:o_rW2 + hidden, :edge_dim],
                         preferred_element_type=f32) + vec(V_rb2, edge_dim)
        node_in = feat_l * feat_r                  # [T, ed]

        # -- BondFFN: bond/node linears fused with the gate's first layer -----
        bg = jnp.dot(h_edge_ref[...], wm_ref[o_bg:o_bg + edge_dim, :inter_dim + gate_dim],
                     preferred_element_type=f32)   # [T, inter+gate]
        ng = jnp.dot(node_in.astype(bf16), wm_ref[o_ng:o_ng + edge_dim, :inter_dim + gate_dim],
                     preferred_element_type=f32)

        es_t = es_ref[...]                         # [T, 8]
        time_e = es_t[:, 4:5]

        inter_in = bg[:, :inter_dim] * ng[:, :inter_dim]
        gate_pre = (bg[:, inter_dim:] + ng[:, inter_dim:]
                    + time_e * vec(V_gW1t, gate_dim) + vec(V_gb1, gate_dim))
        gate_h = jnp.maximum(ln(gate_pre, vec(V_gg1, gate_dim), vec(V_gB1, gate_dim)), 0.0)

        ih = jnp.dot(inter_in.astype(bf16), wm_ref[o_iW1:o_iW1 + inter_dim, :inter_dim],
                     preferred_element_type=f32) + vec(V_ib1, inter_dim)
        ih = jnp.maximum(ln(ih, vec(V_ig1, inter_dim), vec(V_iB1, inter_dim)), 0.0)

        # 1-wide heads as lane reductions (no concat, no 1-lane matmuls)
        inter_out = jnp.sum(ih * vec(V_iW2, inter_dim), axis=-1,
                            keepdims=True) + vec(V_ib2, 1)
        gate_out = jnp.sum(gate_h * vec(V_gW2, gate_dim), axis=-1,
                           keepdims=True) + vec(V_gb2, 1)
        weight_edge = inter_out * jax.nn.sigmoid(gate_out)          # [T, 1]

        # -- per-edge force; single EUP reciprocal ----------------------------
        d = es_t[:, 3:4]
        lane8 = lax.broadcasted_iota(jnp.int32, (tile_e, 8), 1)
        rel = jnp.where(lane8 < 3, es_t, 0.0)                       # rel_vec | zeros
        force = weight_edge * rel * pl.reciprocal(d * (d + 1.0), approx=True)

        # -- scatter-sum over the left index: [n_pad, T] one-hot @ [T, 8] -----
        sub_n = lax.broadcasted_iota(jnp.int32, (n_pad, tile_e), 0)
        oh_s = (sub_n == idxrow_ref[...]).astype(f32)
        out_ref[...] += jnp.dot(oh_s, force, preferred_element_type=f32)

    # ---------------------------- pallas_call -------------------------------
    grid_spec = pltpu.PrefetchScalarGridSpec(
        num_scalar_prefetch=0,
        grid=(num_tiles,),
        in_specs=[
            pl.BlockSpec((tile_e, 8), lambda t: (t, 0)),            # edge indices
            pl.BlockSpec((1, tile_e), lambda t: (0, t)),            # left idx (lane-major)
            pl.BlockSpec((tile_e, edge_dim), lambda t: (t, 0)),     # h_edge tile
            pl.BlockSpec((tile_e, 8), lambda t: (t, 0)),            # edge scalars tile
            pl.BlockSpec(proj.shape, lambda t: (0, 0)),             # pre-projected nodes
            pl.BlockSpec(w_slab.shape, lambda t: (0, 0)),           # bf16 weight slab
            pl.BlockSpec(v_slab.shape, lambda t: (0, 0)),           # f32 vector slab
        ],
        out_specs=pl.BlockSpec((n_pad, 8), lambda t: (0, 0)),
    )

    out = pl.pallas_call(
        kernel,
        grid_spec=grid_spec,
        out_shape=jax.ShapeDtypeStruct((n_pad, 8), f32),
        compiler_params=pltpu.CompilerParams(
            dimension_semantics=("arbitrary",),
            vmem_limit_bytes=32 * 1024 * 1024),
    )(idx2, idx_l_row, h_edge_p, es, proj, w_slab, v_slab)

    return out[:N, :3]


# --------------------------------------------------------------------------
# Pure-JAX reference (f32, unfused weights) for a sanity check
# --------------------------------------------------------------------------
def pos_update_ref(h_node, h_edge, edge_index, relative_vec, distance, edge_time, params):
    (lW1, lb1, lg1, lB1, lW2, lb2,
     rW1, rb1, rg1, rB1, rW2, rb2,
     Wb, Wn,
     iW1, ib1, ig1, iB1, iW2, ib2,
     gW1e, gW1n, gW1t, gb1, gg1, gB1, gW2, gb2) = params

    def ln(x, g, b):
        mu = x.mean(-1, keepdims=True)
        var = ((x - mu) ** 2).mean(-1, keepdims=True)
        return (x - mu) / jnp.sqrt(var + 1e-5) * g + b

    def mlp(x, W1, b1, g1, B1, W2, b2):
        h = jnp.maximum(ln(x @ W1 + b1, g1, B1), 0.0)
        return h @ W2 + b2

    left = h_node[edge_index[0]]
    right = h_node[edge_index[1]]
    lf = mlp(left, lW1, lb1, lg1, lB1, lW2, lb2)
    rf = mlp(right, rW1, rb1, rg1, rB1, rW2, rb2)
    node_in = lf * rf

    inter = mlp((h_edge @ Wb) * (node_in @ Wn), iW1, ib1, ig1, iB1, iW2, ib2)
    gate_h = jnp.maximum(
        ln(h_edge @ gW1e + node_in @ gW1n + edge_time @ gW1t + gb1, gg1, gB1), 0.0)
    gate = gate_h @ gW2 + gb2
    w_edge = inter * jax.nn.sigmoid(gate)

    d = distance.reshape(-1, 1)
    force = w_edge * relative_vec / d / (d + 1.0)
    return jnp.zeros((h_node.shape[0], 3), jnp.float32).at[edge_index[0]].add(force)


# --------------------------------------------------------------------------
# Synthetic parameters matching PosUpdate.__init__ (use_gate=True)
# --------------------------------------------------------------------------
def init_params(key, node_dim, edge_dim, hidden_dim):
    ks = iter(jax.random.split(key, 32))

    def W(din, dout, s=0.1):
        return jax.random.normal(next(ks), (din, dout), jnp.float32) * s

    def b(d):
        return jax.random.normal(next(ks), (1, d), jnp.float32) * 0.01

    ones = lambda d: jnp.ones((1, d), jnp.float32)
    zeros = lambda d: jnp.zeros((1, d), jnp.float32)

    p = []
    # left_lin_edge = MLP(node_dim, edge_dim, hidden_dim): Lin, LN, ReLU, Lin
    p += [W(node_dim, hidden_dim), b(hidden_dim), ones(hidden_dim), zeros(hidden_dim),
          W(hidden_dim, edge_dim), b(edge_dim)]
    # right_lin_edge (same structure)
    p += [W(node_dim, hidden_dim), b(hidden_dim), ones(hidden_dim), zeros(hidden_dim),
          W(hidden_dim, edge_dim), b(edge_dim)]
    # BondFFN bond/node linears (no bias)
    p += [W(edge_dim, node_dim), W(edge_dim, node_dim)]
    # BondFFN.inter_module = MLP(node_dim, 1, node_dim)
    p += [W(node_dim, node_dim), b(node_dim), ones(node_dim), zeros(node_dim),
          W(node_dim, 1), b(1)]
    # BondFFN.gate = MLP(2*edge_dim + 1, 1, 32); first linear split into chunks
    p += [W(edge_dim, 32), W(edge_dim, 32), W(1, 32), b(32), ones(32), zeros(32),
          W(32, 1), b(1)]
    return p


if __name__ == "__main__":
    key = jax.random.PRNGKey(0)
    N, E = 24, 300
    node_dim = edge_dim = hidden_dim = 32

    k1, k2, k3, k4, k5, kp = jax.random.split(key, 6)
    h_node = jax.random.normal(k1, (N, node_dim), jnp.float32)
    h_edge = jax.random.normal(k2, (E, edge_dim), jnp.float32)
    edge_index = jax.random.randint(k3, (2, E), 0, N, jnp.int32)
    relative_vec = jax.random.normal(k4, (E, 3), jnp.float32)
    distance = jnp.linalg.norm(relative_vec, axis=-1) + 0.1   # strictly positive
    edge_time = jax.random.uniform(k5, (E, 1), jnp.float32)

    params = init_params(kp, node_dim, edge_dim, hidden_dim)

    delta_pos = pos_update(h_node, h_edge, edge_index, relative_vec,
                           distance, edge_time, params)
    jax.block_until_ready(delta_pos)

    ref = pos_update_ref(h_node, h_edge, edge_index, relative_vec,
                         distance, edge_time, params)

    assert delta_pos.shape == (N, 3)
    assert bool(jnp.all(jnp.isfinite(delta_pos)))
    # bf16 MXU operands + approx reciprocal -> loose tolerance vs f32 reference
    assert bool(jnp.allclose(delta_pos, ref, rtol=0.1, atol=0.03)), (
        "mismatch vs reference: max abs err = "
        + str(float(jnp.max(jnp.abs(delta_pos - ref)))))
    print("KERNEL_OK")
</pallas_src>

<mosaic_0001>
module attributes {stable_mosaic.version = 11 : i64} {
  func.func @kernel(%arg0: i32, %arg1: memref<128x8xi32, #tpu.memory_space<vmem>>, %arg2: memref<1x128xi32, #tpu.memory_space<vmem>>, %arg3: memref<128x32xbf16, #tpu.memory_space<vmem>>, %arg4: memref<128x8xf32, #tpu.memory_space<vmem>>, %arg5: memref<48x32xbf16, #tpu.memory_space<vmem>>, %arg6: memref<160x64xbf16, #tpu.memory_space<vmem>>, %arg7: memref<24x32xf32, #tpu.memory_space<vmem>>, %arg8: memref<24x8xf32, #tpu.memory_space<vmem>>) attributes {dimension_semantics = [#tpu.dimension_semantics<arbitrary>], iteration_bounds = array<i64: 3>, scalar_prefetch = 0 : i64, scratch_operands = 0 : i64, tpu.core_type = #tpu.core_type<tc>, window_params = [{transform_indices = @transform_0, window_bounds = array<i64: 128, 8>}, {transform_indices = @transform_1, window_bounds = array<i64: 1, 128>}, {transform_indices = @transform_2, window_bounds = array<i64: 128, 32>}, {transform_indices = @transform_3, window_bounds = array<i64: 128, 8>}, {pipeline_mode = #tpu.pipeline_mode<synchronous>, transform_indices = @transform_4, window_bounds = array<i64: 48, 32>}, {pipeline_mode = #tpu.pipeline_mode<synchronous>, transform_indices = @transform_5, window_bounds = array<i64: 160, 64>}, {pipeline_mode = #tpu.pipeline_mode<synchronous>, transform_indices = @transform_6, window_bounds = array<i64: 24, 32>}, {pipeline_mode = #tpu.pipeline_mode<synchronous>, transform_indices = @transform_7, window_bounds = array<i64: 24, 8>}]} {
    %c0_i32 = arith.constant 0 : i32
    %0 = arith.cmpi eq, %arg0, %c0_i32 : i32
    %1 = arith.extui %0 : i1 to i32
    %c0_i32_0 = arith.constant 0 : i32
    %2 = arith.cmpi ne, %1, %c0_i32_0 : i32
    scf.if %2 {
      %cst_75 = arith.constant 0.000000e+00 : f32
      %212 = vector.broadcast %cst_75 : f32 to vector<24x8xf32>
      %c0_76 = arith.constant 0 : index
      %c0_77 = arith.constant 0 : index
      %213 = vector.load %arg8[%c0_76, %c0_77] : memref<24x8xf32, #tpu.memory_space<vmem>>, vector<24x8xf32>
      tpu.vector_store %arg8[%c0_76, %c0_77], %212 {strides = array<i32>} : memref<24x8xf32, #tpu.memory_space<vmem>>, vector<24x8xf32>,
    } else {
    }
    %c0 = arith.constant 0 : index
    %c0_1 = arith.constant 0 : index
    %3 = vector.load %arg1[%c0, %c0_1] : memref<128x8xi32, #tpu.memory_space<vmem>>, vector<128x8xi32>
    %4 = vector.extract_strided_slice %3 {offsets = [0, 0], sizes = [128, 1], strides = [1, 1]} : vector<128x8xi32> to vector<128x1xi32>
    %5 = vector.extract_strided_slice %3 {offsets = [0, 1], sizes = [128, 1], strides = [1, 1]} : vector<128x8xi32> to vector<128x1xi32>
    %6 = tpu.iota {dimensions = array<i32: 1>} : vector<128x24xi32>
    %7 = vector.broadcast %4 : vector<128x1xi32> to vector<128x24xi32>
    %8 = arith.cmpi eq, %6, %7 : vector<128x24xi32>
    %9 = arith.extui %8 : vector<128x24xi1> to vector<128x24xi32>
    %10 = arith.sitofp %9 : vector<128x24xi32> to vector<128x24xf32>
    %11 = arith.truncf %10 : vector<128x24xf32> to vector<128x24xbf16>
    %12 = vector.broadcast %5 : vector<128x1xi32> to vector<128x24xi32>
    %13 = arith.cmpi eq, %6, %12 : vector<128x24xi32>
    %14 = arith.extui %13 : vector<128x24xi1> to vector<128x24xi32>
    %15 = arith.sitofp %14 : vector<128x24xi32> to vector<128x24xf32>
    %16 = arith.truncf %15 : vector<128x24xf32> to vector<128x24xbf16>
    %c0_2 = arith.constant 0 : index
    %c0_3 = arith.constant 0 : index
    %17 = vector.load %arg5[%c0_2, %c0_3] : memref<48x32xbf16, #tpu.memory_space<vmem>>, vector<24x32xbf16>
    %cst = arith.constant dense<0.000000e+00> : vector<128x32xf32>
    %18 = tpu.matmul %11, %17, %cst {dimension_numbers = #tpu.dot_dimension_numbers<[1], [0], [0], [1], [0, 0, 1, 1], [], []>} : vector<128x24xbf16>, vector<24x32xbf16>, vector<128x32xf32> -> vector<128x32xf32>
    %c24 = arith.constant 24 : index
    %c0_4 = arith.constant 0 : index
    %19 = vector.load %arg5[%c24, %c0_4] : memref<48x32xbf16, #tpu.memory_space<vmem>>, vector<24x32xbf16>
    %cst_5 = arith.constant dense<0.000000e+00> : vector<128x32xf32>
    %20 = tpu.matmul %16, %19, %cst_5 {dimension_numbers = #tpu.dot_dimension_numbers<[1], [0], [0], [1], [0, 0, 1, 1], [], []>} : vector<128x24xbf16>, vector<24x32xbf16>, vector<128x32xf32> -> vector<128x32xf32>
    %c0_6 = arith.constant 0 : index
    %c0_7 = arith.constant 0 : index
    %21 = vector.load %arg7[%c0_6, %c0_7] : memref<24x32xf32, #tpu.memory_space<vmem>>, vector<1x32xf32>
    %c1 = arith.constant 1 : index
    %c0_8 = arith.constant 0 : index
    %22 = vector.load %arg7[%c1, %c0_8] : memref<24x32xf32, #tpu.memory_space<vmem>>, vector<1x32xf32>
    %cst_9 = arith.constant dense<0.000000e+00> : vector<128xf32>
    %23 = vector.multi_reduction <add>, %18, %cst_9 [1] : vector<128x32xf32> to vector<128xf32>
    %24 = vector.shape_cast %23 : vector<128xf32> to vector<128x1xf32>
    %cst_10 = arith.constant 3.200000e+01 : f32
    %25 = vector.broadcast %cst_10 : f32 to vector<128x1xf32>
    %26 = arith.divf %24, %25 : vector<128x1xf32>
    %27 = vector.broadcast %26 : vector<128x1xf32> to vector<128x32xf32>
    %28 = arith.subf %18, %27 : vector<128x32xf32>
    %29 = arith.mulf %28, %28 : vector<128x32xf32>
    %cst_11 = arith.constant dense<0.000000e+00> : vector<128xf32>
    %30 = vector.multi_reduction <add>, %29, %cst_11 [1] : vector<128x32xf32> to vector<128xf32>
    %31 = vector.shape_cast %30 : vector<128xf32> to vector<128x1xf32>
    %cst_12 = arith.constant 3.200000e+01 : f32
    %32 = vector.broadcast %cst_12 : f32 to vector<128x1xf32>
    %33 = arith.divf %31, %32 : vector<128x1xf32>
    %34 = vector.broadcast %26 : vector<128x1xf32> to vector<128x32xf32>
    %35 = arith.subf %18, %34 : vector<128x32xf32>
    %cst_13 = arith.constant 9.99999974E-6 : f32
    %36 = vector.broadcast %cst_13 : f32 to vector<128x1xf32>
    %37 = arith.addf %33, %36 : vector<128x1xf32>
    %38 = math.rsqrt %37 : vector<128x1xf32>
    %39 = vector.broadcast %38 : vector<128x1xf32> to vector<128x32xf32>
    %40 = arith.mulf %35, %39 : vector<128x32xf32>
    %41 = vector.broadcast %21 : vector<1x32xf32> to vector<128x32xf32>
    %42 = arith.mulf %40, %41 : vector<128x32xf32>
    %43 = vector.broadcast %22 : vector<1x32xf32> to vector<128x32xf32>
    %44 = arith.addf %42, %43 : vector<128x32xf32>
    %cst_14 = arith.constant 0.000000e+00 : f32
    %45 = vector.broadcast %cst_14 : f32 to vector<128x32xf32>
    %46 = arith.maximumf %44, %45 : vector<128x32xf32>
    %c2 = arith.constant 2 : index
    %c0_15 = arith.constant 0 : index
    %47 = vector.load %arg7[%c2, %c0_15] : memref<24x32xf32, #tpu.memory_space<vmem>>, vector<1x32xf32>
    %c3 = arith.constant 3 : index
    %c0_16 = arith.constant 0 : index
    %48 = vector.load %arg7[%c3, %c0_16] : memref<24x32xf32, #tpu.memory_space<vmem>>, vector<1x32xf32>
    %cst_17 = arith.constant dense<0.000000e+00> : vector<128xf32>
    %49 = vector.multi_reduction <add>, %20, %cst_17 [1] : vector<128x32xf32> to vector<128xf32>
    %50 = vector.shape_cast %49 : vector<128xf32> to vector<128x1xf32>
    %cst_18 = arith.constant 3.200000e+01 : f32
    %51 = vector.broadcast %cst_18 : f32 to vector<128x1xf32>
    %52 = arith.divf %50, %51 : vector<128x1xf32>
    %53 = vector.broadcast %52 : vector<128x1xf32> to vector<128x32xf32>
    %54 = arith.subf %20, %53 : vector<128x32xf32>
    %55 = arith.mulf %54, %54 : vector<128x32xf32>
    %cst_19 = arith.constant dense<0.000000e+00> : vector<128xf32>
    %56 = vector.multi_reduction <add>, %55, %cst_19 [1] : vector<128x32xf32> to vector<128xf32>
    %57 = vector.shape_cast %56 : vector<128xf32> to vector<128x1xf32>
    %cst_20 = arith.constant 3.200000e+01 : f32
    %58 = vector.broadcast %cst_20 : f32 to vector<128x1xf32>
    %59 = arith.divf %57, %58 : vector<128x1xf32>
    %60 = vector.broadcast %52 : vector<128x1xf32> to vector<128x32xf32>
    %61 = arith.subf %20, %60 : vector<128x32xf32>
    %cst_21 = arith.constant 9.99999974E-6 : f32
    %62 = vector.broadcast %cst_21 : f32 to vector<128x1xf32>
    %63 = arith.addf %59, %62 : vector<128x1xf32>
    %64 = math.rsqrt %63 : vector<128x1xf32>
    %65 = vector.broadcast %64 : vector<128x1xf32> to vector<128x32xf32>
    %66 = arith.mulf %61, %65 : vector<128x32xf32>
    %67 = vector.broadcast %47 : vector<1x32xf32> to vector<128x32xf32>
    %68 = arith.mulf %66, %67 : vector<128x32xf32>
    %69 = vector.broadcast %48 : vector<1x32xf32> to vector<128x32xf32>
    %70 = arith.addf %68, %69 : vector<128x32xf32>
    %cst_22 = arith.constant 0.000000e+00 : f32
    %71 = vector.broadcast %cst_22 : f32 to vector<128x32xf32>
    %72 = arith.maximumf %70, %71 : vector<128x32xf32>
    %73 = arith.truncf %46 : vector<128x32xf32> to vector<128x32xbf16>
    %c0_23 = arith.constant 0 : index
    %c0_24 = arith.constant 0 : index
    %74 = vector.load %arg6[%c0_23, %c0_24] : memref<160x64xbf16, #tpu.memory_space<vmem>>, vector<32x32xbf16>
    %cst_25 = arith.constant dense<0.000000e+00> : vector<128x32xf32>
    %75 = tpu.matmul %73, %74, %cst_25 {dimension_numbers = #tpu.dot_dimension_numbers<[1], [0], [0], [1], [0, 0, 1, 1], [], []>} : vector<128x32xbf16>, vector<32x32xbf16>, vector<128x32xf32> -> vector<128x32xf32>
    %c4 = arith.constant 4 : index
    %c0_26 = arith.constant 0 : index
    %76 = vector.load %arg7[%c4, %c0_26] : memref<24x32xf32, #tpu.memory_space<vmem>>, vector<1x32xf32>
    %77 = vector.broadcast %76 : vector<1x32xf32> to vector<128x32xf32>
    %78 = arith.addf %75, %77 : vector<128x32xf32>
    %79 = arith.truncf %72 : vector<128x32xf32> to vector<128x32xbf16>
    %c32 = arith.constant 32 : index
    %c0_27 = arith.constant 0 : index
    %80 = vector.load %arg6[%c32, %c0_27] : memref<160x64xbf16, #tpu.memory_space<vmem>>, vector<32x32xbf16>
    %cst_28 = arith.constant dense<0.000000e+00> : vector<128x32xf32>
    %81 = tpu.matmul %79, %80, %cst_28 {dimension_numbers = #tpu.dot_dimension_numbers<[1], [0], [0], [1], [0, 0, 1, 1], [], []>} : vector<128x32xbf16>, vector<32x32xbf16>, vector<128x32xf32> -> vector<128x32xf32>
    %c5 = arith.constant 5 : index
    %c0_29 = arith.constant 0 : index
    %82 = vector.load %arg7[%c5, %c0_29] : memref<24x32xf32, #tpu.memory_space<vmem>>, vector<1x32xf32>
    %83 = vector.broadcast %82 : vector<1x32xf32> to vector<128x32xf32>
    %84 = arith.addf %81, %83 : vector<128x32xf32>
    %85 = arith.mulf %78, %84 : vector<128x32xf32>
    %c0_30 = arith.constant 0 : index
    %c0_31 = arith.constant 0 : index
    %86 = vector.load %arg3[%c0_30, %c0_31] : memref<128x32xbf16, #tpu.memory_space<vmem>>, vector<128x32xbf16>
    %c64 = arith.constant 64 : index
    %c0_32 = arith.constant 0 : index
    %87 = vector.load %arg6[%c64, %c0_32] : memref<160x64xbf16, #tpu.memory_space<vmem>>, vector<32x64xbf16>
    %cst_33 = arith.constant dense<0.000000e+00> : vector<128x64xf32>
    %88 = tpu.matmul %86, %87, %cst_33 {dimension_numbers = #tpu.dot_dimension_numbers<[1], [0], [0], [1], [0, 0, 1, 1], [], []>} : vector<128x32xbf16>, vector<32x64xbf16>, vector<128x64xf32> -> vector<128x64xf32>
    %89 = arith.truncf %85 : vector<128x32xf32> to vector<128x32xbf16>
    %c96 = arith.constant 96 : index
    %c0_34 = arith.constant 0 : index
    %90 = vector.load %arg6[%c96, %c0_34] : memref<160x64xbf16, #tpu.memory_space<vmem>>, vector<32x64xbf16>
    %cst_35 = arith.constant dense<0.000000e+00> : vector<128x64xf32>
    %91 = tpu.matmul %89, %90, %cst_35 {dimension_numbers = #tpu.dot_dimension_numbers<[1], [0], [0], [1], [0, 0, 1, 1], [], []>} : vector<128x32xbf16>, vector<32x64xbf16>, vector<128x64xf32> -> vector<128x64xf32>
    %c0_36 = arith.constant 0 : index
    %c0_37 = arith.constant 0 : index
    %92 = vector.load %arg4[%c0_36, %c0_37] : memref<128x8xf32, #tpu.memory_space<vmem>>, vector<128x8xf32>
    %93 = vector.extract_strided_slice %92 {offsets = [0, 4], sizes = [128, 1], strides = [1, 1]} : vector<128x8xf32> to vector<128x1xf32>
    %94 = vector.extract_strided_slice %88 {offsets = [0, 0], sizes = [128, 32], strides = [1, 1]} : vector<128x64xf32> to vector<128x32xf32>
    %95 = vector.extract_strided_slice %91 {offsets = [0, 0], sizes = [128, 32], strides = [1, 1]} : vector<128x64xf32> to vector<128x32xf32>
    %96 = arith.mulf %94, %95 : vector<128x32xf32>
    %97 = vector.extract_strided_slice %88 {offsets = [0, 32], sizes = [128, 32], strides = [1, 1]} : vector<128x64xf32> to vector<128x32xf32>
    %98 = vector.extract_strided_slice %91 {offsets = [0, 32], sizes = [128, 32], strides = [1, 1]} : vector<128x64xf32> to vector<128x32xf32>
    %99 = arith.addf %97, %98 : vector<128x32xf32>
    %c6 = arith.constant 6 : index
    %c0_38 = arith.constant 0 : index
    %100 = vector.load %arg7[%c6, %c0_38] : memref<24x32xf32, #tpu.memory_space<vmem>>, vector<1x32xf32>
    %101 = vector.broadcast %93 : vector<128x1xf32> to vector<128x32xf32>
    %102 = vector.broadcast %100 : vector<1x32xf32> to vector<128x32xf32>
    %103 = arith.mulf %101, %102 : vector<128x32xf32>
    %104 = arith.addf %99, %103 : vector<128x32xf32>
    %c7 = arith.constant 7 : index
    %c0_39 = arith.constant 0 : index
    %105 = vector.load %arg7[%c7, %c0_39] : memref<24x32xf32, #tpu.memory_space<vmem>>, vector<1x32xf32>
    %106 = vector.broadcast %105 : vector<1x32xf32> to vector<128x32xf32>
    %107 = arith.addf %104, %106 : vector<128x32xf32>
    %c8 = arith.constant 8 : index
    %c0_40 = arith.constant 0 : index
    %108 = vector.load %arg7[%c8, %c0_40] : memref<24x32xf32, #tpu.memory_space<vmem>>, vector<1x32xf32>
    %c9 = arith.constant 9 : index
    %c0_41 = arith.constant 0 : index
    %109 = vector.load %arg7[%c9, %c0_41] : memref<24x32xf32, #tpu.memory_space<vmem>>, vector<1x32xf32>
    %cst_42 = arith.constant dense<0.000000e+00> : vector<128xf32>
    %110 = vector.multi_reduction <add>, %107, %cst_42 [1] : vector<128x32xf32> to vector<128xf32>
    %111 = vector.shape_cast %110 : vector<128xf32> to vector<128x1xf32>
    %cst_43 = arith.constant 3.200000e+01 : f32
    %112 = vector.broadcast %cst_43 : f32 to vector<128x1xf32>
    %113 = arith.divf %111, %112 : vector<128x1xf32>
    %114 = vector.broadcast %113 : vector<128x1xf32> to vector<128x32xf32>
    %115 = arith.subf %107, %114 : vector<128x32xf32>
    %116 = arith.mulf %115, %115 : vector<128x32xf32>
    %cst_44 = arith.constant dense<0.000000e+00> : vector<128xf32>
    %117 = vector.multi_reduction <add>, %116, %cst_44 [1] : vector<128x32xf32> to vector<128xf32>
    %118 = vector.shape_cast %117 : vector<128xf32> to vector<128x1xf32>
    %cst_45 = arith.constant 3.200000e+01 : f32
    %119 = vector.broadcast %cst_45 : f32 to vector<128x1xf32>
    %120 = arith.divf %118, %119 : vector<128x1xf32>
    %121 = vector.broadcast %113 : vector<128x1xf32> to vector<128x32xf32>
    %122 = arith.subf %107, %121 : vector<128x32xf32>
    %cst_46 = arith.constant 9.99999974E-6 : f32
    %123 = vector.broadcast %cst_46 : f32 to vector<128x1xf32>
    %124 = arith.addf %120, %123 : vector<128x1xf32>
    %125 = math.rsqrt %124 : vector<128x1xf32>
    %126 = vector.broadcast %125 : vector<128x1xf32> to vector<128x32xf32>
    %127 = arith.mulf %122, %126 : vector<128x32xf32>
    %128 = vector.broadcast %108 : vector<1x32xf32> to vector<128x32xf32>
    %129 = arith.mulf %127, %128 : vector<128x32xf32>
    %130 = vector.broadcast %109 : vector<1x32xf32> to vector<128x32xf32>
    %131 = arith.addf %129, %130 : vector<128x32xf32>
    %cst_47 = arith.constant 0.000000e+00 : f32
    %132 = vector.broadcast %cst_47 : f32 to vector<128x32xf32>
    %133 = arith.maximumf %131, %132 : vector<128x32xf32>
    %134 = arith.truncf %96 : vector<128x32xf32> to vector<128x32xbf16>
    %c128 = arith.constant 128 : index
    %c0_48 = arith.constant 0 : index
    %135 = vector.load %arg6[%c128, %c0_48] : memref<160x64xbf16, #tpu.memory_space<vmem>>, vector<32x32xbf16>
    %cst_49 = arith.constant dense<0.000000e+00> : vector<128x32xf32>
    %136 = tpu.matmul %134, %135, %cst_49 {dimension_numbers = #tpu.dot_dimension_numbers<[1], [0], [0], [1], [0, 0, 1, 1], [], []>} : vector<128x32xbf16>, vector<32x32xbf16>, vector<128x32xf32> -> vector<128x32xf32>
    %c10 = arith.constant 10 : index
    %c0_50 = arith.constant 0 : index
    %137 = vector.load %arg7[%c10, %c0_50] : memref<24x32xf32, #tpu.memory_space<vmem>>, vector<1x32xf32>
    %138 = vector.broadcast %137 : vector<1x32xf32> to vector<128x32xf32>
    %139 = arith.addf %136, %138 : vector<128x32xf32>
    %c11 = arith.constant 11 : index
    %c0_51 = arith.constant 0 : index
    %140 = vector.load %arg7[%c11, %c0_51] : memref<24x32xf32, #tpu.memory_space<vmem>>, vector<1x32xf32>
    %c12 = arith.constant 12 : index
    %c0_52 = arith.constant 0 : index
    %141 = vector.load %arg7[%c12, %c0_52] : memref<24x32xf32, #tpu.memory_space<vmem>>, vector<1x32xf32>
    %cst_53 = arith.constant dense<0.000000e+00> : vector<128xf32>
    %142 = vector.multi_reduction <add>, %139, %cst_53 [1] : vector<128x32xf32> to vector<128xf32>
    %143 = vector.shape_cast %142 : vector<128xf32> to vector<128x1xf32>
    %cst_54 = arith.constant 3.200000e+01 : f32
    %144 = vector.broadcast %cst_54 : f32 to vector<128x1xf32>
    %145 = arith.divf %143, %144 : vector<128x1xf32>
    %146 = vector.broadcast %145 : vector<128x1xf32> to vector<128x32xf32>
    %147 = arith.subf %139, %146 : vector<128x32xf32>
    %148 = arith.mulf %147, %147 : vector<128x32xf32>
    %cst_55 = arith.constant dense<0.000000e+00> : vector<128xf32>
    %149 = vector.multi_reduction <add>, %148, %cst_55 [1] : vector<128x32xf32> to vector<128xf32>
    %150 = vector.shape_cast %149 : vector<128xf32> to vector<128x1xf32>
    %cst_56 = arith.constant 3.200000e+01 : f32
    %151 = vector.broadcast %cst_56 : f32 to vector<128x1xf32>
    %152 = arith.divf %150, %151 : vector<128x1xf32>
    %153 = vector.broadcast %145 : vector<128x1xf32> to vector<128x32xf32>
    %154 = arith.subf %139, %153 : vector<128x32xf32>
    %cst_57 = arith.constant 9.99999974E-6 : f32
    %155 = vector.broadcast %cst_57 : f32 to vector<128x1xf32>
    %156 = arith.addf %152, %155 : vector<128x1xf32>
    %157 = math.rsqrt %156 : vector<128x1xf32>
    %158 = vector.broadcast %157 : vector<128x1xf32> to vector<128x32xf32>
    %159 = arith.mulf %154, %158 : vector<128x32xf32>
    %160 = vector.broadcast %140 : vector<1x32xf32> to vector<128x32xf32>
    %161 = arith.mulf %159, %160 : vector<128x32xf32>
    %162 = vector.broadcast %141 : vector<1x32xf32> to vector<128x32xf32>
    %163 = arith.addf %161, %162 : vector<128x32xf32>
    %cst_58 = arith.constant 0.000000e+00 : f32
    %164 = vector.broadcast %cst_58 : f32 to vector<128x32xf32>
    %165 = arith.maximumf %163, %164 : vector<128x32xf32>
    %c13 = arith.constant 13 : index
    %c0_59 = arith.constant 0 : index
    %166 = vector.load %arg7[%c13, %c0_59] : memref<24x32xf32, #tpu.memory_space<vmem>>, vector<1x32xf32>
    %167 = vector.broadcast %166 : vector<1x32xf32> to vector<128x32xf32>
    %168 = arith.mulf %165, %167 : vector<128x32xf32>
    %cst_60 = arith.constant dense<0.000000e+00> : vector<128xf32>
    %169 = vector.multi_reduction <add>, %168, %cst_60 [1] : vector<128x32xf32> to vector<128xf32>
    %170 = vector.shape_cast %169 : vector<128xf32> to vector<128x1xf32>
    %c15 = arith.constant 15 : index
    %c0_61 = arith.constant 0 : index
    %171 = vector.load %arg7[%c15, %c0_61] : memref<24x32xf32, #tpu.memory_space<vmem>>, vector<1x1xf32>
    %172 = vector.broadcast %171 : vector<1x1xf32> to vector<128x1xf32>
    %173 = arith.addf %170, %172 : vector<128x1xf32>
    %c14 = arith.constant 14 : index
    %c0_62 = arith.constant 0 : index
    %174 = vector.load %arg7[%c14, %c0_62] : memref<24x32xf32, #tpu.memory_space<vmem>>, vector<1x32xf32>
    %175 = vector.broadcast %174 : vector<1x32xf32> to vector<128x32xf32>
    %176 = arith.mulf %133, %175 : vector<128x32xf32>
    %cst_63 = arith.constant dense<0.000000e+00> : vector<128xf32>
    %177 = vector.multi_reduction <add>, %176, %cst_63 [1] : vector<128x32xf32> to vector<128xf32>
    %178 = vector.shape_cast %177 : vector<128xf32> to vector<128x1xf32>
    %c16 = arith.constant 16 : index
    %c0_64 = arith.constant 0 : index
    %179 = vector.load %arg7[%c16, %c0_64] : memref<24x32xf32, #tpu.memory_space<vmem>>, vector<1x1xf32>
    %180 = vector.broadcast %179 : vector<1x1xf32> to vector<128x1xf32>
    %181 = arith.addf %178, %180 : vector<128x1xf32>
    %182 = arith.negf %181 : vector<128x1xf32>
    %183 = math.exp %182 : vector<128x1xf32>
    %cst_65 = arith.constant 1.000000e+00 : f32
    %184 = vector.broadcast %cst_65 : f32 to vector<128x1xf32>
    %185 = arith.addf %184, %183 : vector<128x1xf32>
    %186 = arith.divf %184, %185 : vector<128x1xf32>
    %187 = arith.mulf %173, %186 : vector<128x1xf32>
    %188 = vector.extract_strided_slice %92 {offsets = [0, 3], sizes = [128, 1], strides = [1, 1]} : vector<128x8xf32> to vector<128x1xf32>
    %189 = tpu.iota {dimensions = array<i32: 1>} : vector<128x8xi32>
    %c3_i32 = arith.constant 3 : i32
    %190 = vector.broadcast %c3_i32 : i32 to vector<128x8xi32>
    %191 = arith.cmpi slt, %189, %190 : vector<128x8xi32>
    %cst_66 = arith.constant 0.000000e+00 : f32
    %192 = vector.broadcast %cst_66 : f32 to vector<128x8xf32>
    %193 = arith.select %191, %92, %192 : vector<128x8xi1>, vector<128x8xf32>
    %194 = vector.broadcast %187 : vector<128x1xf32> to vector<128x8xf32>
    %195 = arith.mulf %194, %193 : vector<128x8xf32>
    %cst_67 = arith.constant 1.000000e+00 : f32
    %196 = vector.broadcast %cst_67 : f32 to vector<128x1xf32>
    %197 = arith.addf %188, %196 : vector<128x1xf32>
    %198 = arith.mulf %188, %197 : vector<128x1xf32>
    %199 = tpu.reciprocal %198 {approx = true} : vector<128x1xf32> -> vector<128x1xf32>
    %200 = vector.broadcast %199 : vector<128x1xf32> to vector<128x8xf32>
    %201 = arith.mulf %195, %200 : vector<128x8xf32>
    %202 = tpu.iota {dimensions = array<i32: 0>} : vector<24x128xi32>
    %c0_68 = arith.constant 0 : index
    %c0_69 = arith.constant 0 : index
    %203 = vector.load %arg2[%c0_68, %c0_69] : memref<1x128xi32, #tpu.memory_space<vmem>>, vector<1x128xi32>
    %204 = vector.broadcast %203 : vector<1x128xi32> to vector<24x128xi32>
    %205 = arith.cmpi eq, %202, %204 : vector<24x128xi32>
    %206 = arith.extui %205 : vector<24x128xi1> to vector<24x128xi32>
    %207 = arith.sitofp %206 : vector<24x128xi32> to vector<24x128xf32>
    %c0_70 = arith.constant 0 : index
    %c0_71 = arith.constant 0 : index
    %208 = vector.load %arg8[%c0_70, %c0_71] : memref<24x8xf32, #tpu.memory_space<vmem>>, vector<24x8xf32>
    %cst_72 = arith.constant dense<0.000000e+00> : vector<24x8xf32>
    %209 = tpu.matmul %207, %201, %cst_72 {dimension_numbers = #tpu.dot_dimension_numbers<[1], [0], [0], [1], [0, 0, 1, 1], [], []>} : vector<24x128xf32>, vector<128x8xf32>, vector<24x8xf32> -> vector<24x8xf32>
    %210 = arith.addf %208, %209 : vector<24x8xf32>
    %c0_73 = arith.constant 0 : index
    %c0_74 = arith.constant 0 : index
    %211 = vector.load %arg8[%c0_73, %c0_74] : memref<24x8xf32, #tpu.memory_space<vmem>>, vector<24x8xf32>
    tpu.vector_store %arg8[%c0_73, %c0_74], %210 {strides = array<i32>} : memref<24x8xf32, #tpu.memory_space<vmem>>, vector<24x8xf32>,
    return
  }
  func.func @transform_0(%arg0: i32) -> (i32, i32) {
    %c0_i32 = arith.constant 0 : i32
    %c0_i32_0 = arith.constant 0 : i32
    return %arg0, %c0_i32 : i32, i32
  }
  func.func @transform_1(%arg0: i32) -> (i32, i32) {
    %c0_i32 = arith.constant 0 : i32
    %c0_i32_0 = arith.constant 0 : i32
    return %c0_i32, %arg0 : i32, i32
  }
  func.func @transform_2(%arg0: i32) -> (i32, i32) {
    %c0_i32 = arith.constant 0 : i32
    %c0_i32_0 = arith.constant 0 : i32
    return %arg0, %c0_i32 : i32, i32
  }
  func.func @transform_3(%arg0: i32) -> (i32, i32) {
    %c0_i32 = arith.constant 0 : i32
    %c0_i32_0 = arith.constant 0 : i32
    return %arg0, %c0_i32 : i32, i32
  }
  func.func @transform_4(%arg0: i32) -> (i32, i32) {
    %c0_i32 = arith.constant 0 : i32
    %c0_i32_0 = arith.constant 0 : i32
    %c0_i32_1 = arith.constant 0 : i32
    return %c0_i32, %c0_i32_0 : i32, i32
  }
  func.func @transform_5(%arg0: i32) -> (i32, i32) {
    %c0_i32 = arith.constant 0 : i32
    %c0_i32_0 = arith.constant 0 : i32
    %c0_i32_1 = arith.constant 0 : i32
    return %c0_i32, %c0_i32_0 : i32, i32
  }
  func.func @transform_6(%arg0: i32) -> (i32, i32) {
    %c0_i32 = arith.constant 0 : i32
    %c0_i32_0 = arith.constant 0 : i32
    %c0_i32_1 = arith.constant 0 : i32
    return %c0_i32, %c0_i32_0 : i32, i32
  }
  func.func @transform_7(%arg0: i32) -> (i32, i32) {
    %c0_i32 = arith.constant 0 : i32
    %c0_i32_0 = arith.constant 0 : i32
    %c0_i32_1 = arith.constant 0 : i32
    return %c0_i32, %c0_i32_0 : i32, i32
  }
}

</mosaic_0001>

<bundles_post_ra>
// kernel: tpu_custom_call.1
= control target key start
LH: loop header
LB: loop body
LE: loop exit
PB: predicated region body
PF: predicated region fallthrough
CT: control target
= control target key end

     0   :  { %s4708_s24 = smov 0   ;;  %s6403_s0 = inlined_call_operand.vmem [shape: s32[384,8], index: 0, kind: input, shape index: {}]   ;;  %s6404_s1 = inlined_call_operand.vmem [shape: s32[1,384], index: 1, kind: input, shape index: {}]   ;;  %s6405_s2 = inlined_call_operand.vmem [shape: bf16[384,32], index: 2, kind: input, shape index: {}]   ;;  %s6406_s3 = inlined_call_operand.vmem [shape: f32[384,8], index: 3, kind: input, shape index: {}]   ;;  %s6407_s4 = inlined_call_operand.vmem [shape: bf16[48,32], index: 4, kind: input, shape index: {}]   ;;  %s6408_s5 = inlined_call_operand.vmem [shape: bf16[160,64], index: 5, kind: input, shape index: {}]   ;;  %s6409_s6 = inlined_call_operand.vmem [shape: f32[24,32], index: 6, kind: input, shape index: {}]   ;;  %s6410_s7 = inlined_call_operand.vmem [shape: f32[24,8], index: 7, kind: output, shape index: {}]  }
   0x1 LB: > { %s3879_s25 = sadd.s32 4294967295, %s4655_s24   ;;  %p3882_p0 = scmp.ge.s32.totalorder %s4655_s24, 1  ;;  %s4655_s24 = sphi %s4708_s24, %s17_s24  }
   0x2   : > { %p263_p1 = scmp.lt.s32.totalorder %s4655_s24, 4 }
   0x4   : > { %p264_p2 = pnand %p3882_p0, %p263_p1 }
   0x5   : > { %s3883_s26 = sshll.u32 (!%p264_p2), %s3879_s25, 4  ;;  %p309_p3 = scmp.lt.s32.totalorder (!%p264_p2), %s3879_s25, 2 }
   0x6   : > { %267 = sbr.rel (%p264_p2) target bundleno = 2531 (0x9e3), region = 48  ;;  %p304_p4 = scmp.lt.s32.totalorder (!%p264_p2), %s3883_s26, 47 }
   0x7   : > { %p3889_p5 = scmp.ne.s32.totalorder (!%p264_p2), %s3879_s25, 0 }
   0xd   : > { %s4716_s27 = scalar_select %p309_p3, %s3879_s25, 2 }
   0xe   : > { %s6412_s26 = smov (!%p304_p4, %s3883_s26), 47  ;;  %328 = sbr.rel (%p3889_p5) target bundleno = 21 (0x15), region = 52 }
   0xf   : > { %s311_s30 = scalar_lea.vmem %s6404_s1, %s4716_s27  ;;  %s3884_s8 = sshll.u32 %s6412_s26, 3  ;;  %vm329_vm0 = vcmask (!%p3889_p5), 64512   ;;  %v4657_v0 = vmov (!%p3889_p5), 0.0  }
  0x10   : > { %s3886_s9 = sshll.u32 %s6412_s26, 2  ;;  %s4725_s12 = scalar_lea.vmem %s6403_s0, %s3884_s8  ;;  %330 = vst.msk [vmem:[%s6410_s7] sm:$0xff] (!%p3889_p5), %vm329_vm0, %v4657_v0  ;;  %331 = vst.msk [vmem:[%s6410_s7 + $0x8] sm:$0xff] (!%p3889_p5), %vm329_vm0, %v4657_v0 }
  0x11   : > { %s4730_s15 = scalar_lea.vmem %s6405_s2, %s3886_s9  ;;  %s4735_s18 = scalar_lea.vmem %s6406_s3, %s3884_s8  ;;  %332 = vst.msk [vmem:[%s6410_s7 + $0x10] sm:$0xff] (!%p3889_p5), %vm329_vm0, %v4657_v0 }
  0x15 PF: > { %v4747_v1 = vld [vmem:[%s4725_s12 + $0x70] sm:$0xff]  ;;  %v333_v2 = vld [vmem:[%s4725_s12] sm:$0xff]  ;;  %v4658_v3 = vmov 1   ;;  %v4659_v4 = vmov 0   ;;  %v348_v5 = vld [vmem:[%s4725_s12 + $0x78] sm:$0xff]  ;;  %vm596_vm1 = vcmask 1043456   ;;  %v349_v27 = vlaneseq }
  0x16   : > { %4363 = vset.pattern.permute.xlu0 %v4658_v3  ;;  %4362 = vset.pattern.permute.xlu1 %v4659_v4  ;;  %v337_v6 = vld [vmem:[%s4725_s12 + $0x20] sm:$0xff]  ;;  %v334_v7 = vld [vmem:[%s4725_s12 + $0x8] sm:$0xff]  ;;  %v335_v12 = vld [vmem:[%s4725_s12 + $0x10] sm:$0xff]  ;;  %v4660_v34 = vmov 0.0   ;;  %vm571_vm8 = vcmask 195584   ;;  %s4663_s21 = smov 96  }
  0x17   : > { %394 = vperm.xlu1 %4362, %v4747_v1   ;;  %456 = vperm.xlu0 %4363, %v333_v2   ;;  %v341_v8 = vld [vmem:[%s4725_s12 + $0x40] sm:$0xff]  ;;  %v346_v10 = vld [vmem:[%s4725_s12 + $0x68] sm:$0xff]  ;;  %v336_v16 = vld [vmem:[%s4725_s12 + $0x18] sm:$0xff]  ;;  %v4801_v30 = vand.u32 127, %v349_v27 }
  0x18   : > { %v345_v9 = vld [vmem:[%s4725_s12 + $0x60] sm:$0xff]  ;;  %v4388_v13 = vld [vmem:[%s6407_s4 + $0x8] ss:$0 sps:$4 sm:$0xff]   ;;  %v4775_v15 = vld [vmem:[%s6407_s4 + $0xc] sm:$0xff]  }
  0x19   : > { %v4387_v11 = vld [vmem:[%s6407_s4] sm:$0xff]   ;;  %v598_v14 = vsel %vm596_vm1, %v4388_v13, 0  ;;  %v338_v17 = vld [vmem:[%s4725_s12 + $0x28] sm:$0xff]  ;;  %v340_v18 = vld [vmem:[%s4725_s12 + $0x38] sm:$0xff] }
  0x1a   : > { %4336 = vmatprep.subr.bf16.mxu1 %v4387_v11  ;;  %4131 = vmatprep.subr.bf16.mxu0 %v4387_v11  ;;  %v344_v19 = vld [vmem:[%s4725_s12 + $0x58] sm:$0xff]  ;;  %v339_v20 = vld [vmem:[%s4725_s12 + $0x30] sm:$0xff]  ;;  %v342_v21 = vld [vmem:[%s4725_s12 + $0x48] sm:$0xff] }
  0x1b   : > { %397 = vperm.xlu1 %4362, %v348_v5   ;;  %468 = vperm.xlu0 %4363, %v337_v6   ;;  %v343_v22 = vld [vmem:[%s4725_s12 + $0x50] sm:$0xff] }
  0x1c   : > { %4338 = vmatpush3.bf16.msra.mxu1 %v4387_v11  ;;  %4132 = vmatpush3.bf16.msra.mxu0 %v4387_v11  ;;  %v4390_v45 = vld [vmem:[%s6407_s4 + $0x14] ss:$0 sps:$4 sm:$0xff]  }
  0x1d   : > { %4341 = vmatprep.subr.msk.bf16.mxu1 %vm596_vm1, %v4388_v13  ;;  %4340 = vmatprep.subr.msk.bf16.mxu0 %vm596_vm1, %v4388_v13  ;;  %v734_v52 = vsel %vm596_vm1, %v4390_v45, 0 }
  0x1f   : > { %355 = vperm.xlu1 %4362, %v334_v7   ;;  %480 = vperm.xlu0 %4363, %v341_v8  }
  0x20   : > { %4339 = vmatpush3.bf16.msra.mxu1 %v598_v14  ;;  %4134 = vmatpush3.bf16.msra.mxu0 %v598_v14 }
  0x21   : > { %4151 = vmatprep.subr.bf16.mxu1 %v4775_v15 }
  0x23   : > { %4364 = vset.pattern.permute.xlu1 %v4658_v3  ;;  %4372 = vset.pattern.permute.xlu0 %v4659_v4 }
  0x24   : > { %459 = vperm.xlu1 %4364, %v334_v7   ;;  %388 = vperm.xlu0 %4372, %v345_v9  }
  0x28   : > { %4365 = vset.pattern.permute.xlu1 %v4659_v4  ;;  %391 = vperm.xlu0 %4372, %v346_v10  }
  0x29   : > { %358 = vperm.xlu1 %4365, %v335_v12  }
  0x2c   : > { %352 = vperm.xlu0 %4372, %v333_v2  }
  0x2d   : > { %4366 = vset.pattern.permute.xlu1 %v4658_v3 }
  0x2e   : > { %462 = vperm.xlu1 %4366, %v335_v12  }
  0x30   : > { %361 = vperm.xlu0 %4372, %v336_v16  }
  0x32   : > { %465 = vperm.xlu1 %4366, %v336_v16  }
  0x34   : > { %364 = vperm.xlu0 %4372, %v337_v6  }
  0x36   : > { %4367 = vset.pattern.permute.xlu1 %v4659_v4 }
  0x37   : > { %367 = vperm.xlu1 %4367, %v338_v17  }
  0x38   : > { %373 = vperm.xlu0 %4372, %v340_v18  }
  0x3b   : > { %4368 = vset.pattern.permute.xlu1 %v4658_v3 }
  0x3c   : > { %471 = vperm.xlu1 %4368, %v338_v17   ;;  %376 = vperm.xlu0 %4372, %v341_v8  }
  0x40   : > { %4369 = vset.pattern.permute.xlu1 %v4659_v4  ;;  %385 = vperm.xlu0 %4372, %v344_v19  }
  0x41   : > { %370 = vperm.xlu1 %4369, %v339_v20  }
  0x44   : > { %4376 = vset.pattern.permute.xlu0 %v4658_v3 }
  0x45   : > { %4370 = vset.pattern.permute.xlu1 %v4658_v3  ;;  %492 = vperm.xlu0 %4376, %v345_v9  }
  0x46   : > { %474 = vperm.xlu1 %4370, %v339_v20  }
  0x49   : > { %501 = vperm.xlu0 %4376, %v348_v5  }
  0x4a   : > { %477 = vperm.xlu1 %4370, %v340_v18  }
  0x4e   : > { %4371 = vset.pattern.permute.xlu1 %v4659_v4 }
  0x4f   : > { %379 = vperm.xlu1 %4371, %v342_v21  }
  0x53   : > { %4373 = vset.pattern.permute.xlu1 %v4658_v3 }
  0x54   : > { %483 = vperm.xlu1 %4373, %v342_v21  }
  0x58   : > { %4374 = vset.pattern.permute.xlu1 %v4659_v4 }
  0x59   : > { %382 = vperm.xlu1 %4374, %v343_v22  }
  0x5d   : > { %4375 = vset.pattern.permute.xlu1 %v4658_v3 }
  0x5e   : > { %486 = vperm.xlu1 %4375, %v343_v22  }
  0x62   : > { %489 = vperm.xlu1 %4375, %v344_v19  }
  0x66   : > { %495 = vperm.xlu1 %4375, %v346_v10  }
  0x6a   : > { %498 = vperm.xlu1 %4375, %v4747_v1  }
  0x96   : > { %v395_v23 = vpop.permute.xlu1 %394  ;;  %v457_v24 = vpop.permute.xlu0 %456 }
  0x97   : > { %vm413_vm5 = vcmp.eq.s32.totalorder %v4801_v30, %v395_v23  ;;  %vm503_vm6 = vcmp.eq.s32.totalorder %v4801_v30, %v457_v24 }
  0x98   : > { %v3904_v40 = vsel %vm413_vm5, 1.0, %v4660_v34  ;;  %v3906_v42 = vsel %vm503_vm6, 1.0, %v4660_v34 }
  0x9a   : > { %v398_v25 = vpop.permute.xlu1 %397  ;;  %v4796_v26 = vpop.permute.xlu0 %468 }
  0x9b   : > { %vm414_vm3 = vcmp.eq.s32.totalorder %v4801_v30, %v398_v25 }
  0x9c   : > { %v3905_v36 = vsel %vm414_vm3, 1.0, %v4660_v34 }
  0x9d   : > { %v454_v43 = vpack.c.bf16 %v3905_v36, %v3904_v40 }
  0x9e   : > { %v356_v28 = vpop.permute.xlu1 %355  ;;  %v4798_v29 = vpop.permute.xlu0 %480 }
  0x9f   : > { %vm400_vm9 = vcmp.eq.s32.totalorder %v4801_v30, %v356_v28 }
  0xa0   : > { %v3891_v49 = vsel %vm400_vm9, 1.0, %v4660_v34 }
  0xa3   : > { %v460_v31 = vpop.permute.xlu1 %459  ;;  %v389_v32 = vpop.permute.xlu0 %388 }
  0xa4   : > { %vm411_vm2 = vcmp.eq.s32.totalorder %v4801_v30, %v389_v32  ;;  %vm504_vm4 = vcmp.eq.s32.totalorder %v4801_v30, %v460_v31 }
  0xa5   : > { %v3902_v35 = vsel %vm411_vm2, 1.0, %v4660_v34  ;;  %v3907_v38 = vsel %vm504_vm4, 1.0, %v4660_v34 }
  0xa6   : > { %v551_v46 = vpack.c.bf16 %v3907_v38, %v3906_v42 }
  0xa7   : > { %v392_v33 = vpop.permute.xlu0 %391 }
  0xa8   : > { %vm412_vm7 = vcmp.eq.s32.totalorder %v4801_v30, %v392_v33  ;;  %v359_v37 = vpop.permute.xlu1 %358 }
  0xa9   : > { %v3903_v39 = vsel %vm412_vm7, 1.0, %v4660_v34  ;;  %vm401_vm11 = vcmp.eq.s32.totalorder %v4801_v30, %v359_v37 }
  0xaa   : > { %v453_v41 = vpack.c.bf16 %v3903_v39, %v3902_v35  ;;  %v3892_v53 = vsel %vm401_vm11, 1.0, %v4660_v34 }
  0xab   : > { %v353_v44 = vpop.permute.xlu0 %352 }
  0xac   : > { %vm399_vm10 = vcmp.eq.s32.totalorder %v4801_v30, %v353_v44  ;;  %4147 = vmatprep.mubr.msk.bf16.mxu1 %vm571_vm8, %v453_v41 }
  0xad   : > { %v463_v47 = vpop.permute.xlu1 %462  ;;  %4148 = vmatmul.mubr.msk.bf16.vlgmr.msra.gmra.mrb[0].mxu1 %vm571_vm8, %v454_v43  ;;  %v3890_v48 = vsel %vm399_vm10, 1.0, %v4660_v34  ;;  %vm511_vm10 = vcmp.eq.s32.totalorder %v4801_v30, %v4798_v29 }
  0xae   : > { %4155 = vmatprep.mubr.msk.bf16.mxu1 %vm571_vm8, %v551_v46  ;;  %4152 = vmatpush3.bf16.msra.mxu1 %v4775_v15  ;;  %v447_v50 = vpack.c.bf16 %v3891_v49, %v3890_v48  ;;  %vm505_vm12 = vcmp.eq.s32.totalorder %v4801_v30, %v463_v47  ;;  %v3914_v23 = vsel %vm511_vm10, 1.0, %v4660_v34  ;;  %vm3814_vm10 = vcmask 64512  }
  0xaf   : > { %v362_v51 = vpop.permute.xlu0 %361  ;;  %4342 = vmatprep.subr.msk.bf16.mxu1 %vm596_vm1, %v4390_v45  ;;  %v3908_v57 = vsel %vm505_vm12, 1.0, %v4660_v34  ;;  %vm507_vm1 = vcmp.eq.s32.totalorder %v4801_v30, %v4796_v26 }
  0xb0   : > { %vm402_vm13 = vcmp.eq.s32.totalorder %v4801_v30, %v362_v51  ;;  %4135 = vmatprep.mubr.msk.bf16.mxu0 %vm571_vm8, %v447_v50  ;;  %v3910_v3 = vsel %vm507_vm1, 1.0, %v4660_v34 }
  0xb1   : > { %v3893_v54 = vsel %vm402_vm13, 1.0, %v4660_v34  ;;  %v466_v55 = vpop.permute.xlu1 %465 }
  0xb2   : > { %v448_v56 = vpack.c.bf16 %v3893_v54, %v3892_v53  ;;  %vm506_vm14 = vcmp.eq.s32.totalorder %v4801_v30, %v466_v55  ;;  %4154 = vmatpush3.bf16.msra.mxu1 %v734_v52 }
  0xb3   : > { %v3909_v58 = vsel %vm506_vm14, 1.0, %v4660_v34  ;;  %v365_v59 = vpop.permute.xlu0 %364 }
  0xb4   : > { %v552_v60 = vpack.c.bf16 %v3909_v58, %v3908_v57  ;;  %4136 = vmatmul.mubr.msk.bf16.vlgmr.msra.gmra.mrb[0].mxu0 %vm571_vm8, %v448_v56  ;;  %vm403_vm15 = vcmp.eq.s32.totalorder %v4801_v30, %v365_v59 }
  0xb5   : > { %v3894_v62 = vsel %vm403_vm15, 1.0, %v4660_v34 }
  0xb6   : > { %v368_v61 = vpop.permute.xlu1 %367  ;;  %4156 = vmatmul.mubr.msk.bf16.vlgmr.msra.gmra.mrb[4].mxu1 %vm571_vm8, %v552_v60 }
  0xb7   : > { %vm404_vm0 = vcmp.eq.s32.totalorder %v4801_v30, %v368_v61  ;;  %v374_v2 = vpop.permute.xlu0 %373 }
  0xb8   : > { %v3895_v63 = vsel %vm404_vm0, 1.0, %v4660_v34  ;;  %vm406_vm3 = vcmp.eq.s32.totalorder %v4801_v30, %v374_v2 }
  0xb9   : > { %v449_v0 = vpack.c.bf16 %v3895_v63, %v3894_v62  ;;  %v3897_v8 = vsel %vm406_vm3, 1.0, %v4660_v34 }
  0xbb   : > { %v472_v1 = vpop.permute.xlu1 %471  ;;  %4139 = vmatprep.mubr.msk.bf16.mxu0 %vm571_vm8, %v449_v0  ;;  %v377_v13 = vpop.permute.xlu0 %376 }
  0xbc   : > { %vm508_vm2 = vcmp.eq.s32.totalorder %v4801_v30, %v472_v1  ;;  %vm407_vm7 = vcmp.eq.s32.totalorder %v4801_v30, %v377_v13 }
  0xbd   : > { %v3911_v5 = vsel %vm508_vm2, 1.0, %v4660_v34  ;;  %v3898_v18 = vsel %vm407_vm7, 1.0, %v4660_v34 }
  0xbe   : > { %v553_v6 = vpack.c.bf16 %v3911_v5, %v3910_v3 }
  0xbf   : > { %v386_v22 = vpop.permute.xlu0 %385 }
  0xc0   : > { %v371_v7 = vpop.permute.xlu1 %370  ;;  %4159 = vmatprep.mubr.msk.bf16.mxu1 %vm571_vm8, %v553_v6  ;;  %vm410_vm12 = vcmp.eq.s32.totalorder %v4801_v30, %v386_v22 }
  0xc1   : > { %vm405_vm4 = vcmp.eq.s32.totalorder %v4801_v30, %v371_v7  ;;  %v3901_v28 = vsel %vm410_vm12, 1.0, %v4660_v34 }
  0xc2   : > { %v3896_v9 = vsel %vm405_vm4, 1.0, %v4660_v34  ;;  %vm835_vm4 = vcmask 261120  }
  0xc3   : > { %v450_v10 = vpack.c.bf16 %v3897_v8, %v3896_v9 }
  0xc4   : > { %v493_v33 = vpop.permute.xlu0 %492 }
  0xc5   : > { %v475_v11 = vpop.permute.xlu1 %474  ;;  %4140 = vmatmul.mubr.msk.bf16.gmra.mrb[4].mxu0 %vm571_vm8, %v450_v10  ;;  %vm515_vm0 = vcmp.eq.s32.totalorder %v4801_v30, %v493_v33 }
  0xc6   : > { %vm509_vm5 = vcmp.eq.s32.totalorder %v4801_v30, %v475_v11  ;;  %v3918_v41 = vsel %vm515_vm0, 1.0, %v4660_v34 }
  0xc7   : > { %v3912_v14 = vsel %vm509_vm5, 1.0, %v4660_v34  ;;  %vm3453_vm5 = vcmp.lt.s32.totalorder %v4801_v30, 3 }
  0xc8   : > { %v502_v38 = vpop.permute.xlu0 %501 }
  0xc9   : > { %v478_v12 = vpop.permute.xlu1 %477  ;;  %vm518_vm2 = vcmp.eq.s32.totalorder %v4801_v30, %v502_v38 }
  0xca   : > { %vm510_vm6 = vcmp.eq.s32.totalorder %v4801_v30, %v478_v12  ;;  %v3921_v45 = vsel %vm518_vm2, 1.0, %v4660_v34 }
  0xcb   : > { %v3913_v15 = vsel %vm510_vm6, 1.0, %v4660_v34 }
  0xcc   : > { %v554_v16 = vpack.c.bf16 %v3913_v15, %v3912_v14 }
  0xce   : > { %v380_v17 = vpop.permute.xlu1 %379  ;;  %4160 = vmatmul.mubr.msk.bf16.gmra.mrb[8].mxu1 %vm571_vm8, %v554_v16 }
  0xcf   : > { %vm408_vm9 = vcmp.eq.s32.totalorder %v4801_v30, %v380_v17 }
  0xd0   : > { %v3899_v19 = vsel %vm408_vm9, 1.0, %v4660_v34 }
  0xd1   : > { %v451_v20 = vpack.c.bf16 %v3899_v19, %v3898_v18 }
  0xd3   : > { %v484_v21 = vpop.permute.xlu1 %483  ;;  %4143 = vmatprep.mubr.msk.bf16.mxu0 %vm571_vm8, %v451_v20 }
  0xd4   : > { %vm512_vm11 = vcmp.eq.s32.totalorder %v4801_v30, %v484_v21 }
  0xd5   : > { %v3915_v24 = vsel %vm512_vm11, 1.0, %v4660_v34 }
  0xd6   : > { %v555_v25 = vpack.c.bf16 %v3915_v24, %v3914_v23 }
  0xd8   : > { %v383_v26 = vpop.permute.xlu1 %382  ;;  %4163 = vmatprep.mubr.msk.bf16.mxu1 %vm571_vm8, %v555_v25 }
  0xd9   : > { %vm409_vm13 = vcmp.eq.s32.totalorder %v4801_v30, %v383_v26 }
  0xda   : > { %v3900_v29 = vsel %vm409_vm13, 1.0, %v4660_v34 }
  0xdb   : > { %v452_v31 = vpack.c.bf16 %v3901_v28, %v3900_v29 }
  0xdd   : > { %v487_v32 = vpop.permute.xlu1 %486  ;;  %4144 = vmatmul.mubr.msk.bf16.gmra.mrb[8].mxu0 %vm571_vm8, %v452_v31 }
  0xde   : > { %vm513_vm14 = vcmp.eq.s32.totalorder %v4801_v30, %v487_v32 }
  0xdf   : > { %v3916_v35 = vsel %vm513_vm14, 1.0, %v4660_v34 }
  0xe1   : > { %v490_v36 = vpop.permute.xlu1 %489 }
  0xe2   : > { %vm514_vm15 = vcmp.eq.s32.totalorder %v4801_v30, %v490_v36 }
  0xe3   : > { %v3917_v37 = vsel %vm514_vm15, 1.0, %v4660_v34 }
  0xe4   : > { %v556_v39 = vpack.c.bf16 %v3917_v37, %v3916_v35 }
  0xe5   : > { %v496_v40 = vpop.permute.xlu1 %495 }
  0xe6   : > { %vm516_vm1 = vcmp.eq.s32.totalorder %v4801_v30, %v496_v40  ;;  %4164 = vmatmul.mubr.msk.bf16.gmra.mrb[12].mxu1 %vm571_vm8, %v556_v39 }
  0xe7   : > { %v3919_v42 = vsel %vm516_vm1, 1.0, %v4660_v34 }
  0xe8   : > { %v557_v43 = vpack.c.bf16 %v3919_v42, %v3918_v41 }
  0xe9   : > { %v499_v44 = vpop.permute.xlu1 %498 }
  0xea   : > { %vm517_vm3 = vcmp.eq.s32.totalorder %v4801_v30, %v499_v44  ;;  %4167 = vmatprep.mubr.msk.bf16.mxu1 %vm571_vm8, %v557_v43 }
  0xeb   : > { %v3920_v46 = vsel %vm517_vm3, 1.0, %v4660_v34 }
  0xec   : > { %v558_v47 = vpack.c.bf16 %v3921_v45, %v3920_v46 }
  0xee   : > { %4168 = vmatmul.mubr.msk.bf16.gmra.mrb[16].mxu1 %vm571_vm8, %v558_v47  ;;  %vm4666_vm8 = vmmov 0  }
 0x180   : > { %v4891_v48 = vpop.f32.mrb[0].mxu1 }
 0x181   : > { %v4893_v49 = vpop.f32.mrb[1].mxu1  ;;  %v878_v46 = vsel %vm835_vm4, %v4891_v48, 0.0 }
 0x182   : > { %v4895_v50 = vpop.f32.mrb[2].mxu1  ;;  %v872_v62 = vsel %vm835_vm4, %v4893_v49, 0.0 }
 0x183   : > { %v4897_v51 = vpop.f32.mrb[3].mxu1  ;;  %v881_v47 = vsel %vm835_vm4, %v4895_v50, 0.0 }
 0x184   : > { %v875_v1 = vsel %vm835_vm4, %v4897_v51, 0.0 }
 0x187   : > { %v4899_v52 = vpop.f32.mrb[0].mxu0 }
 0x188   : > { %v4901_v53 = vpop.f32.mrb[1].mxu0  ;;  %v842_v54 = vsel %vm835_vm4, %v4899_v52, 0.0 }
 0x189   : > { %v4905_v55 = vpop.f32.mrb[4].mxu1  ;;  %843 = vadd.xlane.f32.xlu0 %v842_v54  ;;  %v4907_v56 = vpop.f32.mrb[2].mxu0  ;;  %v836_v57 = vsel %vm835_vm4, %v4901_v53, 0.0 }
 0x18a   : > { %v4911_v58 = vpop.f32.mrb[5].mxu1  ;;  %837 = vadd.xlane.f32.xlu1 %v836_v57  ;;  %v4913_v59 = vpop.f32.mrb[3].mxu0  ;;  %v845_v63 = vsel %vm835_vm4, %v4907_v56, 0.0  ;;  %v1109_v2 = vsel %vm835_vm4, %v4905_v55, 0.0 }
 0x18b   : > { %v4915_v60 = vpop.f32.mrb[6].mxu1  ;;  %v839_v0 = vsel %vm835_vm4, %v4913_v59, 0.0  ;;  %v1103_v11 = vsel %vm835_vm4, %v4911_v58, 0.0 }
 0x18c   : > { %v4917_v61 = vpop.f32.mrb[7].mxu1  ;;  %v1112_v3 = vsel %vm835_vm4, %v4915_v60, 0.0 }
 0x18d   : > { %873 = vadd.xlane.f32.xlu0 %v872_v62  ;;  %v1106_v12 = vsel %vm835_vm4, %v4917_v61, 0.0 }
 0x18e   : > { %846 = vadd.xlane.f32.xlu1 %v845_v63 }
 0x191   : > { %840 = vadd.xlane.f32.xlu0 %v839_v0 }
 0x192   : > { %876 = vadd.xlane.f32.xlu1 %v875_v1 }
 0x195   : > { %1110 = vadd.xlane.f32.xlu0 %v1109_v2 }
 0x196   : > { %1113 = vadd.xlane.f32.xlu1 %v1112_v3 }
 0x198   : > { %v4931_v5 = vpop.f32.mrb[4].mxu0 }
 0x199   : > { %v4933_v6 = vpop.f32.mrb[5].mxu0  ;;  %v854_v7 = vsel %vm835_vm4, %v4931_v5, 0.0 }
 0x19a   : > { %855 = vadd.xlane.f32.xlu0 %v854_v7  ;;  %v4937_v8 = vpop.f32.mrb[6].mxu0  ;;  %v848_v14 = vsel %vm835_vm4, %v4933_v6, 0.0 }
 0x19b   : > { %v4939_v9 = vpop.f32.mrb[7].mxu0  ;;  %v857_v10 = vsel %vm835_vm4, %v4937_v8, 0.0 }
 0x19c   : > { %858 = vadd.xlane.f32.xlu1 %v857_v10  ;;  %v851_v17 = vsel %vm835_vm4, %v4939_v9, 0.0 }
 0x19e   : > { %1104 = vadd.xlane.f32.xlu0 %v1103_v11 }
 0x1a0   : > { %1107 = vadd.xlane.f32.xlu1 %v1106_v12 }
 0x1a1   : > { %v4947_v13 = vpop.f32.mrb[8].mxu1 }
 0x1a2   : > { %v4951_v15 = vpop.f32.mrb[9].mxu1  ;;  %849 = vadd.xlane.f32.xlu0 %v848_v14  ;;  %v1121_v19 = vsel %vm835_vm4, %v4947_v13, 0.0 }
 0x1a3   : > { %v4953_v16 = vpop.f32.mrb[10].mxu1  ;;  %v1115_v28 = vsel %vm835_vm4, %v4951_v15, 0.0 }
 0x1a4   : > { %v4957_v18 = vpop.f32.mrb[11].mxu1  ;;  %852 = vadd.xlane.f32.xlu1 %v851_v17  ;;  %v1124_v20 = vsel %vm835_vm4, %v4953_v16, 0.0 }
 0x1a5   : > { %v1118_v29 = vsel %vm835_vm4, %v4957_v18, 0.0 }
 0x1a6   : > { %1122 = vadd.xlane.f32.xlu0 %v1121_v19 }
 0x1a8   : > { %1125 = vadd.xlane.f32.xlu1 %v1124_v20 }
 0x1b0   : > { %v4963_v21 = vpop.f32.mrb[8].mxu0 }
 0x1b1   : > { %v4965_v22 = vpop.f32.mrb[9].mxu0  ;;  %v866_v23 = vsel %vm835_vm4, %v4963_v21, 0.0 }
 0x1b2   : > { %867 = vadd.xlane.f32.xlu0 %v866_v23  ;;  %v4969_v24 = vpop.f32.mrb[10].mxu0  ;;  %v860_v32 = vsel %vm835_vm4, %v4965_v22, 0.0 }
 0x1b3   : > { %v4971_v25 = vpop.f32.mrb[11].mxu0  ;;  %v869_v26 = vsel %vm835_vm4, %v4969_v24, 0.0 }
 0x1b4   : > { %870 = vadd.xlane.f32.xlu1 %v869_v26  ;;  %v863_v36 = vsel %vm835_vm4, %v4971_v25, 0.0 }
 0x1b6   : > { %1116 = vadd.xlane.f32.xlu0 %v1115_v28 }
 0x1b8   : > { %1119 = vadd.xlane.f32.xlu1 %v1118_v29 }
 0x1b9   : > { %v4979_v31 = vpop.f32.mrb[12].mxu1 }
 0x1ba   : > { %v4983_v33 = vpop.f32.mrb[13].mxu1  ;;  %861 = vadd.xlane.f32.xlu0 %v860_v32  ;;  %v1133_v38 = vsel %vm835_vm4, %v4979_v31, 0.0 }
 0x1bb   : > { %v4985_v35 = vpop.f32.mrb[14].mxu1  ;;  %v1127_v41 = vsel %vm835_vm4, %v4983_v33, 0.0 }
 0x1bc   : > { %v4989_v37 = vpop.f32.mrb[15].mxu1  ;;  %864 = vadd.xlane.f32.xlu1 %v863_v36  ;;  %v1136_v39 = vsel %vm835_vm4, %v4985_v35, 0.0 }
 0x1bd   : > { %v1130_v44 = vsel %vm835_vm4, %v4989_v37, 0.0 }
 0x1be   : > { %1134 = vadd.xlane.f32.xlu0 %v1133_v38 }
 0x1c0   : > { %1137 = vadd.xlane.f32.xlu1 %v1136_v39 }
 0x1c1   : > { %v4995_v40 = vpop.f32.mrb[16].mxu1 }
 0x1c2   : > { %1128 = vadd.xlane.f32.xlu0 %v1127_v41  ;;  %v4999_v42 = vpop.f32.mrb[17].mxu1  ;;  %v1145_v62 = vsel %vm835_vm4, %v4995_v40, 0.0 }
 0x1c3   : > { %v5001_v43 = vpop.f32.mrb[18].mxu1  ;;  %v1139_v54 = vsel %vm835_vm4, %v4999_v42, 0.0 }
 0x1c4   : > { %1131 = vadd.xlane.f32.xlu1 %v1130_v44  ;;  %v5005_v45 = vpop.f32.mrb[19].mxu1  ;;  %v1148_v63 = vsel %vm835_vm4, %v5001_v43, 0.0 }
 0x1c5   : > { %v1142_v57 = vsel %vm835_vm4, %v5005_v45, 0.0 }
 0x1c6   : > { %879 = vadd.xlane.f32.xlu0 %v878_v46 }
 0x1c8   : > { %882 = vadd.xlane.f32.xlu1 %v881_v47 }
 0x1ca   : > { %1140 = vadd.xlane.f32.xlu0 %v1139_v54 }
 0x1cc   : > { %1143 = vadd.xlane.f32.xlu1 %v1142_v57 }
 0x1ce   : > { %1146 = vadd.xlane.f32.xlu0 %v1145_v62 }
 0x1d0   : > { %1149 = vadd.xlane.f32.xlu1 %v1148_v63 }
 0x216   : > { %v844_v0 = vpop.xlane.xlu0 %843 }
 0x217   : > { %v887_v1 = vmul.f32 0.03125, %v844_v0  ;;  %v838_v2 = vpop.xlane.xlu1 %837 }
 0x218   : > { %v885_v3 = vmul.f32 0.03125, %v838_v2 }
 0x219   : > { %v5020_v7 = vsub.f32 %v4899_v52, %v887_v1 }
 0x21a   : > { %v5023_v10 = vsub.f32 %v4901_v53, %v885_v3  ;;  %v874_v11 = vpop.xlane.xlu0 %873 }
 0x21b   : > { %v897_v12 = vmul.f32 0.03125, %v874_v11  ;;  %v847_v14 = vpop.xlane.xlu1 %846  ;;  %v919_v17 = vmul.f32 %v5020_v7, %v5020_v7 }
 0x21c   : > { %v888_v19 = vmul.f32 0.03125, %v847_v14  ;;  %v917_v26 = vmul.f32 %v5023_v10, %v5023_v10 }
 0x21d   : > { %v5028_v20 = vsub.f32 %v4893_v49, %v897_v12  ;;  %v939_v23 = vsel %vm835_vm4, %v919_v17, 0.0 }
 0x21e   : > { %v5034_v52 = vsub.f32 %v4907_v56, %v888_v19  ;;  %940 = vadd.xlane.f32.xlu0 %v939_v23  ;;  %v841_v53 = vpop.xlane.xlu0 %840  ;;  %v933_v49 = vsel %vm835_vm4, %v917_v26, 0.0 }
 0x21f   : > { %v886_v28 = vmul.f32 0.03125, %v841_v53  ;;  %v877_v29 = vpop.xlane.xlu1 %876  ;;  %v929_v39 = vmul.f32 %v5028_v20, %v5028_v20 }
 0x220   : > { %v898_v32 = vmul.f32 0.03125, %v877_v29  ;;  %v920_v36 = vmul.f32 %v5034_v52, %v5034_v52 }
 0x221   : > { %v5039_v38 = vsub.f32 %v4913_v59, %v886_v28  ;;  %v969_v62 = vsel %vm835_vm4, %v929_v39, 0.0 }
 0x222   : > { %v5045_v41 = vsub.f32 %v4897_v51, %v898_v32  ;;  %934 = vadd.xlane.f32.xlu0 %v933_v49  ;;  %v1111_v56 = vpop.xlane.xlu0 %1110  ;;  %v942_v44 = vsel %vm835_vm4, %v920_v36, 0.0 }
 0x223   : > { %v1153_v46 = vmul.f32 0.03125, %v1111_v56  ;;  %v1114_v47 = vpop.xlane.xlu1 %1113  ;;  %943 = vadd.xlane.f32.xlu1 %v942_v44  ;;  %v918_v54 = vmul.f32 %v5039_v38, %v5039_v38 }
 0x224   : > { %v1154_v59 = vmul.f32 0.03125, %v1114_v47  ;;  %v930_v0 = vmul.f32 %v5045_v41, %v5045_v41 }
 0x225   : > { %v5051_v57 = vsub.f32 %v4905_v55, %v1153_v46  ;;  %v936_v63 = vsel %vm835_vm4, %v918_v54, 0.0 }
 0x226   : > { %v5056_v51 = vsub.f32 %v4915_v60, %v1154_v59  ;;  %970 = vadd.xlane.f32.xlu0 %v969_v62  ;;  %v972_v17 = vsel %vm835_vm4, %v930_v0, 0.0 }
 0x227   : > { %937 = vadd.xlane.f32.xlu1 %v936_v63  ;;  %v856_v1 = vpop.xlane.xlu0 %855  ;;  %v1185_v2 = vmul.f32 %v5051_v57, %v5051_v57 }
 0x228   : > { %v891_v3 = vmul.f32 0.03125, %v856_v1  ;;  %v1186_v12 = vmul.f32 %v5056_v51, %v5056_v51 }
 0x229   : > { %v859_v11 = vpop.xlane.xlu1 %858  ;;  %v1205_v55 = vsel %vm835_vm4, %v1185_v2, 0.0 }
 0x22a   : > { %v5066_v14 = vsub.f32 %v4931_v5, %v891_v3  ;;  %v892_v60 = vmul.f32 0.03125, %v859_v11  ;;  %1206 = vadd.xlane.f32.xlu0 %v1205_v55  ;;  %v1208_v29 = vsel %vm835_vm4, %v1186_v12, 0.0 }
 0x22b   : > { %973 = vadd.xlane.f32.xlu1 %v972_v17  ;;  %v1105_v19 = vpop.xlane.xlu0 %1104 }
 0x22c   : > { %v5070_v23 = vsub.f32 %v4937_v8, %v892_v60  ;;  %v1151_v26 = vmul.f32 0.03125, %v1105_v19  ;;  %v923_v53 = vmul.f32 %v5066_v14, %v5066_v14 }
 0x22d   : > { %v1108_v28 = vpop.xlane.xlu1 %1107 }
 0x22e   : > { %v5076_v32 = vsub.f32 %v4911_v58, %v1151_v26  ;;  %v1152_v5 = vmul.f32 0.03125, %v1108_v28  ;;  %v951_v36 = vsel %vm835_vm4, %v923_v53, 0.0  ;;  %v924_v49 = vmul.f32 %v5070_v23, %v5070_v23 }
 0x22f   : > { %1209 = vadd.xlane.f32.xlu1 %v1208_v29  ;;  %952 = vadd.xlane.f32.xlu0 %v951_v36  ;;  %v850_v8 = vpop.xlane.xlu0 %849 }
 0x230   : > { %v5082_v39 = vsub.f32 %v4917_v61, %v1152_v5  ;;  %v889_v56 = vmul.f32 0.03125, %v850_v8  ;;  %v1183_v44 = vmul.f32 %v5076_v32, %v5076_v32  ;;  %v954_v58 = vsel %vm835_vm4, %v924_v49, 0.0 }
 0x231   : > { %v853_v46 = vpop.xlane.xlu1 %852 }
 0x232   : > { %v5088_v47 = vsub.f32 %v4933_v6, %v889_v56  ;;  %v890_v54 = vmul.f32 0.03125, %v853_v46  ;;  %v1199_v59 = vsel %vm835_vm4, %v1183_v44, 0.0  ;;  %v1184_v62 = vmul.f32 %v5082_v39, %v5082_v39 }
 0x233   : > { %955 = vadd.xlane.f32.xlu1 %v954_v58  ;;  %1200 = vadd.xlane.f32.xlu0 %v1199_v59  ;;  %v1123_v61 = vpop.xlane.xlu0 %1122 }
 0x234   : > { %v5094_v63 = vsub.f32 %v4939_v9, %v890_v54  ;;  %v1157_v0 = vmul.f32 0.03125, %v1123_v61  ;;  %v921_v1 = vmul.f32 %v5088_v47, %v5088_v47  ;;  %v1202_v6 = vsel %vm835_vm4, %v1184_v62, 0.0 }
 0x235   : > { %v1126_v2 = vpop.xlane.xlu1 %1125 }
 0x236   : > { %v5100_v3 = vsub.f32 %v4947_v13, %v1157_v0  ;;  %v1158_v11 = vmul.f32 0.03125, %v1126_v2  ;;  %v945_v55 = vsel %vm835_vm4, %v921_v1, 0.0  ;;  %v922_v12 = vmul.f32 %v5094_v63, %v5094_v63 }
 0x237   : > { %1203 = vadd.xlane.f32.xlu1 %v1202_v6  ;;  %946 = vadd.xlane.f32.xlu0 %v945_v55 }
 0x238   : > { %v5106_v9 = vsub.f32 %v4953_v16, %v1158_v11  ;;  %v1189_v60 = vmul.f32 %v5100_v3, %v5100_v3  ;;  %v948_v17 = vsel %vm835_vm4, %v922_v12, 0.0 }
 0x23a   : > { %v1217_v19 = vsel %vm835_vm4, %v1189_v60, 0.0  ;;  %v1190_v13 = vmul.f32 %v5106_v9, %v5106_v9 }
 0x23b   : > { %949 = vadd.xlane.f32.xlu1 %v948_v17  ;;  %1218 = vadd.xlane.f32.xlu0 %v1217_v19 }
 0x23c   : > { %v1220_v26 = vsel %vm835_vm4, %v1190_v13, 0.0 }
 0x23f   : > { %1221 = vadd.xlane.f32.xlu1 %v1220_v26  ;;  %v868_v53 = vpop.xlane.xlu0 %867 }
 0x240   : > { %v895_v28 = vmul.f32 0.03125, %v868_v53 }
 0x241   : > { %v871_v29 = vpop.xlane.xlu1 %870 }
 0x242   : > { %v5116_v16 = vsub.f32 %v4963_v21, %v895_v28  ;;  %v896_v5 = vmul.f32 0.03125, %v871_v29 }
 0x243   : > { %v1117_v36 = vpop.xlane.xlu0 %1116 }
 0x244   : > { %v5119_v49 = vsub.f32 %v4969_v24, %v896_v5  ;;  %v1155_v8 = vmul.f32 0.03125, %v1117_v36  ;;  %v927_v56 = vmul.f32 %v5116_v16, %v5116_v16  ;;  %v4391_v24 = vld [vmem:[%s6408_s5] sm:$0xff]  }
 0x245   : > { %v1120_v44 = vpop.xlane.xlu1 %1119  ;;  %4171 = vmatprep.subr.bf16.mxu0 %v4391_v24 }
 0x246   : > { %v5124_v46 = vsub.f32 %v4951_v15, %v1155_v8  ;;  %v1156_v58 = vmul.f32 0.03125, %v1120_v44  ;;  %v963_v54 = vsel %vm835_vm4, %v927_v56, 0.0  ;;  %v928_v21 = vmul.f32 %v5119_v49, %v5119_v49  ;;  %4172 = vmatpush3.bf16.msra.mxu0 %v4391_v24 }
 0x247   : > { %964 = vadd.xlane.f32.xlu0 %v963_v54  ;;  %v862_v59 = vpop.xlane.xlu0 %861 }
 0x248   : > { %v5133_v62 = vsub.f32 %v4957_v18, %v1156_v58  ;;  %v893_v61 = vmul.f32 0.03125, %v862_v59  ;;  %v966_v0 = vsel %vm835_vm4, %v928_v21, 0.0  ;;  %v1187_v15 = vmul.f32 %v5124_v46, %v5124_v46  ;;  %v4392_v18 = vld [vmem:[%s6408_s5 + $0x8] sm:$0xff]  }
 0x249   : > { %v865_v1 = vpop.xlane.xlu1 %864  ;;  %967 = vadd.xlane.f32.xlu1 %v966_v0  ;;  %4173 = vmatprep.subr.bf16.mxu0 %v4392_v18 }
 0x24a   : > { %v5139_v2 = vsub.f32 %v4965_v22, %v893_v61  ;;  %v894_v6 = vmul.f32 0.03125, %v865_v1  ;;  %v1211_v11 = vsel %vm835_vm4, %v1187_v15, 0.0  ;;  %v1188_v55 = vmul.f32 %v5133_v62, %v5133_v62  ;;  %4174 = vmatpush3.bf16.msra.mxu0 %v4392_v18 }
 0x24b   : > { %1212 = vadd.xlane.f32.xlu0 %v1211_v11  ;;  %v1135_v12 = vpop.xlane.xlu0 %1134 }
 0x24c   : > { %v5148_v60 = vsub.f32 %v4971_v25, %v894_v6  ;;  %v1161_v17 = vmul.f32 0.03125, %v1135_v12  ;;  %v1214_v22 = vsel %vm835_vm4, %v1188_v55, 0.0  ;;  %v925_v19 = vmul.f32 %v5139_v2, %v5139_v2 }
 0x24d   : > { %v1138_v13 = vpop.xlane.xlu1 %1137  ;;  %1215 = vadd.xlane.f32.xlu1 %v1214_v22 }
 0x24e   : > { %v5154_v26 = vsub.f32 %v4979_v31, %v1161_v17  ;;  %v1162_v53 = vmul.f32 0.03125, %v1138_v13  ;;  %v957_v28 = vsel %vm835_vm4, %v925_v19, 0.0  ;;  %v926_v29 = vmul.f32 %v5148_v60, %v5148_v60 }
 0x24f   : > { %958 = vadd.xlane.f32.xlu0 %v957_v28  ;;  %v1129_v25 = vpop.xlane.xlu0 %1128  ;;  %v4394_v28 = vld [vmem:[%s6408_s5 + $0x18] sm:$0xff]  }
 0x250   : > { %v5160_v5 = vsub.f32 %v4985_v35, %v1162_v53  ;;  %v1159_v36 = vmul.f32 0.03125, %v1129_v25  ;;  %v960_v8 = vsel %vm835_vm4, %v926_v29, 0.0  ;;  %v1193_v56 = vmul.f32 %v5154_v26, %v5154_v26 }
 0x251   : > { %v1132_v31 = vpop.xlane.xlu1 %1131  ;;  %961 = vadd.xlane.f32.xlu1 %v960_v8 }
 0x252   : > { %v5166_v44 = vsub.f32 %v4983_v33, %v1159_v36  ;;  %v1160_v58 = vmul.f32 0.03125, %v1132_v31  ;;  %v1229_v54 = vsel %vm835_vm4, %v1193_v56, 0.0  ;;  %v1194_v21 = vmul.f32 %v5160_v5, %v5160_v5 }
 0x253   : > { %1230 = vadd.xlane.f32.xlu0 %v1229_v54  ;;  %v880_v35 = vpop.xlane.xlu0 %879 }
 0x254   : > { %v5172_v59 = vsub.f32 %v4989_v37, %v1160_v58  ;;  %v899_v24 = vmul.f32 0.03125, %v880_v35  ;;  %v1232_v61 = vsel %vm835_vm4, %v1194_v21, 0.0  ;;  %v1191_v0 = vmul.f32 %v5166_v44, %v5166_v44  ;;  %v4393_v37 = vld [vmem:[%s6408_s5 + $0x10] sm:$0xff]  }
 0x255   : > { %v883_v15 = vpop.xlane.xlu1 %882  ;;  %1233 = vadd.xlane.f32.xlu1 %v1232_v61  ;;  %4191 = vmatprep.subr.bf16.mxu1 %v4393_v37 }
 0x256   : > { %v5178_v33 = vsub.f32 %v4891_v48, %v899_v24  ;;  %v900_v1 = vmul.f32 0.03125, %v883_v15  ;;  %v1223_v6 = vsel %vm835_vm4, %v1191_v0, 0.0  ;;  %v1192_v11 = vmul.f32 %v5172_v59, %v5172_v59  ;;  %4192 = vmatpush3.bf16.msra.mxu1 %v4393_v37  ;;  %v2025_v37 = vld [vmem:[%s4735_s18 + $0x20] sm:$0xff] }
 0x257   : > { %1224 = vadd.xlane.f32.xlu0 %v1223_v6  ;;  %v1141_v55 = vpop.xlane.xlu0 %1140  ;;  %4193 = vmatprep.subr.bf16.mxu1 %v4394_v28  ;;  %v4661_v15 = vmov 4   ;;  %v2023_v6 = vld [vmem:[%s4735_s18 + $0x10] sm:$0xff] }
 0x258   : > { %v5187_v18 = vsub.f32 %v4895_v50, %v900_v1  ;;  %v1163_v12 = vmul.f32 0.03125, %v1141_v55  ;;  %v1226_v17 = vsel %vm835_vm4, %v1192_v11, 0.0  ;;  %v931_v48 = vmul.f32 %v5178_v33, %v5178_v33  ;;  %4378 = vset.pattern.permute.xlu1 %v4661_v15  ;;  %4377 = vset.pattern.permute.xlu0 %v4661_v15  ;;  %v2021_v1 = vld [vmem:[%s4735_s18] sm:$0xff]  ;;  %v2024_v11 = vld [vmem:[%s4735_s18 + $0x18] sm:$0xff]  ;;  %v2026_v55 = vld [vmem:[%s4735_s18 + $0x28] sm:$0xff] }
 0x259   : > { %v1144_v22 = vpop.xlane.xlu1 %1143  ;;  %1227 = vadd.xlane.f32.xlu1 %v1226_v17  ;;  %v2028_v17 = vld [vmem:[%s4735_s18 + $0x38] sm:$0xff] }
 0x25a   : > { %v5193_v19 = vsub.f32 %v4999_v42, %v1163_v12  ;;  %v1164_v13 = vmul.f32 0.03125, %v1144_v22  ;;  %v975_v53 = vsel %vm835_vm4, %v931_v48, 0.0  ;;  %v932_v50 = vmul.f32 %v5187_v18, %v5187_v18  ;;  %4194 = vmatpush3.bf16.msra.mxu1 %v4394_v28  ;;  %v2027_v12 = vld [vmem:[%s4735_s18 + $0x30] sm:$0xff] }
 0x25b   : > { %976 = vadd.xlane.f32.xlu0 %v975_v53  ;;  %v1147_v29 = vpop.xlane.xlu0 %1146 }
 0x25c   : > { %v5202_v25 = vsub.f32 %v5005_v45, %v1164_v13  ;;  %v1165_v36 = vmul.f32 0.03125, %v1147_v29  ;;  %v978_v8 = vsel %vm835_vm4, %v932_v50, 0.0  ;;  %v1195_v42 = vmul.f32 %v5193_v19, %v5193_v19 }
 0x25d   : > { %v1150_v56 = vpop.xlane.xlu1 %1149  ;;  %979 = vadd.xlane.f32.xlu1 %v978_v8 }
 0x25e   : > { %v5208_v31 = vsub.f32 %v4995_v40, %v1165_v36  ;;  %v1166_v58 = vmul.f32 0.03125, %v1150_v56  ;;  %v1235_v54 = vsel %vm835_vm4, %v1195_v42, 0.0  ;;  %v1196_v45 = vmul.f32 %v5202_v25, %v5202_v25 }
 0x25f   : > { %1236 = vadd.xlane.f32.xlu0 %v1235_v54 }
 0x260   : > { %v5214_v21 = vsub.f32 %v5001_v43, %v1166_v58  ;;  %v1238_v35 = vsel %vm835_vm4, %v1196_v45, 0.0  ;;  %v1197_v24 = vmul.f32 %v5208_v31, %v5208_v31  ;;  %v2022_v43 = vld [vmem:[%s4735_s18 + $0x8] sm:$0xff] }
 0x261   : > { %1239 = vadd.xlane.f32.xlu1 %v1238_v35 }
 0x262   : > { %v1241_v40 = vsel %vm835_vm4, %v1197_v24, 0.0  ;;  %v1198_v61 = vmul.f32 %v5214_v21, %v5214_v21 }
 0x263   : > { %1242 = vadd.xlane.f32.xlu0 %v1241_v40 }
 0x264   : > { %v1244_v0 = vsel %vm835_vm4, %v1198_v61, 0.0 }
 0x265   : > { %1245 = vadd.xlane.f32.xlu1 %v1244_v0 }
 0x276   : > { %2077 = vperm.xlu1 %4378, %v2022_v43  }
 0x279   : > { %2072 = vperm.xlu0 %4377, %v2021_v1  }
 0x27a   : > { %2082 = vperm.xlu1 %4378, %v2023_v6  }
 0x27e   : > { %2087 = vperm.xlu1 %4378, %v2024_v11  }
 0x282   : > { %2092 = vperm.xlu1 %4378, %v2025_v37  }
 0x286   : > { %2097 = vperm.xlu1 %4378, %v2026_v55  }
 0x28a   : > { %2102 = vperm.xlu1 %4378, %v2027_v12  }
 0x28e   : > { %2107 = vperm.xlu1 %4378, %v2028_v17  }
 0x2ab   : > { %v941_v48 = vpop.xlane.xlu0 %940 }
 0x2ac   : > { %v983_v22 = vmul.f32 0.03125, %v941_v48  ;;  %v5236_v48 = vld [vmem:[%s6409_s6] ss:$0 sm:$0xff] }
 0x2ae   : > { %v999_v13 = vadd.f32 1e-05, %v983_v22 }
 0x2af   : > { %v935_v53 = vpop.xlane.xlu0 %934 }
 0x2b0   : > { %v981_v50 = vmul.f32 0.03125, %v935_v53  ;;  %v944_v28 = vpop.xlane.xlu1 %943  ;;  %4409 = vrsqrt.f32 %v999_v13 }
 0x2b1   : > { %v984_v29 = vmul.f32 0.03125, %v944_v28 }
 0x2b2   : > { %v997_v36 = vadd.f32 1e-05, %v981_v50 }
 0x2b3   : > { %v1000_v8 = vadd.f32 1e-05, %v984_v29  ;;  %v971_v42 = vpop.xlane.xlu0 %970 }
 0x2b4   : > { %4411 = vrsqrt.f32 %v997_v36  ;;  %v938_v56 = vpop.xlane.xlu1 %937 }
 0x2b5   : > { %4413 = vrsqrt.f32 %v1000_v8  ;;  %v982_v58 = vmul.f32 0.03125, %v938_v56 }
 0x2b7   : > { %v998_v54 = vadd.f32 1e-05, %v982_v58  ;;  %v1207_v45 = vpop.xlane.xlu0 %1206 }
 0x2b8   : > { %v974_v35 = vpop.xlane.xlu1 %973  ;;  %v1249_v24 = vmul.f32 0.03125, %v1207_v45 }
 0x2b9   : > { %4415 = vrsqrt.f32 %v998_v54 }
 0x2ba   : > { %v4410_v40 = vpop.eup %4409  ;;  %v1265_v6 = vadd.f32 1e-05, %v1249_v24 }
 0x2bb   : > { %v1031_v37 = vmul.f32 %v4410_v40, %v5020_v7 }
 0x2bc   : > { %v1210_v61 = vpop.xlane.xlu1 %1209  ;;  %v953_v0 = vpop.xlane.xlu0 %952 }
 0x2bd   : > { %v1250_v43 = vmul.f32 0.03125, %v1210_v61  ;;  %v987_v15 = vmul.f32 0.03125, %v953_v0  ;;  %v1051_v36 = vmul.f32 %v5236_v48, %v1031_v37 }
 0x2be   : > { %v4412_v1 = vpop.eup %4411 }
 0x2bf   : > { %v4414_v11 = vpop.eup %4413  ;;  %v1029_v55 = vmul.f32 %v4412_v1, %v5023_v10  ;;  %v1266_v12 = vadd.f32 1e-05, %v1250_v43  ;;  %v1003_v17 = vadd.f32 1e-05, %v987_v15 }
 0x2c0   : > { %v1032_v22 = vmul.f32 %v4414_v11, %v5034_v52  ;;  %v956_v13 = vpop.xlane.xlu1 %955  ;;  %v1201_v53 = vpop.xlane.xlu0 %1200  ;;  %v5245_v52 = vld [vmem:[%s6409_s6 + $0x1] ss:$0 sm:$0xff]  ;;  %v994_v11 = vmul.f32 0.03125, %v974_v35 }
 0x2c1   : > { %4417 = vrsqrt.f32 %v1266_v12  ;;  %v988_v50 = vmul.f32 0.03125, %v956_v13  ;;  %v1247_v28 = vmul.f32 0.03125, %v1201_v53  ;;  %v1049_v7 = vmul.f32 %v5236_v48, %v1029_v55 }
 0x2c2   : > { %v1052_v29 = vmul.f32 %v5236_v48, %v1032_v22  ;;  %4419 = vrsqrt.f32 %v1265_v6  ;;  %v1071_v15 = vadd.f32 %v5245_v52, %v1051_v36  ;;  %v993_v22 = vmul.f32 0.03125, %v971_v42 }
 0x2c3   : > { %v4416_v10 = vpop.eup %4415  ;;  %4421 = vrsqrt.f32 %v1003_v17  ;;  %v1004_v8 = vadd.f32 1e-05, %v988_v50  ;;  %v1263_v56 = vadd.f32 1e-05, %v1247_v28  ;;  %v1069_v43 = vadd.f32 %v5245_v52, %v1049_v7 }
 0x2c4   : > { %v1030_v58 = vmul.f32 %v4416_v10, %v5039_v38  ;;  %v1204_v54 = vpop.xlane.xlu1 %1203  ;;  %v947_v45 = vpop.xlane.xlu0 %946  ;;  %v1072_v24 = vadd.f32 %v5245_v52, %v1052_v29  ;;  %v1087_v28 = vmax.f32 %v1071_v15, 0.0  ;;  %v1010_v36 = vadd.f32 1e-05, %v994_v11 }
 0x2c5   : > { %4423 = vrsqrt.f32 %v1004_v8  ;;  %v1248_v40 = vmul.f32 0.03125, %v1204_v54  ;;  %v985_v61 = vmul.f32 0.03125, %v947_v45  ;;  %v1085_v13 = vmax.f32 %v1069_v43, 0.0  ;;  %v5260_v43 = vld [vmem:[%s6409_s6 + $0x2] ss:$0 sm:$0xff] }
 0x2c6   : > { %4425 = vrsqrt.f32 %v1263_v56  ;;  %v1050_v0 = vmul.f32 %v5236_v48, %v1030_v58  ;;  %v1088_v12 = vmax.f32 %v1072_v24, 0.0  ;;  %v1009_v24 = vadd.f32 1e-05, %v993_v22 }
 0x2c7   : > { %v1264_v1 = vadd.f32 1e-05, %v1248_v40  ;;  %v1001_v6 = vadd.f32 1e-05, %v985_v61 }
 0x2c8   : > { %v950_v37 = vpop.xlane.xlu1 %949  ;;  %v1219_v55 = vpop.xlane.xlu0 %1218  ;;  %v1070_v38 = vadd.f32 %v5245_v52, %v1050_v0  ;;  %v1368_v45 = vpack.c.bf16 %v1088_v12, %v1087_v28 }
 0x2c9   : > { %4427 = vrsqrt.f32 %v1264_v1  ;;  %v986_v17 = vmul.f32 0.03125, %v950_v37  ;;  %v1253_v7 = vmul.f32 0.03125, %v1219_v55 }
 0x2ca   : > { %4429 = vrsqrt.f32 %v1001_v6  ;;  %v1086_v53 = vmax.f32 %v1070_v38, 0.0 }
 0x2cb   : > { %v4418_v50 = vpop.eup %4417  ;;  %v1002_v29 = vadd.f32 1e-05, %v986_v17  ;;  %v1269_v61 = vadd.f32 1e-05, %v1253_v7 }
 0x2cc   : > { %v4420_v10 = vpop.eup %4419  ;;  %v1222_v8 = vpop.xlane.xlu1 %1221  ;;  %v1367_v56 = vpack.c.bf16 %v1086_v53, %v1085_v13  ;;  %v1298_v58 = vmul.f32 %v4418_v50, %v5056_v51 }
 0x2cd   : > { %v4422_v35 = vpop.eup %4421  ;;  %4431 = vrsqrt.f32 %v1002_v29  ;;  %v1254_v54 = vmul.f32 0.03125, %v1222_v8  ;;  %v1297_v40 = vmul.f32 %v4420_v10, %v5051_v57 }
 0x2ce   : > { %4175 = vmatprep.mubr.msk.bf16.mxu0 %vm835_vm4, %v1367_v56  ;;  %v1035_v51 = vmul.f32 %v4422_v35, %v5066_v14  ;;  %4433 = vrsqrt.f32 %v1010_v36  ;;  %v1318_v6 = vmul.f32 %v5260_v43, %v1298_v58  ;;  %v5271_v14 = vld [vmem:[%s6409_s6 + $0x3] ss:$0 sm:$0xff] }
 0x2cf   : > { %v4424_v42 = vpop.eup %4423  ;;  %4176 = vmatmul.mubr.msk.bf16.vlgmr.msra.gmra.mrb[12].mxu0 %vm835_vm4, %v1368_v45  ;;  %v1270_v1 = vadd.f32 1e-05, %v1254_v54  ;;  %4435 = vrsqrt.f32 %v1009_v24  ;;  %v1317_v37 = vmul.f32 %v5260_v43, %v1297_v40 }
 0x2d0   : > { %v4426_v0 = vpop.eup %4425  ;;  %v1036_v15 = vmul.f32 %v4424_v42, %v5070_v23  ;;  %4437 = vrsqrt.f32 %v1269_v61  ;;  %v1055_v17 = vmul.f32 %v5236_v48, %v1035_v51  ;;  %v1338_v22 = vadd.f32 %v5271_v14, %v1318_v6 }
 0x2d1   : > { %v1295_v11 = vmul.f32 %v4426_v0, %v5076_v32  ;;  %4439 = vrsqrt.f32 %v1270_v1  ;;  %v1337_v10 = vadd.f32 %v5271_v14, %v1317_v37 }
 0x2d2   : > { %v1056_v32 = vmul.f32 %v5236_v48, %v1036_v15  ;;  %v1354_v45 = vmax.f32 %v1338_v22, 0.0 }
 0x2d3   : > { %v4428_v57 = vpop.eup %4427  ;;  %v1315_v55 = vmul.f32 %v5260_v43, %v1295_v11 }
 0x2d4   : > { %v4430_v38 = vpop.eup %4429  ;;  %v1296_v23 = vmul.f32 %v4428_v57, %v5082_v39  ;;  %v965_v12 = vpop.xlane.xlu0 %964  ;;  %v1076_v54 = vadd.f32 %v5245_v52, %v1056_v32 }
 0x2d5   : > { %v1033_v13 = vmul.f32 %v4430_v38, %v5088_v47  ;;  %v991_v53 = vmul.f32 0.03125, %v965_v12  ;;  %v1335_v29 = vadd.f32 %v5271_v14, %v1315_v55  ;;  %v1075_v47 = vadd.f32 %v5245_v52, %v1055_v17 }
 0x2d6   : > { %v968_v50 = vpop.xlane.xlu1 %967  ;;  %v1316_v28 = vmul.f32 %v5260_v43, %v1296_v23  ;;  %v1092_v23 = vmax.f32 %v1076_v54, 0.0 }
 0x2d7   : > { %v4432_v7 = vpop.eup %4431  ;;  %v1007_v39 = vadd.f32 1e-05, %v991_v53  ;;  %v992_v36 = vmul.f32 0.03125, %v968_v50  ;;  %v1053_v8 = vmul.f32 %v5236_v48, %v1033_v13  ;;  %v1351_v61 = vmax.f32 %v1335_v29, 0.0 }
 0x2d8   : > { %v1034_v56 = vmul.f32 %v4432_v7, %v5094_v63  ;;  %v1213_v35 = vpop.xlane.xlu0 %1212  ;;  %v1336_v58 = vadd.f32 %v5271_v14, %v1316_v28  ;;  %v4434_v1 = vpop.eup %4433  ;;  %v1353_v63 = vmax.f32 %v1337_v10, 0.0  ;;  %v1091_v7 = vmax.f32 %v1075_v47, 0.0 }
 0x2d9   : > { %4441 = vrsqrt.f32 %v1007_v39  ;;  %v1008_v24 = vadd.f32 1e-05, %v992_v36  ;;  %v1251_v42 = vmul.f32 0.03125, %v1213_v35  ;;  %v1073_v15 = vadd.f32 %v5245_v52, %v1053_v8  ;;  %v4436_v57 = vpop.eup %4435 }
 0x2da   : > { %v1216_v40 = vpop.xlane.xlu1 %1215  ;;  %v1352_v0 = vmax.f32 %v1336_v58, 0.0  ;;  %v1054_v51 = vmul.f32 %v5236_v48, %v1034_v56  ;;  %v4438_v12 = vpop.eup %4437  ;;  %v1518_v22 = vpack.c.bf16 %v1354_v45, %v1353_v63  ;;  %v1042_v53 = vmul.f32 %v4434_v1, %v5045_v41 }
 0x2db   : > { %4443 = vrsqrt.f32 %v1008_v24  ;;  %v1267_v6 = vadd.f32 1e-05, %v1251_v42  ;;  %v1252_v11 = vmul.f32 0.03125, %v1216_v40  ;;  %v4440_v13 = vpop.eup %4439  ;;  %v1089_v28 = vmax.f32 %v1073_v15, 0.0 }
 0x2dc   : > { %v959_v37 = vpop.xlane.xlu0 %958  ;;  %v1517_v55 = vpack.c.bf16 %v1352_v0, %v1351_v61  ;;  %v1074_v38 = vadd.f32 %v5245_v52, %v1054_v51  ;;  %v1041_v36 = vmul.f32 %v4436_v57, %v5028_v20  ;;  %v1301_v8 = vmul.f32 %v4438_v12, %v5100_v3 }
 0x2dd   : > { %4445 = vrsqrt.f32 %v1267_v6  ;;  %v1268_v17 = vadd.f32 1e-05, %v1252_v11  ;;  %v989_v32 = vmul.f32 0.03125, %v959_v37  ;;  %v1370_v58 = vpack.c.bf16 %v1092_v23, %v1091_v7 }
 0x2de   : > { %v962_v50 = vpop.xlane.xlu1 %961  ;;  %4195 = vmatprep.mubr.msk.bf16.mxu1 %vm835_vm4, %v1517_v55  ;;  %v1090_v29 = vmax.f32 %v1074_v38, 0.0  ;;  %v1302_v41 = vmul.f32 %v4440_v13, %v5106_v9  ;;  %v1062_v47 = vmul.f32 %v5236_v48, %v1042_v53  ;;  %v1321_v3 = vmul.f32 %v5260_v43, %v1301_v8 }
 0x2df   : > { %4447 = vrsqrt.f32 %v1268_v17  ;;  %v1005_v10 = vadd.f32 1e-05, %v989_v32  ;;  %v990_v39 = vmul.f32 0.03125, %v962_v50  ;;  %4196 = vmatmul.mubr.msk.bf16.vlgmr.msra.gmra.mrb[20].mxu1 %vm835_vm4, %v1518_v22  ;;  %v1061_v0 = vmul.f32 %v5236_v48, %v1041_v36 }
 0x2e0   : > { %v1231_v56 = vpop.xlane.xlu0 %1230  ;;  %v1369_v35 = vpack.c.bf16 %v1090_v29, %v1089_v28  ;;  %v1322_v1 = vmul.f32 %v5260_v43, %v1302_v41  ;;  %v5303_v11 = vadd.f32 %v5245_v52, %v1062_v47  ;;  %v1341_v17 = vadd.f32 %v5271_v14, %v1321_v3 }
 0x2e1   : > { %4449 = vrsqrt.f32 %v1005_v10  ;;  %v1006_v54 = vadd.f32 1e-05, %v990_v39  ;;  %v1257_v45 = vmul.f32 0.03125, %v1231_v56  ;;  %v5309_v32 = vadd.f32 %v5245_v52, %v1061_v0 }
 0x2e2   : > { %v1234_v24 = vpop.xlane.xlu1 %1233  ;;  %4179 = vmatprep.mubr.msk.bf16.mxu0 %vm835_vm4, %v1369_v35  ;;  %v1342_v53 = vadd.f32 %v5271_v14, %v1322_v1 }
 0x2e3   : > { %v4442_v42 = vpop.eup %4441  ;;  %4451 = vrsqrt.f32 %v1006_v54  ;;  %v1273_v40 = vadd.f32 1e-05, %v1257_v45  ;;  %v1258_v61 = vmul.f32 0.03125, %v1234_v24  ;;  %4180 = vmatmul.mubr.msk.bf16.gmra.mrb[16].mxu0 %vm835_vm4, %v1370_v58  ;;  %v1357_v58 = vmax.f32 %v1341_v17, 0.0 }
 0x2e4   : > { %v1225_v20 = vpop.xlane.xlu0 %1224  ;;  %v1039_v63 = vmul.f32 %v4442_v42, %v5116_v16  ;;  %v1358_v24 = vmax.f32 %v1342_v53, 0.0 }
 0x2e5   : > { %v4444_v9 = vpop.eup %4443  ;;  %4453 = vrsqrt.f32 %v1273_v40  ;;  %v1274_v51 = vadd.f32 1e-05, %v1258_v61  ;;  %v1255_v15 = vmul.f32 0.03125, %v1225_v20 }
 0x2e6   : > { %v1228_v6 = vpop.xlane.xlu1 %1227  ;;  %v1040_v37 = vmul.f32 %v4444_v9, %v5119_v49  ;;  %v1059_v29 = vmul.f32 %v5236_v48, %v1039_v63  ;;  %v1520_v17 = vpack.c.bf16 %v1358_v24, %v1357_v58 }
 0x2e7   : > { %v4446_v57 = vpop.eup %4445  ;;  %4455 = vrsqrt.f32 %v1274_v51  ;;  %v1271_v55 = vadd.f32 1e-05, %v1255_v15  ;;  %v1256_v38 = vmul.f32 0.03125, %v1228_v6 }
 0x2e8   : > { %v1299_v23 = vmul.f32 %v4446_v57, %v5124_v46  ;;  %v977_v12 = vpop.xlane.xlu0 %976  ;;  %v1098_v46 = vmax.f32 %v5303_v11, 0.0  ;;  %v1060_v36 = vmul.f32 %v5236_v48, %v1040_v37 }
 0x2e9   : > { %v4448_v22 = vpop.eup %4447  ;;  %4457 = vrsqrt.f32 %v1271_v55  ;;  %v1272_v16 = vadd.f32 1e-05, %v1256_v38  ;;  %v995_v13 = vmul.f32 0.03125, %v977_v12 }
 0x2ea   : > { %v1300_v50 = vmul.f32 %v4448_v22, %v5133_v62  ;;  %v980_v49 = vpop.xlane.xlu1 %979  ;;  %v1319_v28 = vmul.f32 %v5260_v43, %v1299_v23  ;;  %v1080_v9 = vadd.f32 %v5245_v52, %v1060_v36 }
 0x2eb   : > { %v4450_v7 = vpop.eup %4449  ;;  %4459 = vrsqrt.f32 %v1272_v16  ;;  %v1011_v10 = vadd.f32 1e-05, %v995_v13  ;;  %v996_v39 = vmul.f32 0.03125, %v980_v49 }
 0x2ec   : > { %v1037_v8 = vmul.f32 %v4450_v7, %v5139_v2  ;;  %v1237_v56 = vpop.xlane.xlu0 %1236  ;;  %v1320_v35 = vmul.f32 %v5260_v43, %v1300_v50  ;;  %v1339_v62 = vadd.f32 %v5271_v14, %v1319_v28  ;;  %v1079_v2 = vadd.f32 %v5245_v52, %v1059_v29 }
 0x2ed   : > { %v4452_v41 = vpop.eup %4451  ;;  %4461 = vrsqrt.f32 %v1011_v10  ;;  %v1012_v54 = vadd.f32 1e-05, %v996_v39  ;;  %v1259_v45 = vmul.f32 0.03125, %v1237_v56  ;;  %v1096_v50 = vmax.f32 %v1080_v9, 0.0 }
 0x2ee   : > { %v1038_v47 = vmul.f32 %v4452_v41, %v5148_v60  ;;  %v1240_v42 = vpop.xlane.xlu1 %1239  ;;  %v1340_v40 = vadd.f32 %v5271_v14, %v1320_v35  ;;  %v1057_v61 = vmul.f32 %v5236_v48, %v1037_v8  ;;  %v1355_v15 = vmax.f32 %v1339_v62, 0.0 }
 0x2ef   : > { %v4454_v20 = vpop.eup %4453  ;;  %4463 = vrsqrt.f32 %v1012_v54  ;;  %v1275_v3 = vadd.f32 1e-05, %v1259_v45  ;;  %v1260_v0 = vmul.f32 0.03125, %v1240_v42  ;;  %v1095_v10 = vmax.f32 %v1079_v2, 0.0 }
 0x2f0   : > { %v1243_v51 = vpop.xlane.xlu0 %1242  ;;  %v1356_v1 = vmax.f32 %v1340_v40, 0.0  ;;  %v1058_v63 = vmul.f32 %v5236_v48, %v1038_v47  ;;  %v1077_v60 = vadd.f32 %v5245_v52, %v1057_v61  ;;  %v1305_v57 = vmul.f32 %v4454_v20, %v5154_v26 }
 0x2f1   : > { %v4456_v6 = vpop.eup %4455  ;;  %4465 = vrsqrt.f32 %v1275_v3  ;;  %v1276_v37 = vadd.f32 1e-05, %v1260_v0  ;;  %v1261_v55 = vmul.f32 0.03125, %v1243_v51  ;;  %v1097_v56 = vmax.f32 %v5309_v32, 0.0 }
 0x2f2   : > { %v1306_v38 = vmul.f32 %v4456_v6, %v5160_v5  ;;  %v1246_v23 = vpop.xlane.xlu1 %1245  ;;  %v1519_v12 = vpack.c.bf16 %v1356_v1, %v1355_v15  ;;  %v1078_v22 = vadd.f32 %v5245_v52, %v1058_v63  ;;  %v1093_v26 = vmax.f32 %v1077_v60, 0.0 }
 0x2f3   : > { %v4458_v16 = vpop.eup %4457  ;;  %4467 = vrsqrt.f32 %v1276_v37  ;;  %v1277_v13 = vadd.f32 1e-05, %v1261_v55  ;;  %v1262_v53 = vmul.f32 0.03125, %v1246_v23  ;;  %v1325_v39 = vmul.f32 %v5260_v43, %v1305_v57 }
 0x2f4   : > { %v1303_v49 = vmul.f32 %v4458_v16, %v5166_v44  ;;  %4199 = vmatprep.mubr.msk.bf16.mxu1 %vm835_vm4, %v1519_v12  ;;  %v1094_v28 = vmax.f32 %v1078_v22, 0.0  ;;  %v1326_v29 = vmul.f32 %v5260_v43, %v1306_v38  ;;  %v1372_v62 = vpack.c.bf16 %v1096_v50, %v1095_v10  ;;  %v4396_v10 = vld [vmem:[%s6408_s5 + $0x30] sm:$0xff]  }
 0x2f5   : > { %v4460_v7 = vpop.eup %4459  ;;  %4469 = vrsqrt.f32 %v1277_v13  ;;  %v1278_v5 = vadd.f32 1e-05, %v1262_v53  ;;  %4200 = vmatmul.mubr.msk.bf16.gmra.mrb[24].mxu1 %vm835_vm4, %v1520_v17  ;;  %v1373_v54 = vpack.c.bf16 %v1098_v46, %v1097_v56  ;;  %v1345_v32 = vadd.f32 %v5271_v14, %v1325_v39  ;;  %4231 = vmatprep.subr.bf16.mxu1 %v4396_v10  ;;  %v2036_v39 = vld [vmem:[%s4735_s18 + $0x78] sm:$0xff]  ;;  %v4399_v56 = vld [vmem:[%s4730_s15] sm:$0xff]  }
 0x2f6   : > { %v1304_v36 = vmul.f32 %v4460_v7, %v5172_v59  ;;  %v1371_v8 = vpack.c.bf16 %v1094_v28, %v1093_v26  ;;  %v1323_v44 = vmul.f32 %v5260_v43, %v1303_v49  ;;  %v1346_v58 = vadd.f32 %v5271_v14, %v1326_v29  ;;  %v2029_v49 = vld [vmem:[%s4735_s18 + $0x40] sm:$0xff]  ;;  %v2031_v26 = vld [vmem:[%s4735_s18 + $0x50] sm:$0xff]  ;;  %v2030_v28 = vld [vmem:[%s4735_s18 + $0x48] sm:$0xff]  ;;  %4232 = vmatpush3.bf16.msra.mxu1 %v4396_v10 }
 0x2f7   : > { %v4462_v35 = vpop.eup %4461  ;;  %4471 = vrsqrt.f32 %v1278_v5  ;;  %v1361_v0 = vmax.f32 %v1345_v32, 0.0  ;;  %2112 = vperm.xlu1 %4378, %v2029_v49   ;;  %2117 = vperm.xlu0 %4377, %v2030_v28   ;;  %v2033_v29 = vld [vmem:[%s4735_s18 + $0x60] sm:$0xff]  ;;  %v2034_v7 = vld [vmem:[%s4735_s18 + $0x68] sm:$0xff] }
 0x2f8   : > { %v1043_v41 = vmul.f32 %v4462_v35, %v5178_v33  ;;  %4183 = vmatprep.mubr.msk.bf16.mxu0 %vm835_vm4, %v1371_v8  ;;  %v1324_v45 = vmul.f32 %v5260_v43, %v1304_v36  ;;  %v1343_v59 = vadd.f32 %v5271_v14, %v1323_v44  ;;  %v1362_v40 = vmax.f32 %v1346_v58, 0.0  ;;  %v4395_v5 = vld [vmem:[%s6408_s5 + $0x20] sm:$0xff]   ;;  %v4397_v36 = vld [vmem:[%s6408_s5 + $0x28] sm:$0xff]   ;;  %v4398_v8 = vld [vmem:[%s6408_s5 + $0x38] sm:$0xff]   ;;  %v2073_v32 = vpop.permute.xlu0 %2072 }
 0x2f9   : > { %v4464_v24 = vpop.eup %4463  ;;  %4184 = vmatmul.mubr.msk.bf16.gmra.mrb[20].mxu0 %vm835_vm4, %v1372_v62  ;;  %4211 = vmatprep.subr.bf16.mxu0 %v4395_v5  ;;  %v4400_v44 = vld [vmem:[%s4730_s15 + $0x8] sm:$0xff]   ;;  %v4401_v35 = vld [vmem:[%s4730_s15 + $0x10] sm:$0xff]   ;;  %v4402_v62 = vld [vmem:[%s4730_s15 + $0x18] sm:$0xff]  }
 0x2fa   : > { %v1044_v47 = vmul.f32 %v4464_v24, %v5187_v18  ;;  %4187 = vmatprep.mubr.msk.bf16.mxu0 %vm835_vm4, %v1373_v54  ;;  %v1344_v33 = vadd.f32 %v5271_v14, %v1324_v45  ;;  %v1063_v11 = vmul.f32 %v5236_v48, %v1043_v41  ;;  %v1359_v61 = vmax.f32 %v1343_v59, 0.0  ;;  %4212 = vmatpush3.bf16.msra.mxu0 %v4395_v5  ;;  %v4403_v58 = vld [vmem:[%s4730_s15 + $0x20] sm:$0xff]   ;;  %v4404_v41 = vld [vmem:[%s4730_s15 + $0x28] sm:$0xff]   ;;  %v4405_v54 = vld [vmem:[%s4730_s15 + $0x30] sm:$0xff]   ;;  %v2078_v24 = vpop.permute.xlu1 %2077 }
 0x2fb   : > { %v4466_v42 = vpop.eup %4465  ;;  %v1522_v60 = vpack.c.bf16 %v1362_v40, %v1361_v0  ;;  %2122 = vperm.xlu1 %4378, %v2031_v26   ;;  %4213 = vmatprep.subr.bf16.mxu0 %v4397_v36  ;;  %v4406_v45 = vld [vmem:[%s4730_s15 + $0x38] sm:$0xff]   ;;  %v5410_v59 = vld [vmem:[%s6409_s6 + $0x6] ss:$0 sm:$0xff]  ;;  %s4662_s15 = smov 32  }
 0x2fc   : > { %v1307_v46 = vmul.f32 %v4466_v42, %v5193_v19  ;;  %v1360_v2 = vmax.f32 %v1344_v33, 0.0  ;;  %v1064_v20 = vmul.f32 %v5236_v48, %v1044_v47  ;;  %v1083_v9 = vadd.f32 %v5245_v52, %v1063_v11  ;;  %4233 = vmatprep.subr.bf16.mxu1 %v4398_v8  ;;  %v4407_v47 = vld [vmem:[%s6408_s5 + $0x40] sm:$0xff]  }
 0x2fd   : > { %v4468_v3 = vpop.eup %4467  ;;  %4234 = vmatpush3.bf16.msra.mxu1 %v4398_v8  ;;  %v2155_v33 = vmul.f32 %v5410_v59, %v2078_v24  ;;  %v2154_v42 = vmul.f32 %v5410_v59, %v2073_v32  ;;  %v3997_v11 = vld [vmem:[%s6409_s6 + $0x7] ss:$0 sm:$0xff] }
 0x2fe   : > { %v1308_v18 = vmul.f32 %v4468_v3, %v5202_v25  ;;  %v1521_v51 = vpack.c.bf16 %v1360_v2, %v1359_v61  ;;  %v1084_v15 = vadd.f32 %v5245_v52, %v1064_v20  ;;  %v1327_v1 = vmul.f32 %v5260_v43, %v1307_v46  ;;  %4214 = vmatpush3.bf16.msra.mxu0 %v4397_v36  ;;  %v2083_v40 = vpop.permute.xlu1 %2082 }
 0x2ff   : > { %v4470_v63 = vpop.eup %4469  ;;  %v1099_v6 = vmax.f32 %v1083_v9, 0.0  ;;  %2132 = vperm.xlu1 %4378, %v2033_v29   ;;  %4251 = vmatprep.subr.bf16.mxu0 %v4407_v47  ;;  %v2156_v46 = vmul.f32 %v5410_v59, %v2083_v40 }
 0x300   : > { %v1309_v19 = vmul.f32 %v4470_v63, %v5208_v31  ;;  %4203 = vmatprep.mubr.msk.bf16.mxu1 %vm835_vm4, %v1521_v51  ;;  %v1100_v57 = vmax.f32 %v1084_v15, 0.0  ;;  %v1328_v48 = vmul.f32 %v5260_v43, %v1308_v18  ;;  %v1347_v37 = vadd.f32 %v5271_v14, %v1327_v1 }
 0x301   : > { %v4472_v55 = vpop.eup %4471  ;;  %4204 = vmatmul.mubr.msk.bf16.gmra.mrb[28].mxu1 %vm835_vm4, %v1522_v60 }
 0x302   : > { %v1310_v25 = vmul.f32 %v4472_v55, %v5214_v21  ;;  %v1374_v52 = vpack.c.bf16 %v1100_v57, %v1099_v6  ;;  %v1348_v38 = vadd.f32 %v5271_v14, %v1328_v48  ;;  %v1329_v23 = vmul.f32 %v5260_v43, %v1309_v19  ;;  %v2088_v61 = vpop.permute.xlu1 %2087 }
 0x303   : > { %v1363_v31 = vmax.f32 %v1347_v37, 0.0  ;;  %v2157_v2 = vmul.f32 %v5410_v59, %v2088_v61 }
 0x304   : > { %4188 = vmatmul.mubr.msk.bf16.gmra.mrb[24].mxu0 %vm835_vm4, %v1374_v52  ;;  %v1364_v12 = vmax.f32 %v1348_v38, 0.0  ;;  %v1330_v17 = vmul.f32 %v5260_v43, %v1310_v25  ;;  %v1349_v22 = vadd.f32 %v5271_v14, %v1329_v23  ;;  %v2032_v43 = vld [vmem:[%s4735_s18 + $0x58] sm:$0xff] }
 0x305   : > { %2127 = vperm.xlu0 %4377, %v2032_v43   ;;  %4215 = vmatprep.mubr.msk.bf16.mxu0 %vm835_vm4, %v4399_v56 }
 0x306   : > { %v1523_v16 = vpack.c.bf16 %v1364_v12, %v1363_v31  ;;  %v1350_v21 = vadd.f32 %v5271_v14, %v1330_v17  ;;  %v1365_v13 = vmax.f32 %v1349_v22, 0.0  ;;  %v2035_v14 = vld [vmem:[%s4735_s18 + $0x70] sm:$0xff]  ;;  %v2093_v20 = vpop.permute.xlu1 %2092  ;;  %v5448_v22 = vld [vmem:[%s6409_s6 + $0x4] ss:$0 sm:$0xff] }
 0x307   : > { %2142 = vperm.xlu1 %4378, %v2035_v14   ;;  %v2158_v3 = vmul.f32 %v5410_v59, %v2093_v20 }
 0x308   : > { %4207 = vmatprep.mubr.msk.bf16.mxu1 %vm835_vm4, %v1523_v16  ;;  %v1366_v53 = vmax.f32 %v1350_v21, 0.0  ;;  %v5453_v16 = vld [vmem:[%s6409_s6 + $0x5] ss:$0 sm:$0xff] }
 0x309   : > { %2137 = vperm.xlu0 %4377, %v2034_v7  }
 0x30a   : > { %v1524_v50 = vpack.c.bf16 %v1366_v53, %v1365_v13  ;;  %v2098_v0 = vpop.permute.xlu1 %2097 }
 0x30b   : > { %2186 = vrot.lane.b32.xlu1 %v2154_v42, %s4662_s15  ;;  %v2159_v9 = vmul.f32 %v5410_v59, %v2098_v0 }
 0x30c   : > { %4208 = vmatmul.mubr.msk.bf16.gmra.mrb[32].mxu1 %vm835_vm4, %v1524_v50  ;;  %4216 = vmatmul.mubr.msk.bf16.vlgmr.msra.gmra.mrb[28].mxu0 %vm835_vm4, %v4400_v44 }
 0x30d   : > { %2147 = vperm.xlu0 %4377, %v2036_v39   ;;  %4219 = vmatprep.mubr.msk.bf16.mxu0 %vm835_vm4, %v4401_v35 }
 0x30e   : > { %4252 = vmatpush3.bf16.msra.mxu0 %v4407_v47  ;;  %v2103_v18 = vpop.permute.xlu1 %2102 }
 0x30f   : > { %2256 = vrot.lane.b32.xlu1 %v3997_v11, %s4662_s15  ;;  %v2160_v51 = vmul.f32 %v5410_v59, %v2103_v18 }
 0x311   : > { %2188 = vrot.lane.b32.xlu0 %v2155_v33, %s4662_s15 }
 0x312   : > { %v2108_v15 = vpop.permute.xlu1 %2107 }
 0x313   : > { %2192 = vrot.lane.b32.xlu1 %v2157_v2, %s4662_s15  ;;  %v2161_v1 = vmul.f32 %v5410_v59, %v2108_v15 }
 0x314   : > { %4220 = vmatmul.mubr.msk.bf16.gmra.mrb[32].mxu0 %vm835_vm4, %v4402_v62 }
 0x315   : > { %4223 = vmatprep.mubr.msk.bf16.mxu0 %vm835_vm4, %v4403_v58  ;;  %2190 = vrot.lane.b32.xlu0 %v2156_v46, %s4662_s15 }
 0x317   : > { %2196 = vrot.lane.b32.xlu1 %v2159_v9, %s4662_s15 }
 0x319   : > { %2194 = vrot.lane.b32.xlu0 %v2158_v3, %s4662_s15 }
 0x31b   : > { %2200 = vrot.lane.b32.xlu1 %v2161_v1, %s4662_s15 }
 0x31c   : > { %4224 = vmatmul.mubr.msk.bf16.gmra.mrb[36].mxu0 %vm835_vm4, %v4404_v41 }
 0x31d   : > { %4227 = vmatprep.mubr.msk.bf16.mxu0 %vm835_vm4, %v4405_v54  ;;  %2198 = vrot.lane.b32.xlu0 %v2160_v51, %s4662_s15 }
 0x324   : > { %4228 = vmatmul.mubr.msk.bf16.gmra.mrb[40].mxu0 %vm835_vm4, %v4406_v45 }
 0x376   : > { %v2113_v6 = vpop.permute.xlu1 %2112  ;;  %v2118_v37 = vpop.permute.xlu0 %2117 }
 0x377   : > { %v2162_v57 = vmul.f32 %v5410_v59, %v2113_v6  ;;  %v2163_v25 = vmul.f32 %v5410_v59, %v2118_v37 }
 0x379   : > { %2202 = vrot.lane.b32.xlu0 %v2162_v57, %s4662_s15  ;;  %2204 = vrot.lane.b32.xlu1 %v2163_v25, %s4662_s15 }
 0x37a   : > { %v2123_v55 = vpop.permute.xlu1 %2122 }
 0x37b   : > { %v2164_v52 = vmul.f32 %v5410_v59, %v2123_v55 }
 0x37d   : > { %2206 = vrot.lane.b32.xlu0 %v2164_v52, %s4662_s15 }
 0x37e   : > { %v2133_v23 = vpop.permute.xlu1 %2132 }
 0x37f   : > { %v2166_v12 = vmul.f32 %v5410_v59, %v2133_v23 }
 0x381   : > { %2210 = vrot.lane.b32.xlu0 %v2166_v12, %s4662_s15 }
 0x384   : > { %v2128_v38 = vpop.permute.xlu0 %2127 }
 0x385   : > { %v2165_v31 = vmul.f32 %v5410_v59, %v2128_v38 }
 0x386   : > { %v2143_v17 = vpop.permute.xlu1 %2142 }
 0x387   : > { %2208 = vrot.lane.b32.xlu1 %v2165_v31, %s4662_s15  ;;  %v2168_v21 = vmul.f32 %v5410_v59, %v2143_v17 }
 0x388   : > { %v2138_v29 = vpop.permute.xlu0 %2137 }
 0x389   : > { %2214 = vrot.lane.b32.xlu0 %v2168_v21, %s4662_s15  ;;  %v2167_v39 = vmul.f32 %v5410_v59, %v2138_v29 }
 0x38b   : > { %2212 = vrot.lane.b32.xlu1 %v2167_v39, %s4662_s15 }
 0x38c   : > { %v2148_v54 = vpop.permute.xlu0 %2147 }
 0x38d   : > { %v2169_v32 = vmul.f32 %v5410_v59, %v2148_v54 }
 0x38f   : > { %2216 = vrot.lane.b32.xlu1 %v2169_v32, %s4662_s15 }
 0x3a2   : > { %v4177_v63 = vpop.f32.mrb[12].mxu0 }
 0x3a3   : > { %v1454_v60 = vpop.f32.mrb[13].mxu0  ;;  %v1463_v53 = vadd.f32 %v4177_v63, %v5448_v22 }
 0x3a4   : > { %v4178_v19 = vpop.f32.mrb[14].mxu0  ;;  %v1455_v26 = vadd.f32 %v5448_v22, %v1454_v60 }
 0x3a5   : > { %v1457_v48 = vpop.f32.mrb[15].mxu0  ;;  %v1466_v14 = vadd.f32 %v4178_v19, %v5448_v22 }
 0x3a6   : > { %v1458_v36 = vadd.f32 %v5448_v22, %v1457_v48 }
 0x3b2   : > { %v4197_v13 = vpop.f32.mrb[20].mxu1 }
 0x3b3   : > { %v1613_v50 = vadd.f32 %v4197_v13, %v5453_v16  ;;  %v1604_v49 = vpop.f32.mrb[21].mxu1 }
 0x3b4   : > { %v1605_v28 = vadd.f32 %v5453_v16, %v1604_v49  ;;  %v4198_v43 = vpop.f32.mrb[22].mxu1 }
 0x3b5   : > { %v1669_v7 = vmul.f32 %v1613_v50, %v1463_v53  ;;  %v1616_v5 = vadd.f32 %v4198_v43, %v5453_v16  ;;  %v1607_v10 = vpop.f32.mrb[23].mxu1 }
 0x3b6   : > { %v1667_v8 = vmul.f32 %v1605_v28, %v1455_v26  ;;  %v1608_v56 = vadd.f32 %v5453_v16, %v1607_v10  ;;  %v4181_v44 = vpop.f32.mrb[16].mxu0 }
 0x3b7   : > { %v1670_v35 = vmul.f32 %v1616_v5, %v1466_v14  ;;  %v1470_v62 = vpop.f32.mrb[17].mxu0  ;;  %v1479_v42 = vadd.f32 %v4181_v44, %v5448_v22 }
 0x3b8   : > { %v1668_v58 = vmul.f32 %v1608_v56, %v1458_v36  ;;  %v4182_v41 = vpop.f32.mrb[18].mxu0  ;;  %v1471_v46 = vadd.f32 %v5448_v22, %v1470_v62 }
 0x3b9   : > { %v1877_v45 = vpack.c.bf16 %v1670_v35, %v1669_v7  ;;  %v1473_v24 = vpop.f32.mrb[19].mxu0  ;;  %v1482_v59 = vadd.f32 %v4182_v41, %v5448_v22 }
 0x3ba   : > { %v1876_v47 = vpack.c.bf16 %v1668_v58, %v1667_v8  ;;  %v1474_v9 = vadd.f32 %v5448_v22, %v1473_v24 }
 0x3bc   : > { %4235 = vmatprep.mubr.msk.bf16.mxu1 %vm835_vm4, %v1876_v47 }
 0x3bd   : > { %4236 = vmatmul.mubr.msk.bf16.vlgmr.msra.gmra.mrb[36].mxu1 %vm835_vm4, %v1877_v45 }
 0x3c8   : > { %v4201_v33 = vpop.f32.mrb[24].mxu1 }
 0x3c9   : > { %v1629_v40 = vadd.f32 %v4201_v33, %v5453_v16  ;;  %v1620_v11 = vpop.f32.mrb[25].mxu1 }
 0x3ca   : > { %v1621_v61 = vadd.f32 %v5453_v16, %v1620_v11  ;;  %v4202_v2 = vpop.f32.mrb[26].mxu1 }
 0x3cb   : > { %v1673_v20 = vmul.f32 %v1629_v40, %v1479_v42  ;;  %v1632_v3 = vadd.f32 %v4202_v2, %v5453_v16  ;;  %v1623_v0 = vpop.f32.mrb[27].mxu1 }
 0x3cc   : > { %v1671_v18 = vmul.f32 %v1621_v61, %v1471_v46  ;;  %v1624_v51 = vadd.f32 %v5453_v16, %v1623_v0  ;;  %v4185_v15 = vpop.f32.mrb[20].mxu0  ;;  %v3998_v61 = vld [vmem:[%s6409_s6 + $0x8] ss:$0 sm:$0xff] }
 0x3cd   : > { %v1674_v1 = vmul.f32 %v1632_v3, %v1482_v59  ;;  %v1486_v63 = vpop.f32.mrb[21].mxu0  ;;  %v1495_v55 = vadd.f32 %v4185_v15, %v5448_v22  ;;  %2618 = vrot.lane.b32.xlu1 %v3998_v61, %s4662_s15  ;;  %v4015_v3 = vld [vmem:[%s6409_s6 + $0xe] ss:$0 sm:$0xff] }
 0x3ce   : > { %v1672_v60 = vmul.f32 %v1624_v51, %v1474_v9  ;;  %v4186_v6 = vpop.f32.mrb[22].mxu0  ;;  %v1487_v38 = vadd.f32 %v5448_v22, %v1486_v63 }
 0x3cf   : > { %v1879_v19 = vpack.c.bf16 %v1674_v1, %v1673_v20  ;;  %v1489_v57 = vpop.f32.mrb[23].mxu0  ;;  %v1498_v12 = vadd.f32 %v4186_v6, %v5448_v22  ;;  %v4408_v20 = vld [vmem:[%s6408_s5 + $0x48] sm:$0xff]  }
 0x3d0   : > { %v1878_v48 = vpack.c.bf16 %v1672_v60, %v1671_v18  ;;  %v1490_v50 = vadd.f32 %v5448_v22, %v1489_v57  ;;  %4253 = vmatprep.subr.bf16.mxu0 %v4408_v20 }
 0x3d1   : > { %3189 = vrot.lane.b32.xlu1 %v4015_v3, %s4662_s15  ;;  %4254 = vmatpush3.bf16.msra.mxu0 %v4408_v20 }
 0x3d2   : > { %4239 = vmatprep.mubr.msk.bf16.mxu1 %vm835_vm4, %v1878_v48 }
 0x3d3   : > { %4240 = vmatmul.mubr.msk.bf16.gmra.mrb[40].mxu1 %vm835_vm4, %v1879_v19 }
 0x3d4   : > { %v4205_v37 = vpop.f32.mrb[28].mxu1 }
 0x3d5   : > { %v1645_v25 = vadd.f32 %v4205_v37, %v5453_v16  ;;  %v1636_v52 = vpop.f32.mrb[29].mxu1  ;;  %v2187_v37 = vpop.permute.xlu1 %2186 }
 0x3d6   : > { %v1637_v23 = vadd.f32 %v5453_v16, %v1636_v52  ;;  %v4206_v31 = vpop.f32.mrb[30].mxu1 }
 0x3d7   : > { %v1677_v17 = vmul.f32 %v1645_v25, %v1495_v55  ;;  %v1648_v21 = vadd.f32 %v4206_v31, %v5453_v16  ;;  %v4189_v13 = vpop.f32.mrb[24].mxu0  ;;  %v1639_v53 = vpop.f32.mrb[31].mxu1 }
 0x3d8   : > { %v1675_v49 = vmul.f32 %v1637_v23, %v1487_v38  ;;  %v1640_v26 = vadd.f32 %v5453_v16, %v1639_v53  ;;  %v1502_v28 = vpop.f32.mrb[25].mxu0  ;;  %v1511_v36 = vadd.f32 %v4189_v13, %v5448_v22  ;;  %v2189_v55 = vpop.permute.xlu0 %2188 }
 0x3d9   : > { %v1678_v43 = vmul.f32 %v1648_v21, %v1498_v12  ;;  %v4190_v29 = vpop.f32.mrb[26].mxu0  ;;  %v1503_v44 = vadd.f32 %v5448_v22, %v1502_v28  ;;  %v5532_v25 = vpop.permute.xlu1 %2256 }
 0x3da   : > { %v1676_v14 = vmul.f32 %v1640_v26, %v1490_v50  ;;  %v1505_v7 = vpop.f32.mrb[27].mxu0  ;;  %v1514_v58 = vadd.f32 %v4190_v29, %v5448_v22 }
 0x3db   : > { %v1881_v5 = vpack.c.bf16 %v1678_v43, %v1677_v17  ;;  %v1506_v24 = vadd.f32 %v5448_v22, %v1505_v7 }
 0x3dc   : > { %v1880_v10 = vpack.c.bf16 %v1676_v14, %v1675_v49  ;;  %v2191_v38 = vpop.permute.xlu0 %2190 }
 0x3dd   : > { %v2193_v53 = vpop.permute.xlu1 %2192 }
 0x3de   : > { %4243 = vmatprep.mubr.msk.bf16.mxu1 %vm835_vm4, %v1880_v10 }
 0x3df   : > { %v4209_v39 = vpop.f32.mrb[32].mxu1  ;;  %4244 = vmatmul.mubr.msk.bf16.gmra.mrb[44].mxu1 %vm835_vm4, %v1881_v5  ;;  %v4217_v46 = vpop.f32.mrb[28].mxu0 }
 0x3e0   : > { %v1661_v8 = vadd.f32 %v4209_v39, %v5453_v16  ;;  %v1652_v56 = vpop.f32.mrb[33].mxu1  ;;  %v1813_v2 = vpop.f32.mrb[29].mxu0 }
 0x3e1   : > { %v1653_v35 = vadd.f32 %v5453_v16, %v1652_v56  ;;  %v4210_v62 = vpop.f32.mrb[34].mxu1  ;;  %v4218_v22 = vpop.f32.mrb[30].mxu0 }
 0x3e2   : > { %v1681_v41 = vmul.f32 %v1661_v8, %v1511_v36  ;;  %v1664_v54 = vadd.f32 %v4210_v62, %v5453_v16  ;;  %v1655_v45 = vpop.f32.mrb[35].mxu1  ;;  %v1816_v59 = vpop.f32.mrb[31].mxu0 }
 0x3e3   : > { %v1679_v32 = vmul.f32 %v1653_v35, %v1503_v44  ;;  %v1656_v47 = vadd.f32 %v5453_v16, %v1655_v45  ;;  %v3999_v16 = vld [vmem:[%s6409_s6 + $0x9] ss:$0 sm:$0xff]  ;;  %v2195_v35 = vpop.permute.xlu0 %2194  ;;  %v2197_v62 = vpop.permute.xlu1 %2196 }
 0x3e4   : > { %v1682_v33 = vmul.f32 %v1664_v54, %v1514_v58  ;;  %2642 = vrot.lane.b32.xlu0 %v3999_v16, %s4662_s15 }
 0x3e5   : > { %v1680_v42 = vmul.f32 %v1656_v47, %v1506_v24 }
 0x3e6   : > { %v1883_v40 = vpack.c.bf16 %v1682_v33, %v1681_v41 }
 0x3e7   : > { %v1882_v11 = vpack.c.bf16 %v1680_v42, %v1679_v32  ;;  %v4221_v0 = vpop.f32.mrb[32].mxu0  ;;  %v2199_v41 = vpop.permute.xlu0 %2198 }
 0x3e8   : > { %v1829_v9 = vpop.f32.mrb[33].mxu0  ;;  %v2201_v42 = vpop.permute.xlu1 %2200 }
 0x3e9   : > { %4247 = vmatprep.mubr.msk.bf16.mxu1 %vm835_vm4, %v1882_v11  ;;  %v4222_v18 = vpop.f32.mrb[34].mxu0 }
 0x3ea   : > { %4248 = vmatmul.mubr.msk.bf16.gmra.mrb[48].mxu1 %vm835_vm4, %v1883_v40  ;;  %v1832_v51 = vpop.f32.mrb[35].mxu0 }
 0x3eb   : > { %4303 = vmatprep.mubr.msk.f32.mxu1 %vm4666_vm8, %v4660_v34 }
 0x3ef   : > { %v5516_v15 = vpop.f32.mrb[36].mxu0 }
 0x3f0   : > { %v5518_v1 = vpop.f32.mrb[37].mxu0 }
 0x3f1   : > { %v5520_v63 = vpop.f32.mrb[38].mxu0 }
 0x3f2   : > { %v5522_v60 = vpop.f32.mrb[39].mxu0 }
 0x3f7   : > { %v5524_v6 = vpop.f32.mrb[40].mxu0 }
 0x3f8   : > { %v5526_v19 = vpop.f32.mrb[41].mxu0 }
 0x3f9   : > { %v5528_v57 = vpop.f32.mrb[42].mxu0 }
 0x3fa   : > { %v5530_v48 = vpop.f32.mrb[43].mxu0 }
 0x490   : > { %v4237_v52 = vpop.f32.mrb[36].mxu1 }
 0x491   : > { %v2039_v23 = vmul.f32 %v4237_v52, %v4217_v46  ;;  %v2055_v31 = vadd.f32 %v4237_v52, %v4217_v46  ;;  %v1958_v12 = vpop.f32.mrb[37].mxu1 }
 0x492   : > { %v2037_v17 = vmul.f32 %v1958_v12, %v1813_v2  ;;  %v2053_v21 = vadd.f32 %v1958_v12, %v1813_v2  ;;  %v4238_v13 = vpop.f32.mrb[38].mxu1 }
 0x493   : > { %v2236_v50 = vadd.f32 %v2191_v38, %v2055_v31  ;;  %v2040_v49 = vmul.f32 %v4238_v13, %v4218_v22  ;;  %v2056_v26 = vadd.f32 %v4238_v13, %v4218_v22  ;;  %v1961_v28 = vpop.f32.mrb[39].mxu1 }
 0x494   : > { %v2038_v43 = vmul.f32 %v1961_v28, %v1816_v59  ;;  %v2054_v29 = vadd.f32 %v1961_v28, %v1816_v59  ;;  %v2234_v7 = vadd.f32 %v2187_v37, %v2053_v21 }
 0x495   : > { %v5535_v14 = vadd.f32 %v5532_v25, %v2236_v50  ;;  %v2678_v5 = vpack.c.bf16 %v2040_v49, %v2039_v23  ;;  %v2237_v10 = vadd.f32 %v2193_v53, %v2056_v26 }
 0x496   : > { %v2677_v39 = vpack.c.bf16 %v2038_v43, %v2037_v17  ;;  %v2235_v36 = vadd.f32 %v2189_v55, %v2054_v29  ;;  %v5544_v56 = vadd.f32 %v5532_v25, %v2234_v7  ;;  %v2203_v55 = vpop.permute.xlu0 %2202 }
 0x497   : > { %v5538_v8 = vadd.f32 %v5532_v25, %v2237_v10  ;;  %2297 = vrot.lane.b32.xlu0 %v5535_v14, %s4663_s21 }
 0x498   : > { %4255 = vmatprep.mubr.msk.bf16.mxu0 %vm835_vm4, %v2677_v39  ;;  %v5550_v44 = vadd.f32 %v5532_v25, %v2235_v36 }
 0x499   : > { %4256 = vmatmul.mubr.msk.bf16.vlgmr.msra.gmra.mrb[44].mxu0 %vm835_vm4, %v2678_v5  ;;  %2299 = vrot.lane.b32.xlu1 %v5538_v8, %s4663_s21 }
 0x49a   : > { %v2207_v23 = vpop.permute.xlu0 %2206 }
 0x49b   : > { %2293 = vrot.lane.b32.xlu0 %v5544_v56, %s4663_s21 }
 0x49d   : > { %2295 = vrot.lane.b32.xlu1 %v5550_v44, %s4663_s21 }
 0x4a6   : > { %v4241_v58 = vpop.f32.mrb[40].mxu1 }
 0x4a7   : > { %v2043_v54 = vmul.f32 %v4241_v58, %v4221_v0  ;;  %v2059_v45 = vadd.f32 %v4241_v58, %v4221_v0  ;;  %v1974_v24 = vpop.f32.mrb[41].mxu1 }
 0x4a8   : > { %v2041_v32 = vmul.f32 %v1974_v24, %v1829_v9  ;;  %v2057_v47 = vadd.f32 %v1974_v24, %v1829_v9  ;;  %v4242_v33 = vpop.f32.mrb[42].mxu1 }
 0x4a9   : > { %v2240_v40 = vadd.f32 %v2199_v41, %v2059_v45  ;;  %v2044_v11 = vmul.f32 %v4242_v33, %v4222_v18  ;;  %v2060_v46 = vadd.f32 %v4242_v33, %v4222_v18  ;;  %v1977_v61 = vpop.f32.mrb[43].mxu1  ;;  %v2205_v18 = vpop.permute.xlu1 %2204 }
 0x4aa   : > { %v2042_v2 = vmul.f32 %v1977_v61, %v1832_v51  ;;  %v2058_v22 = vadd.f32 %v1977_v61, %v1832_v51  ;;  %v2238_v59 = vadd.f32 %v2195_v35, %v2057_v47 }
 0x4ab   : > { %v5557_v16 = vadd.f32 %v5532_v25, %v2240_v40  ;;  %v2241_v20 = vadd.f32 %v2201_v42, %v2060_v46  ;;  %v2680_v3 = vpack.c.bf16 %v2044_v11, %v2043_v54 }
 0x4ac   : > { %v2679_v37 = vpack.c.bf16 %v2042_v2, %v2041_v32  ;;  %v2239_v9 = vadd.f32 %v2197_v62, %v2058_v22  ;;  %v5566_v51 = vadd.f32 %v5532_v25, %v2238_v59 }
 0x4ad   : > { %v5560_v0 = vadd.f32 %v5532_v25, %v2241_v20  ;;  %2305 = vrot.lane.b32.xlu0 %v5557_v16, %s4663_s21  ;;  %v2209_v50 = vpop.permute.xlu1 %2208 }
 0x4ae   : > { %4259 = vmatprep.mubr.msk.bf16.mxu0 %vm835_vm4, %v2679_v37  ;;  %v5572_v52 = vadd.f32 %v5532_v25, %v2239_v9 }
 0x4af   : > { %4260 = vmatmul.mubr.msk.bf16.gmra.mrb[48].mxu0 %vm835_vm4, %v2680_v3  ;;  %2307 = vrot.lane.b32.xlu1 %v5560_v0, %s4663_s21 }
 0x4b1   : > { %2301 = vrot.lane.b32.xlu0 %v5566_v51, %s4663_s21 }
 0x4b2   : > { %v4245_v38 = vpop.f32.mrb[44].mxu1 }
 0x4b3   : > { %v2047_v31 = vmul.f32 %v4245_v38, %v5516_v15  ;;  %v2063_v12 = vadd.f32 %v4245_v38, %v5516_v15  ;;  %v1990_v17 = vpop.f32.mrb[45].mxu1  ;;  %2303 = vrot.lane.b32.xlu1 %v5572_v52, %s4663_s21 }
 0x4b4   : > { %v2045_v21 = vmul.f32 %v1990_v17, %v5518_v1  ;;  %v2061_v13 = vadd.f32 %v1990_v17, %v5518_v1  ;;  %v4246_v53 = vpop.f32.mrb[46].mxu1  ;;  %v2211_v1 = vpop.permute.xlu0 %2210 }
 0x4b5   : > { %v2244_v49 = vadd.f32 %v2207_v23, %v2063_v12  ;;  %v2048_v26 = vmul.f32 %v4246_v53, %v5520_v63  ;;  %v2064_v28 = vadd.f32 %v4246_v53, %v5520_v63  ;;  %v1993_v43 = vpop.f32.mrb[47].mxu1  ;;  %v2213_v63 = vpop.permute.xlu1 %2212 }
 0x4b6   : > { %v2046_v29 = vmul.f32 %v1993_v43, %v5522_v60  ;;  %v2062_v15 = vadd.f32 %v1993_v43, %v5522_v60  ;;  %v2242_v5 = vadd.f32 %v2203_v55, %v2061_v13 }
 0x4b7   : > { %v5587_v7 = vadd.f32 %v5532_v25, %v2244_v49  ;;  %v2245_v10 = vadd.f32 %v2209_v50, %v2064_v28  ;;  %v2682_v39 = vpack.c.bf16 %v2048_v26, %v2047_v31 }
 0x4b8   : > { %v2681_v36 = vpack.c.bf16 %v2046_v29, %v2045_v21  ;;  %v2243_v62 = vadd.f32 %v2205_v18, %v2062_v15  ;;  %v5596_v60 = vadd.f32 %v5532_v25, %v2242_v5  ;;  %v2215_v32 = vpop.permute.xlu0 %2214 }
 0x4b9   : > { %v5590_v35 = vadd.f32 %v5532_v25, %v2245_v10  ;;  %2313 = vrot.lane.b32.xlu0 %v5587_v7, %s4663_s21  ;;  %v2217_v2 = vpop.permute.xlu1 %2216 }
 0x4ba   : > { %4263 = vmatprep.mubr.msk.bf16.mxu0 %vm835_vm4, %v2681_v36  ;;  %v5602_v58 = vadd.f32 %v5532_v25, %v2243_v62 }
 0x4bb   : > { %4264 = vmatmul.mubr.msk.bf16.gmra.mrb[52].mxu0 %vm835_vm4, %v2682_v39  ;;  %2315 = vrot.lane.b32.xlu1 %v5590_v35, %s4663_s21 }
 0x4bc   : > { %v5640_v38 = vpop.permute.xlu0 %2642 }
 0x4bd   : > { %v4249_v41 = vpop.f32.mrb[48].mxu1  ;;  %2309 = vrot.lane.b32.xlu0 %v5596_v60, %s4663_s21  ;;  %v5638_v18 = vpop.permute.xlu1 %2618 }
 0x4be   : > { %v2051_v54 = vmul.f32 %v4249_v41, %v5524_v6  ;;  %v2067_v45 = vadd.f32 %v4249_v41, %v5524_v6  ;;  %v2006_v24 = vpop.f32.mrb[49].mxu1 }
 0x4bf   : > { %v2049_v47 = vmul.f32 %v2006_v24, %v5526_v19  ;;  %v2065_v33 = vadd.f32 %v2006_v24, %v5526_v19  ;;  %v4250_v42 = vpop.f32.mrb[50].mxu1  ;;  %2311 = vrot.lane.b32.xlu1 %v5602_v58, %s4663_s21 }
 0x4c0   : > { %v2248_v40 = vadd.f32 %v2215_v32, %v2067_v45  ;;  %v2052_v11 = vmul.f32 %v4250_v42, %v5528_v57  ;;  %v2068_v46 = vadd.f32 %v4250_v42, %v5528_v57  ;;  %v2009_v61 = vpop.f32.mrb[51].mxu1 }
 0x4c1   : > { %v2050_v22 = vmul.f32 %v2009_v61, %v5530_v48  ;;  %v2066_v6 = vadd.f32 %v2009_v61, %v5530_v48  ;;  %v2246_v20 = vadd.f32 %v2211_v1, %v2065_v33  ;;  %v5642_v23 = vpop.permute.xlu1 %3189  ;;  %v4000_v61 = vld [vmem:[%s6409_s6 + $0xa] ss:$0 sm:$0xff] }
 0x4c2   : > { %v5617_v59 = vadd.f32 %v5532_v25, %v2248_v40  ;;  %v2249_v19 = vadd.f32 %v2217_v2, %v2068_v46  ;;  %v2684_v3 = vpack.c.bf16 %v2052_v11, %v2051_v54 }
 0x4c3   : > { %v2683_v37 = vpack.c.bf16 %v2050_v22, %v2049_v47  ;;  %v2247_v9 = vadd.f32 %v2213_v63, %v2066_v6  ;;  %v5626_v57 = vadd.f32 %v5532_v25, %v2246_v20 }
 0x4c4   : > { %v5620_v55 = vadd.f32 %v5532_v25, %v2249_v19  ;;  %2321 = vrot.lane.b32.xlu0 %v5617_v59, %s4663_s21 }
 0x4c5   : > { %4267 = vmatprep.mubr.msk.bf16.mxu0 %vm835_vm4, %v2683_v37  ;;  %v5632_v48 = vadd.f32 %v5532_v25, %v2247_v9 }
 0x4c6   : > { %4268 = vmatmul.mubr.msk.bf16.gmra.mrb[56].mxu0 %vm835_vm4, %v2684_v3  ;;  %2323 = vrot.lane.b32.xlu1 %v5620_v55, %s4663_s21 }
 0x4c8   : > { %2317 = vrot.lane.b32.xlu0 %v5626_v57, %s4663_s21 }
 0x4ca   : > { %2319 = vrot.lane.b32.xlu1 %v5632_v48, %s4663_s21 }
 0x509   : > { %v2298_v31 = vpop.permute.xlu0 %2297 }
 0x50a   : > { %v2347_v12 = vsel %vm835_vm4, %v2298_v31, 0.0 }
 0x50b   : > { %v2300_v17 = vpop.permute.xlu1 %2299  ;;  %2348 = vadd.xlane.f32.xlu0 %v2347_v12 }
 0x50c   : > { %v2350_v50 = vsel %vm835_vm4, %v2300_v17, 0.0 }
 0x50d   : > { %v2294_v21 = vpop.permute.xlu0 %2293 }
 0x50e   : > { %v2341_v25 = vsel %vm835_vm4, %v2294_v21, 0.0 }
 0x50f   : > { %v2296_v13 = vpop.permute.xlu1 %2295  ;;  %2342 = vadd.xlane.f32.xlu0 %v2341_v25 }
 0x510   : > { %v2344_v53 = vsel %vm835_vm4, %v2296_v13, 0.0 }
 0x511   : > { %2345 = vadd.xlane.f32.xlu1 %v2344_v53 }
 0x513   : > { %2351 = vadd.xlane.f32.xlu0 %v2350_v50 }
 0x51f   : > { %v2306_v49 = vpop.permute.xlu0 %2305 }
 0x520   : > { %v2359_v26 = vsel %vm835_vm4, %v2306_v49, 0.0 }
 0x521   : > { %v2308_v28 = vpop.permute.xlu1 %2307  ;;  %2360 = vadd.xlane.f32.xlu1 %v2359_v26 }
 0x522   : > { %v2362_v43 = vsel %vm835_vm4, %v2308_v28, 0.0 }
 0x523   : > { %2363 = vadd.xlane.f32.xlu0 %v2362_v43  ;;  %v2302_v29 = vpop.permute.xlu0 %2301 }
 0x524   : > { %v2353_v15 = vsel %vm835_vm4, %v2302_v29, 0.0 }
 0x525   : > { %v2304_v5 = vpop.permute.xlu1 %2303  ;;  %2354 = vadd.xlane.f32.xlu1 %v2353_v15 }
 0x526   : > { %v2356_v10 = vsel %vm835_vm4, %v2304_v5, 0.0 }
 0x527   : > { %2357 = vadd.xlane.f32.xlu0 %v2356_v10 }
 0x52b   : > { %v2314_v39 = vpop.permute.xlu0 %2313 }
 0x52c   : > { %v2371_v36 = vsel %vm835_vm4, %v2314_v39, 0.0 }
 0x52d   : > { %v2316_v1 = vpop.permute.xlu1 %2315  ;;  %2372 = vadd.xlane.f32.xlu1 %v2371_v36 }
 0x52e   : > { %v2374_v62 = vsel %vm835_vm4, %v2316_v1, 0.0 }
 0x52f   : > { %2375 = vadd.xlane.f32.xlu0 %v2374_v62  ;;  %v2310_v63 = vpop.permute.xlu0 %2309 }
 0x530   : > { %v2365_v41 = vsel %vm835_vm4, %v2310_v63, 0.0 }
 0x531   : > { %v2312_v54 = vpop.permute.xlu1 %2311  ;;  %2366 = vadd.xlane.f32.xlu1 %v2365_v41 }
 0x532   : > { %v2368_v45 = vsel %vm835_vm4, %v2312_v54, 0.0 }
 0x533   : > { %2369 = vadd.xlane.f32.xlu0 %v2368_v45 }
 0x536   : > { %v2322_v24 = vpop.permute.xlu0 %2321 }
 0x537   : > { %v2383_v32 = vsel %vm835_vm4, %v2322_v24, 0.0 }
 0x538   : > { %v2324_v47 = vpop.permute.xlu1 %2323  ;;  %2384 = vadd.xlane.f32.xlu1 %v2383_v32 }
 0x539   : > { %v2386_v33 = vsel %vm835_vm4, %v2324_v47, 0.0 }
 0x53a   : > { %2387 = vadd.xlane.f32.xlu0 %v2386_v33  ;;  %v2318_v42 = vpop.permute.xlu0 %2317 }
 0x53b   : > { %v2377_v40 = vsel %vm835_vm4, %v2318_v42, 0.0 }
 0x53c   : > { %v2320_v11 = vpop.permute.xlu1 %2319  ;;  %2378 = vadd.xlane.f32.xlu1 %v2377_v40 }
 0x53d   : > { %v2380_v46 = vsel %vm835_vm4, %v2320_v11, 0.0 }
 0x53e   : > { %2381 = vadd.xlane.f32.xlu0 %v2380_v46 }
 0x56c   : > { %v4257_v2 = vpop.f32.mrb[44].mxu0 }
 0x56d   : > { %v5663_v22 = vadd.f32 %v4257_v2, %v4000_v61  ;;  %v2764_v6 = vpop.f32.mrb[45].mxu0 }
 0x56e   : > { %v4258_v20 = vpop.f32.mrb[46].mxu0  ;;  %v5665_v19 = vadd.f32 %v4000_v61, %v2764_v6 }
 0x56f   : > { %v5667_v3 = vadd.f32 %v4258_v20, %v4000_v61  ;;  %v2767_v37 = vpop.f32.mrb[47].mxu0  ;;  %v2835_v9 = vsel %vm835_vm4, %v5663_v22, 0.0 }
 0x570   : > { %2836 = vadd.xlane.f32.xlu1 %v2835_v9  ;;  %v5671_v31 = vadd.f32 %v4000_v61, %v2767_v37  ;;  %v2829_v17 = vsel %vm835_vm4, %v5665_v19, 0.0 }
 0x571   : > { %v2838_v12 = vsel %vm835_vm4, %v5667_v3, 0.0 }
 0x572   : > { %2839 = vadd.xlane.f32.xlu0 %v2838_v12  ;;  %v2832_v21 = vsel %vm835_vm4, %v5671_v31, 0.0 }
 0x574   : > { %2830 = vadd.xlane.f32.xlu1 %v2829_v17 }
 0x576   : > { %2833 = vadd.xlane.f32.xlu0 %v2832_v21 }
 0x582   : > { %v4261_v25 = vpop.f32.mrb[48].mxu0 }
 0x583   : > { %v5679_v13 = vadd.f32 %v4261_v25, %v4000_v61  ;;  %v2780_v53 = vpop.f32.mrb[49].mxu0 }
 0x584   : > { %v4262_v50 = vpop.f32.mrb[50].mxu0  ;;  %v5681_v49 = vadd.f32 %v4000_v61, %v2780_v53 }
 0x585   : > { %v5683_v26 = vadd.f32 %v4262_v50, %v4000_v61  ;;  %v2783_v28 = vpop.f32.mrb[51].mxu0  ;;  %v2847_v43 = vsel %vm835_vm4, %v5679_v13, 0.0 }
 0x586   : > { %2848 = vadd.xlane.f32.xlu1 %v2847_v43  ;;  %v5687_v29 = vadd.f32 %v4000_v61, %v2783_v28  ;;  %v2841_v5 = vsel %vm835_vm4, %v5681_v49, 0.0 }
 0x587   : > { %v2850_v15 = vsel %vm835_vm4, %v5683_v26, 0.0 }
 0x588   : > { %2851 = vadd.xlane.f32.xlu0 %v2850_v15  ;;  %v2844_v10 = vsel %vm835_vm4, %v5687_v29, 0.0 }
 0x58a   : > { %2842 = vadd.xlane.f32.xlu1 %v2841_v5 }
 0x58c   : > { %2845 = vadd.xlane.f32.xlu0 %v2844_v10 }
 0x58e   : > { %v4265_v39 = vpop.f32.mrb[52].mxu0 }
 0x58f   : > { %v5695_v36 = vadd.f32 %v4265_v39, %v4000_v61  ;;  %v2796_v1 = vpop.f32.mrb[53].mxu0 }
 0x590   : > { %v4266_v62 = vpop.f32.mrb[54].mxu0  ;;  %v5697_v63 = vadd.f32 %v4000_v61, %v2796_v1 }
 0x591   : > { %v5699_v41 = vadd.f32 %v4266_v62, %v4000_v61  ;;  %v2799_v54 = vpop.f32.mrb[55].mxu0  ;;  %v2859_v45 = vsel %vm835_vm4, %v5695_v36, 0.0 }
 0x592   : > { %2860 = vadd.xlane.f32.xlu1 %v2859_v45  ;;  %v5703_v24 = vadd.f32 %v4000_v61, %v2799_v54  ;;  %v2853_v47 = vsel %vm835_vm4, %v5697_v63, 0.0 }
 0x593   : > { %v2862_v32 = vsel %vm835_vm4, %v5699_v41, 0.0 }
 0x594   : > { %2863 = vadd.xlane.f32.xlu0 %v2862_v32  ;;  %v2856_v33 = vsel %vm835_vm4, %v5703_v24, 0.0 }
 0x596   : > { %2854 = vadd.xlane.f32.xlu1 %v2853_v47 }
 0x598   : > { %2857 = vadd.xlane.f32.xlu0 %v2856_v33  ;;  %v2349_v17 = vpop.xlane.xlu0 %2348 }
 0x599   : > { %v4269_v42 = vpop.f32.mrb[56].mxu0  ;;  %v2391_v50 = vmul.f32 0.03125, %v2349_v17 }
 0x59a   : > { %v5711_v40 = vadd.f32 %v4269_v42, %v4000_v61  ;;  %v2812_v11 = vpop.f32.mrb[57].mxu0 }
 0x59b   : > { %v4270_v46 = vpop.f32.mrb[58].mxu0  ;;  %v5713_v2 = vadd.f32 %v4000_v61, %v2812_v11  ;;  %v5728_v43 = vsub.f32 %v5535_v14, %v2391_v50 }
 0x59c   : > { %v5715_v6 = vadd.f32 %v4270_v46, %v4000_v61  ;;  %v2815_v20 = vpop.f32.mrb[59].mxu0  ;;  %v2871_v37 = vsel %vm835_vm4, %v5711_v40, 0.0  ;;  %v2343_v53 = vpop.xlane.xlu0 %2342 }
 0x59d   : > { %2872 = vadd.xlane.f32.xlu1 %v2871_v37  ;;  %v5719_v9 = vadd.f32 %v4000_v61, %v2815_v20  ;;  %v2865_v21 = vsel %vm835_vm4, %v5713_v2, 0.0  ;;  %v2389_v61 = vmul.f32 0.03125, %v2343_v53  ;;  %v2423_v39 = vmul.f32 %v5728_v43, %v5728_v43 }
 0x59e   : > { %v2874_v12 = vsel %vm835_vm4, %v5715_v6, 0.0  ;;  %v2346_v28 = vpop.xlane.xlu1 %2345 }
 0x59f   : > { %2875 = vadd.xlane.f32.xlu0 %v2874_v12  ;;  %v2868_v25 = vsel %vm835_vm4, %v5719_v9, 0.0  ;;  %v2390_v10 = vmul.f32 0.03125, %v2346_v28  ;;  %v5733_v1 = vsub.f32 %v5544_v56, %v2389_v61 }
 0x5a0   : > { %v2352_v15 = vpop.xlane.xlu0 %2351 }
 0x5a1   : > { %2866 = vadd.xlane.f32.xlu1 %v2865_v21  ;;  %v2392_v62 = vmul.f32 0.03125, %v2352_v15  ;;  %v5737_v45 = vsub.f32 %v5550_v44, %v2390_v10  ;;  %v2421_v14 = vmul.f32 %v5733_v1, %v5733_v1 }
 0x5a3   : > { %2869 = vadd.xlane.f32.xlu0 %v2868_v25  ;;  %v5742_v47 = vsub.f32 %v5538_v8, %v2392_v62  ;;  %v2422_v56 = vmul.f32 %v5737_v45, %v5737_v45 }
 0x5a5   : > { %v2424_v20 = vmul.f32 %v5742_v47, %v5742_v47 }
 0x5ae   : > { %v2361_v5 = vpop.xlane.xlu1 %2360 }
 0x5af   : > { %v2395_v32 = vmul.f32 0.03125, %v2361_v5 }
 0x5b0   : > { %v2364_v54 = vpop.xlane.xlu0 %2363 }
 0x5b1   : > { %v2396_v33 = vmul.f32 0.03125, %v2364_v54  ;;  %v5748_v46 = vsub.f32 %v5557_v16, %v2395_v32 }
 0x5b2   : > { %2457 = vrot.lane.b32.xlu1 %v2423_v39, %s4663_s21  ;;  %v2355_v42 = vpop.xlane.xlu1 %2354 }
 0x5b3   : > { %v2393_v44 = vmul.f32 0.03125, %v2355_v42  ;;  %v5753_v37 = vsub.f32 %v5560_v0, %v2396_v33  ;;  %v2427_v17 = vmul.f32 %v5748_v46, %v5748_v46 }
 0x5b4   : > { %v2358_v11 = vpop.xlane.xlu0 %2357 }
 0x5b5   : > { %v2394_v8 = vmul.f32 0.03125, %v2358_v11  ;;  %v5760_v21 = vsub.f32 %v5566_v51, %v2393_v44  ;;  %v2428_v25 = vmul.f32 %v5753_v37, %v5753_v37 }
 0x5b6   : > { %2453 = vrot.lane.b32.xlu1 %v2421_v14, %s4663_s21 }
 0x5b7   : > { %v5765_v53 = vsub.f32 %v5572_v52, %v2394_v8  ;;  %v2425_v61 = vmul.f32 %v5760_v21, %v5760_v21 }
 0x5b9   : > { %2455 = vrot.lane.b32.xlu0 %v2422_v56, %s4663_s21  ;;  %v2426_v5 = vmul.f32 %v5765_v53, %v5765_v53 }
 0x5ba   : > { %v2373_v12 = vpop.xlane.xlu1 %2372  ;;  %2459 = vrot.lane.b32.xlu1 %v2424_v20, %s4663_s21 }
 0x5bb   : > { %v2399_v16 = vmul.f32 0.03125, %v2373_v12 }
 0x5bc   : > { %v2376_v0 = vpop.xlane.xlu0 %2375 }
 0x5bd   : > { %v2400_v50 = vmul.f32 0.03125, %v2376_v0  ;;  %2465 = vrot.lane.b32.xlu0 %v2427_v17, %s4663_s21  ;;  %v5772_v51 = vsub.f32 %v5587_v7, %v2399_v16 }
 0x5be   : > { %v2367_v28 = vpop.xlane.xlu1 %2366  ;;  %2467 = vrot.lane.b32.xlu1 %v2428_v25, %s4663_s21 }
 0x5bf   : > { %v2397_v15 = vmul.f32 0.03125, %v2367_v28  ;;  %v5777_v52 = vsub.f32 %v5590_v35, %v2400_v50  ;;  %v2431_v62 = vmul.f32 %v5772_v51, %v5772_v51 }
 0x5c0   : > { %v2370_v10 = vpop.xlane.xlu0 %2369 }
 0x5c1   : > { %v2398_v39 = vmul.f32 0.03125, %v2370_v10  ;;  %2461 = vrot.lane.b32.xlu0 %v2425_v61, %s4663_s21  ;;  %v5784_v54 = vsub.f32 %v5596_v60, %v2397_v15  ;;  %v2432_v7 = vmul.f32 %v5777_v52, %v5777_v52 }
 0x5c2   : > { %2463 = vrot.lane.b32.xlu1 %v2426_v5, %s4663_s21 }
 0x5c3   : > { %v5789_v32 = vsub.f32 %v5602_v58, %v2398_v39  ;;  %v2429_v33 = vmul.f32 %v5784_v54, %v5784_v54 }
 0x5c5   : > { %2473 = vrot.lane.b32.xlu0 %v2431_v62, %s4663_s21  ;;  %v2385_v35 = vpop.xlane.xlu1 %2384  ;;  %v2430_v60 = vmul.f32 %v5789_v32, %v5789_v32 }
 0x5c6   : > { %v2403_v14 = vmul.f32 0.03125, %v2385_v35  ;;  %2475 = vrot.lane.b32.xlu1 %v2432_v7, %s4663_s21 }
 0x5c7   : > { %v2388_v42 = vpop.xlane.xlu0 %2387 }
 0x5c8   : > { %v5798_v11 = vsub.f32 %v5617_v59, %v2403_v14  ;;  %v2404_v56 = vmul.f32 0.03125, %v2388_v42 }
 0x5c9   : > { %2469 = vrot.lane.b32.xlu0 %v2429_v33, %s4663_s21  ;;  %v2379_v58 = vpop.xlane.xlu1 %2378 }
 0x5ca   : > { %v2435_v44 = vmul.f32 %v5798_v11, %v5798_v11  ;;  %v5804_v20 = vsub.f32 %v5620_v55, %v2404_v56  ;;  %v2401_v8 = vmul.f32 0.03125, %v2379_v58  ;;  %2471 = vrot.lane.b32.xlu1 %v2430_v60, %s4663_s21 }
 0x5cb   : > { %v2382_v12 = vpop.xlane.xlu0 %2381 }
 0x5cc   : > { %v2436_v17 = vmul.f32 %v5804_v20, %v5804_v20  ;;  %v5810_v59 = vsub.f32 %v5626_v57, %v2401_v8  ;;  %v2402_v16 = vmul.f32 0.03125, %v2382_v12 }
 0x5cd   : > { %2481 = vrot.lane.b32.xlu0 %v2435_v44, %s4663_s21 }
 0x5ce   : > { %v2433_v25 = vmul.f32 %v5810_v59, %v5810_v59  ;;  %v5816_v0 = vsub.f32 %v5632_v48, %v2402_v16  ;;  %2483 = vrot.lane.b32.xlu1 %v2436_v17, %s4663_s21 }
 0x5d0   : > { %v2434_v55 = vmul.f32 %v5816_v0, %v5816_v0 }
 0x5d1   : > { %2477 = vrot.lane.b32.xlu0 %v2433_v25, %s4663_s21 }
 0x5d2   : > { %2479 = vrot.lane.b32.xlu1 %v2434_v55, %s4663_s21 }
 0x5fd   : > { %v2837_v57 = vpop.xlane.xlu1 %2836 }
 0x5fe   : > { %v2879_v50 = vmul.f32 0.03125, %v2837_v57 }
 0x5ff   : > { %v2840_v28 = vpop.xlane.xlu0 %2839 }
 0x600   : > { %v5824_v61 = vsub.f32 %v5663_v22, %v2879_v50  ;;  %v2880_v15 = vmul.f32 0.03125, %v2840_v28 }
 0x601   : > { %v2831_v5 = vpop.xlane.xlu1 %2830 }
 0x602   : > { %v2877_v10 = vmul.f32 0.03125, %v2831_v5  ;;  %v2911_v48 = vmul.f32 %v5824_v61, %v5824_v61  ;;  %v5829_v62 = vsub.f32 %v5667_v3, %v2880_v15 }
 0x603   : > { %v2834_v39 = vpop.xlane.xlu0 %2833 }
 0x604   : > { %v5832_v7 = vsub.f32 %v5665_v19, %v2877_v10  ;;  %v2878_v35 = vmul.f32 0.03125, %v2834_v39  ;;  %v2931_v14 = vsel %vm835_vm4, %v2911_v48, 0.0  ;;  %v2912_v60 = vmul.f32 %v5829_v62, %v5829_v62 }
 0x605   : > { %2932 = vadd.xlane.f32.xlu0 %v2931_v14 }
 0x606   : > { %v2909_v22 = vmul.f32 %v5832_v7, %v5832_v7  ;;  %v5838_v33 = vsub.f32 %v5671_v31, %v2878_v35  ;;  %v2934_v3 = vsel %vm835_vm4, %v2912_v60, 0.0 }
 0x608   : > { %v2925_v42 = vsel %vm835_vm4, %v2909_v22, 0.0  ;;  %v2910_v19 = vmul.f32 %v5838_v33, %v5838_v33 }
 0x609   : > { %2926 = vadd.xlane.f32.xlu0 %v2925_v42 }
 0x60a   : > { %v2928_v56 = vsel %vm835_vm4, %v2910_v19, 0.0 }
 0x60d   : > { %2935 = vadd.xlane.f32.xlu0 %v2934_v3 }
 0x611   : > { %2929 = vadd.xlane.f32.xlu0 %v2928_v56 }
 0x613   : > { %v2849_v58 = vpop.xlane.xlu1 %2848 }
 0x615   : > { %v5847_v44 = vpop.xlane.xlu0 %2851 }
 0x617   : > { %v2843_v31 = vpop.xlane.xlu1 %2842 }
 0x619   : > { %v2846_v8 = vpop.xlane.xlu0 %2845 }
 0x61f   : > { %v2861_v12 = vpop.xlane.xlu1 %2860 }
 0x621   : > { %v5849_v17 = vpop.xlane.xlu0 %2863 }
 0x623   : > { %v2855_v16 = vpop.xlane.xlu1 %2854 }
 0x625   : > { %v5851_v25 = vpop.xlane.xlu0 %2857 }
 0x62a   : > { %v5853_v55 = vpop.xlane.xlu1 %2872 }
 0x62c   : > { %v5855_v57 = vpop.xlane.xlu0 %2875 }
 0x62e   : > { %v2867_v50 = vpop.xlane.xlu1 %2866 }
 0x630   : > { %v5857_v28 = vpop.xlane.xlu0 %2869 }
 0x632   : > { %v2458_v15 = vpop.permute.xlu1 %2457 }
 0x633   : > { %v2507_v5 = vsel %vm835_vm4, %v2458_v15, 0.0 }
 0x634   : > { %2508 = vadd.xlane.f32.xlu0 %v2507_v5  ;;  %v2456_v10 = vpop.permute.xlu0 %2455 }
 0x635   : > { %v2504_v48 = vsel %vm835_vm4, %v2456_v10, 0.0 }
 0x636   : > { %v2454_v39 = vpop.permute.xlu1 %2453  ;;  %2505 = vadd.xlane.f32.xlu1 %v2504_v48 }
 0x637   : > { %v2501_v35 = vsel %vm835_vm4, %v2454_v39, 0.0 }
 0x638   : > { %2502 = vadd.xlane.f32.xlu0 %v2501_v35  ;;  %v2466_v14 = vpop.permute.xlu0 %2465 }
 0x639   : > { %v2519_v22 = vsel %vm835_vm4, %v2466_v14, 0.0  ;;  %v2882_v14 = vmul.f32 0.03125, %v2846_v8 }
 0x63a   : > { %v2460_v42 = vpop.permute.xlu1 %2459  ;;  %2520 = vadd.xlane.f32.xlu1 %v2519_v22 }
 0x63b   : > { %v2510_v60 = vsel %vm835_vm4, %v2460_v42, 0.0 }
 0x63c   : > { %2511 = vadd.xlane.f32.xlu0 %v2510_v60  ;;  %v2462_v3 = vpop.permute.xlu0 %2461 }
 0x63d   : > { %v2513_v19 = vsel %vm835_vm4, %v2462_v3, 0.0 }
 0x63e   : > { %v2468_v56 = vpop.permute.xlu1 %2467  ;;  %2514 = vadd.xlane.f32.xlu1 %v2513_v19  ;;  %v5871_v19 = vsub.f32 %v5687_v29, %v2882_v14 }
 0x63f   : > { %v2522_v15 = vsel %vm835_vm4, %v2468_v56, 0.0  ;;  %v2885_v56 = vmul.f32 0.03125, %v2855_v16  ;;  %v2883_v16 = vmul.f32 0.03125, %v2849_v58 }
 0x640   : > { %2523 = vadd.xlane.f32.xlu0 %v2522_v15  ;;  %v2474_v5 = vpop.permute.xlu0 %2473  ;;  %v2914_v29 = vmul.f32 %v5871_v19, %v5871_v19 }
 0x641   : > { %v2531_v10 = vsel %vm835_vm4, %v2474_v5, 0.0 }
 0x642   : > { %v2464_v48 = vpop.permute.xlu1 %2463  ;;  %2532 = vadd.xlane.f32.xlu1 %v2531_v10  ;;  %v2881_v10 = vmul.f32 0.03125, %v2843_v31 }
 0x643   : > { %v2516_v39 = vsel %vm835_vm4, %v2464_v48, 0.0 }
 0x644   : > { %2517 = vadd.xlane.f32.xlu0 %v2516_v39  ;;  %v2470_v35 = vpop.permute.xlu0 %2469  ;;  %v2887_v39 = vmul.f32 0.03125, %v2861_v12  ;;  %v2889_v12 = vmul.f32 0.03125, %v2867_v50 }
 0x645   : > { %v2525_v22 = vsel %vm835_vm4, %v2470_v35, 0.0  ;;  %v5876_v35 = vsub.f32 %v5697_v63, %v2885_v56  ;;  %v2940_v63 = vsel %vm835_vm4, %v2914_v29, 0.0 }
 0x646   : > { %v2476_v42 = vpop.permute.xlu1 %2475  ;;  %2526 = vadd.xlane.f32.xlu1 %v2525_v22  ;;  %v5900_v50 = vsub.f32 %v5713_v2, %v2889_v12 }
 0x647   : > { %v2534_v60 = vsel %vm835_vm4, %v2476_v42, 0.0  ;;  %v5882_v42 = vsub.f32 %v5681_v49, %v2881_v10  ;;  %v2884_v49 = vmul.f32 0.03125, %v5847_v44  ;;  %v2886_v44 = vmul.f32 0.03125, %v5851_v25 }
 0x648   : > { %2535 = vadd.xlane.f32.xlu0 %v2534_v60  ;;  %v2482_v3 = vpop.permute.xlu0 %2481  ;;  %v5886_v60 = vsub.f32 %v5695_v36, %v2887_v39  ;;  %v2891_v36 = vmul.f32 0.03125, %v5853_v55 }
 0x649   : > { %v2543_v15 = vsel %vm835_vm4, %v2482_v3, 0.0  ;;  %v2917_v3 = vmul.f32 %v5876_v35, %v5876_v35  ;;  %v5920_v29 = vsub.f32 %v5703_v24, %v2886_v44 }
 0x64a   : > { %v2472_v5 = vpop.permute.xlu1 %2471  ;;  %2544 = vadd.xlane.f32.xlu1 %v2543_v15  ;;  %v5892_v15 = vsub.f32 %v5679_v13, %v2883_v16  ;;  %v5906_v13 = vsub.f32 %v5683_v26, %v2884_v49  ;;  %v5913_v2 = vsub.f32 %v5711_v40, %v2891_v36  ;;  %v2888_v26 = vmul.f32 0.03125, %v5849_v17 }
 0x64b   : > { %v2528_v48 = vsel %vm835_vm4, %v2472_v5, 0.0  ;;  %v2913_v5 = vmul.f32 %v5882_v42, %v5882_v42  ;;  %v2949_v10 = vsel %vm835_vm4, %v2917_v3, 0.0  ;;  %v2890_v17 = vmul.f32 0.03125, %v5857_v28 }
 0x64c   : > { %2529 = vadd.xlane.f32.xlu0 %v2528_v48  ;;  %v2478_v8 = vpop.permute.xlu0 %2477  ;;  %v2919_v48 = vmul.f32 %v5886_v60, %v5886_v60  ;;  %v2915_v39 = vmul.f32 %v5892_v15, %v5892_v15  ;;  %v2923_v16 = vmul.f32 %v5913_v2, %v5913_v2  ;;  %v2918_v12 = vmul.f32 %v5920_v29, %v5920_v29 }
 0x64d   : > { %v2537_v22 = vsel %vm835_vm4, %v2478_v8, 0.0  ;;  %v2937_v8 = vsel %vm835_vm4, %v2913_v5, 0.0  ;;  %v2892_v3 = vmul.f32 0.03125, %v5855_v57 }
 0x64e   : > { %v2484_v14 = vpop.permute.xlu1 %2483  ;;  %2538 = vadd.xlane.f32.xlu1 %v2537_v22  ;;  %v2955_v55 = vsel %vm835_vm4, %v2919_v48, 0.0  ;;  %v2921_v22 = vmul.f32 %v5900_v50, %v5900_v50  ;;  %v2943_v25 = vsel %vm835_vm4, %v2915_v39, 0.0  ;;  %v2952_v49 = vsel %vm835_vm4, %v2918_v12, 0.0 }
 0x64f   : > { %v2546_v31 = vsel %vm835_vm4, %v2484_v14, 0.0  ;;  %v2916_v14 = vmul.f32 %v5906_v13, %v5906_v13  ;;  %v5944_v28 = vsub.f32 %v5715_v6, %v2892_v3 }
 0x650   : > { %2547 = vadd.xlane.f32.xlu0 %v2546_v31  ;;  %v2961_v40 = vsel %vm835_vm4, %v2921_v22, 0.0  ;;  %v5929_v31 = vsub.f32 %v5699_v41, %v2888_v26 }
 0x651   : > { %v2946_v24 = vsel %vm835_vm4, %v2916_v14, 0.0 }
 0x652   : > { %v2480_v56 = vpop.permute.xlu1 %2479  ;;  %2941 = vadd.xlane.f32.xlu1 %v2940_v63  ;;  %v2967_v63 = vsel %vm835_vm4, %v2923_v16, 0.0  ;;  %v2920_v41 = vmul.f32 %v5929_v31, %v5929_v31 }
 0x653   : > { %v2540_v58 = vsel %vm835_vm4, %v2480_v56, 0.0  ;;  %v5938_v56 = vsub.f32 %v5719_v9, %v2890_v17  ;;  %v2924_v9 = vmul.f32 %v5944_v28, %v5944_v28 }
 0x654   : > { %2541 = vadd.xlane.f32.xlu0 %v2540_v58  ;;  %v2958_v58 = vsel %vm835_vm4, %v2920_v41, 0.0 }
 0x655   : > { %v2922_v5 = vmul.f32 %v5938_v56, %v5938_v56  ;;  %v2970_v36 = vsel %vm835_vm4, %v2924_v9, 0.0 }
 0x656   : > { %2950 = vadd.xlane.f32.xlu1 %v2949_v10 }
 0x657   : > { %v2964_v57 = vsel %vm835_vm4, %v2922_v5, 0.0 }
 0x658   : > { %2938 = vadd.xlane.f32.xlu0 %v2937_v8 }
 0x65a   : > { %2956 = vadd.xlane.f32.xlu1 %v2955_v55 }
 0x65c   : > { %2944 = vadd.xlane.f32.xlu0 %v2943_v25 }
 0x65e   : > { %2962 = vadd.xlane.f32.xlu1 %v2961_v40 }
 0x660   : > { %2947 = vadd.xlane.f32.xlu0 %v2946_v24 }
 0x662   : > { %2968 = vadd.xlane.f32.xlu1 %v2967_v63 }
 0x664   : > { %2953 = vadd.xlane.f32.xlu0 %v2952_v49 }
 0x668   : > { %2959 = vadd.xlane.f32.xlu0 %v2958_v58 }
 0x66c   : > { %2965 = vadd.xlane.f32.xlu0 %v2964_v57 }
 0x670   : > { %2971 = vadd.xlane.f32.xlu0 %v2970_v36 }
 0x692   : > { %v5953_v10 = vpop.xlane.xlu0 %2932 }
 0x696   : > { %v5955_v48 = vpop.xlane.xlu0 %2926 }
 0x69a   : > { %v5957_v6 = vpop.xlane.xlu0 %2935 }
 0x69e   : > { %v5959_v44 = vpop.xlane.xlu0 %2929 }
 0x6c1   : > { %v2509_v8 = vpop.xlane.xlu0 %2508 }
 0x6c2   : > { %v2551_v39 = vmul.f32 0.03125, %v2509_v8 }
 0x6c3   : > { %v2506_v55 = vpop.xlane.xlu1 %2505 }
 0x6c4   : > { %v2567_v22 = vadd.f32 1e-05, %v2551_v39  ;;  %v2550_v26 = vmul.f32 0.03125, %v2506_v55 }
 0x6c5   : > { %v2503_v25 = vpop.xlane.xlu0 %2502 }
 0x6c6   : > { %4473 = vrsqrt.f32 %v2567_v22  ;;  %v2566_v14 = vadd.f32 1e-05, %v2550_v26  ;;  %v2549_v40 = vmul.f32 0.03125, %v2503_v25 }
 0x6c7   : > { %v2521_v16 = vpop.xlane.xlu1 %2520 }
 0x6c8   : > { %4475 = vrsqrt.f32 %v2566_v14  ;;  %v2565_v17 = vadd.f32 1e-05, %v2549_v40  ;;  %v2555_v24 = vmul.f32 0.03125, %v2521_v16 }
 0x6c9   : > { %v2512_v12 = vpop.xlane.xlu0 %2511 }
 0x6ca   : > { %4477 = vrsqrt.f32 %v2565_v17  ;;  %v2571_v63 = vadd.f32 1e-05, %v2555_v24  ;;  %v2552_v3 = vmul.f32 0.03125, %v2512_v12 }
 0x6cb   : > { %v2515_v49 = vpop.xlane.xlu1 %2514 }
 0x6cc   : > { %4479 = vrsqrt.f32 %v2571_v63  ;;  %v2568_v41 = vadd.f32 1e-05, %v2552_v3  ;;  %v2553_v58 = vmul.f32 0.03125, %v2515_v49 }
 0x6cd   : > { %v2524_v5 = vpop.xlane.xlu0 %2523 }
 0x6ce   : > { %4481 = vrsqrt.f32 %v2568_v41  ;;  %v2569_v57 = vadd.f32 1e-05, %v2553_v58  ;;  %v2556_v9 = vmul.f32 0.03125, %v2524_v5 }
 0x6cf   : > { %v2533_v36 = vpop.xlane.xlu1 %2532 }
 0x6d0   : > { %v4474_v8 = vpop.eup %4473  ;;  %4483 = vrsqrt.f32 %v2569_v57  ;;  %v2572_v39 = vadd.f32 1e-05, %v2556_v9  ;;  %v2559_v55 = vmul.f32 0.03125, %v2533_v36 }
 0x6d1   : > { %v2599_v22 = vmul.f32 %v4474_v8, %v5728_v43  ;;  %v2518_v26 = vpop.xlane.xlu0 %2517 }
 0x6d2   : > { %v4476_v25 = vpop.eup %4475  ;;  %4485 = vrsqrt.f32 %v2572_v39  ;;  %v2575_v14 = vadd.f32 1e-05, %v2559_v55  ;;  %v2554_v40 = vmul.f32 0.03125, %v2518_v26 }
 0x6d3   : > { %v2598_v16 = vmul.f32 %v4476_v25, %v5737_v45  ;;  %v2527_v17 = vpop.xlane.xlu1 %2526  ;;  %v2623_v24 = vmul.f32 %v5638_v18, %v2599_v22 }
 0x6d4   : > { %v4478_v12 = vpop.eup %4477  ;;  %4487 = vrsqrt.f32 %v2575_v14  ;;  %v2570_v63 = vadd.f32 1e-05, %v2554_v40  ;;  %v2557_v3 = vmul.f32 0.03125, %v2527_v17 }
 0x6d5   : > { %v2597_v49 = vmul.f32 %v4478_v12, %v5733_v1  ;;  %v2536_v41 = vpop.xlane.xlu0 %2535  ;;  %v2647_v58 = vadd.f32 %v5640_v38, %v2623_v24  ;;  %v2622_v43 = vmul.f32 %v5638_v18, %v2598_v16 }
 0x6d6   : > { %v4480_v5 = vpop.eup %4479  ;;  %4489 = vrsqrt.f32 %v2570_v63  ;;  %v2573_v57 = vadd.f32 1e-05, %v2557_v3  ;;  %v2560_v9 = vmul.f32 0.03125, %v2536_v41 }
 0x6d7   : > { %v2603_v45 = vmul.f32 %v4480_v5, %v5748_v46  ;;  %v2545_v36 = vpop.xlane.xlu1 %2544  ;;  %v2663_v8 = vmax.f32 %v2647_v58, 0.0  ;;  %v2621_v39 = vmul.f32 %v5638_v18, %v2597_v49  ;;  %v2646_v55 = vadd.f32 %v5640_v38, %v2622_v43 }
 0x6d8   : > { %v4482_v22 = vpop.eup %4481  ;;  %4491 = vrsqrt.f32 %v2573_v57  ;;  %v2576_v1 = vadd.f32 1e-05, %v2560_v9  ;;  %v2563_v26 = vmul.f32 0.03125, %v2545_v36 }
 0x6d9   : > { %v2600_v25 = vmul.f32 %v4482_v22, %v5742_v47  ;;  %v2530_v14 = vpop.xlane.xlu0 %2529  ;;  %v3194_v40 = vmul.f32 %v5642_v23, %v2663_v8  ;;  %v2645_v16 = vadd.f32 %v5640_v38, %v2621_v39  ;;  %v2627_v12 = vmul.f32 %v5638_v18, %v2603_v45 }
 0x6da   : > { %v4484_v17 = vpop.eup %4483  ;;  %4493 = vrsqrt.f32 %v2576_v1  ;;  %v2579_v46 = vadd.f32 1e-05, %v2563_v26  ;;  %v2558_v24 = vmul.f32 0.03125, %v2530_v14  ;;  %v2662_v41 = vmax.f32 %v2646_v55, 0.0 }
 0x6db   : > { %v2601_v63 = vmul.f32 %v4484_v17, %v5760_v21  ;;  %v2539_v3 = vpop.xlane.xlu1 %2538  ;;  %3228 = vrot.lane.b32.xlu1 %v3194_v40, %s4663_s21  ;;  %v2661_v49 = vmax.f32 %v2645_v16, 0.0  ;;  %v2624_v47 = vmul.f32 %v5638_v18, %v2600_v25  ;;  %v2651_v57 = vadd.f32 %v5640_v38, %v2627_v12 }
 0x6dc   : > { %v4486_v58 = vpop.eup %4485  ;;  %4495 = vrsqrt.f32 %v2579_v46  ;;  %v2574_v43 = vadd.f32 1e-05, %v2558_v24  ;;  %v2561_v5 = vmul.f32 0.03125, %v2539_v3  ;;  %v3193_v16 = vmul.f32 %v5642_v23, %v2662_v41 }
 0x6dd   : > { %v2604_v9 = vmul.f32 %v4486_v58, %v5753_v37  ;;  %v2548_v36 = vpop.xlane.xlu0 %2547  ;;  %v3192_v45 = vmul.f32 %v5642_v23, %v2661_v49  ;;  %v2648_v21 = vadd.f32 %v5640_v38, %v2624_v47  ;;  %v2625_v8 = vmul.f32 %v5638_v18, %v2601_v63 }
 0x6de   : > { %v4488_v39 = vpop.eup %4487  ;;  %4497 = vrsqrt.f32 %v2574_v43  ;;  %v2577_v55 = vadd.f32 1e-05, %v2561_v5  ;;  %v2564_v22 = vmul.f32 0.03125, %v2548_v36  ;;  %v2667_v17 = vmax.f32 %v2651_v57, 0.0 }
 0x6df   : > { %v2607_v1 = vmul.f32 %v4488_v39, %v5772_v51  ;;  %3224 = vrot.lane.b32.xlu0 %v3192_v45, %s4663_s21  ;;  %v2664_v26 = vmax.f32 %v2648_v21, 0.0  ;;  %v2649_v25 = vadd.f32 %v5640_v38, %v2625_v8  ;;  %v2628_v37 = vmul.f32 %v5638_v18, %v2604_v9 }
 0x6e0   : > { %v4490_v14 = vpop.eup %4489  ;;  %4499 = vrsqrt.f32 %v2577_v55  ;;  %v2580_v40 = vadd.f32 1e-05, %v2564_v22  ;;  %v3198_v5 = vmul.f32 %v5642_v23, %v2667_v17 }
 0x6e1   : > { %v2602_v46 = vmul.f32 %v4490_v14, %v5765_v53  ;;  %v2542_v24 = vpop.xlane.xlu0 %2541  ;;  %v3195_v12 = vmul.f32 %v5642_v23, %v2664_v26  ;;  %v2665_v63 = vmax.f32 %v2649_v25, 0.0  ;;  %v2652_v51 = vadd.f32 %v5640_v38, %v2628_v37 }
 0x6e2   : > { %v4492_v3 = vpop.eup %4491  ;;  %4501 = vrsqrt.f32 %v2580_v40  ;;  %v2562_v49 = vmul.f32 0.03125, %v2542_v24  ;;  %v2631_v47 = vmul.f32 %v5638_v18, %v2607_v1 }
 0x6e3   : > { %v2605_v58 = vmul.f32 %v4492_v3, %v5784_v54  ;;  %3226 = vrot.lane.b32.xlu0 %v3193_v16, %s4663_s21  ;;  %3230 = vrot.lane.b32.xlu1 %v3195_v12, %s4663_s21  ;;  %v2626_v41 = vmul.f32 %v5638_v18, %v2602_v46  ;;  %v2668_v57 = vmax.f32 %v2652_v51, 0.0  ;;  %v3196_v45 = vmul.f32 %v5642_v23, %v2665_v63 }
 0x6e4   : > { %v4494_v53 = vpop.eup %4493  ;;  %v2578_v43 = vadd.f32 1e-05, %v2562_v49  ;;  %v2655_v9 = vadd.f32 %v5640_v38, %v2631_v47 }
 0x6e5   : > { %v2608_v36 = vmul.f32 %v4494_v53, %v5777_v52  ;;  %v2650_v21 = vadd.f32 %v5640_v38, %v2626_v41  ;;  %v2629_v54 = vmul.f32 %v5638_v18, %v2605_v58  ;;  %v3199_v26 = vmul.f32 %v5642_v23, %v2668_v57 }
 0x6e6   : > { %v4496_v8 = vpop.eup %4495  ;;  %4503 = vrsqrt.f32 %v2578_v43  ;;  %v2671_v25 = vmax.f32 %v2655_v9, 0.0  ;;  %v2974_v41 = vmul.f32 0.03125, %v5959_v44 }
 0x6e7   : > { %3232 = vrot.lane.b32.xlu0 %v3196_v45, %s4663_s21  ;;  %3236 = vrot.lane.b32.xlu1 %v3198_v5, %s4663_s21  ;;  %v2666_v39 = vmax.f32 %v2650_v21, 0.0  ;;  %v2653_v55 = vadd.f32 %v5640_v38, %v2629_v54  ;;  %v2632_v22 = vmul.f32 %v5638_v18, %v2608_v36  ;;  %v2611_v52 = vmul.f32 %v4496_v8, %v5798_v11 }
 0x6e8   : > { %v4498_v1 = vpop.eup %4497  ;;  %v3202_v11 = vmul.f32 %v5642_v23, %v2671_v25  ;;  %v2990_v36 = vadd.f32 1e-05, %v2974_v41 }
 0x6e9   : > { %v2606_v37 = vmul.f32 %v4498_v1, %v5789_v32  ;;  %v3197_v14 = vmul.f32 %v5642_v23, %v2666_v39  ;;  %v2669_v40 = vmax.f32 %v2653_v55, 0.0  ;;  %v2656_v16 = vadd.f32 %v5640_v38, %v2632_v22 }
 0x6ea   : > { %v4500_v17 = vpop.eup %4499  ;;  %v2635_v63 = vmul.f32 %v5638_v18, %v2611_v52  ;;  %4505 = vrsqrt.f32 %v2990_v36 }
 0x6eb   : > { %3238 = vrot.lane.b32.xlu1 %v3199_v26, %s4663_s21  ;;  %3234 = vrot.lane.b32.xlu0 %v3197_v14, %s4663_s21  ;;  %v2630_v46 = vmul.f32 %v5638_v18, %v2606_v37  ;;  %v2672_v12 = vmax.f32 %v2656_v16, 0.0  ;;  %v2609_v32 = vmul.f32 %v4500_v17, %v5810_v59  ;;  %v3200_v3 = vmul.f32 %v5642_v23, %v2669_v40  ;;  %v6053_v40 = vld [vmem:[%s6409_s6 + $0xc] ss:$0 sm:$0xff] }
 0x6ec   : > { %v4502_v24 = vpop.eup %4501  ;;  %v2659_v43 = vadd.f32 %v5640_v38, %v2635_v63  ;;  %v4664_v17 = vmov 3  }
 0x6ed   : > { %v2612_v51 = vmul.f32 %v4502_v24, %v5804_v20  ;;  %v2654_v49 = vadd.f32 %v5640_v38, %v2630_v46  ;;  %v3203_v53 = vmul.f32 %v5642_v23, %v2672_v12  ;;  %v2633_v57 = vmul.f32 %v5638_v18, %v2609_v32  ;;  %4379 = vset.pattern.permute.xlu1 %v4664_v17  ;;  %v6063_v24 = vld [vmem:[%s6409_s6 + $0xd] ss:$0 sm:$0xff] }
 0x6ee   : > { %v2675_v45 = vmax.f32 %v2659_v43, 0.0  ;;  %4380 = vset.pattern.permute.xlu0 %v4664_v17 }
 0x6ef   : > { %3244 = vrot.lane.b32.xlu1 %v3202_v11, %s4663_s21  ;;  %3240 = vrot.lane.b32.xlu0 %v3200_v3, %s4663_s21  ;;  %v2636_v47 = vmul.f32 %v5638_v18, %v2612_v51  ;;  %v2670_v20 = vmax.f32 %v2654_v49, 0.0  ;;  %v2657_v54 = vadd.f32 %v5640_v38, %v2633_v57  ;;  %v2939_v3 = vpop.xlane.xlu0 %2938 }
 0x6f0   : > { %v4504_v58 = vpop.eup %4503  ;;  %v3206_v39 = vmul.f32 %v5642_v23, %v2675_v45 }
 0x6f1   : > { %v2610_v59 = vmul.f32 %v4504_v58, %v5816_v0  ;;  %v2660_v5 = vadd.f32 %v5640_v38, %v2636_v47  ;;  %v3201_v21 = vmul.f32 %v5642_v23, %v2670_v20  ;;  %v2973_v0 = vmul.f32 0.03125, %v5955_v48  ;;  %v2942_v47 = vpop.xlane.xlu1 %2941 }
 0x6f2   : > { %v2673_v55 = vmax.f32 %v2657_v54, 0.0  ;;  %v2978_v57 = vmul.f32 0.03125, %v2942_v47 }
 0x6f3   : > { %3246 = vrot.lane.b32.xlu0 %v3203_v53, %s4663_s21  ;;  %v2676_v9 = vmax.f32 %v2660_v5, 0.0  ;;  %v2634_v8 = vmul.f32 %v5638_v18, %v2610_v59  ;;  %v2989_v1 = vadd.f32 1e-05, %v2973_v0  ;;  %v2945_v49 = vpop.xlane.xlu0 %2944  ;;  %v2976_v5 = vmul.f32 0.03125, %v5957_v6 }
 0x6f4   : > { %v3204_v52 = vmul.f32 %v5642_v23, %v2673_v55  ;;  %v4506_v25 = vpop.eup %4505 }
 0x6f5   : > { %v3207_v44 = vmul.f32 %v5642_v23, %v2676_v9  ;;  %v2658_v22 = vadd.f32 %v5640_v38, %v2634_v8  ;;  %4507 = vrsqrt.f32 %v2989_v1  ;;  %v3022_v48 = vmul.f32 %v4506_v25, %v5838_v33  ;;  %v6047_v38 = vld [vmem:[%s6409_s6 + $0xb] ss:$0 sm:$0xff]  ;;  %v2951_v41 = vpop.xlane.xlu1 %2950 }
 0x6f6   : > { %v2992_v36 = vadd.f32 1e-05, %v2976_v5 }
 0x6f7   : > { %3242 = vrot.lane.b32.xlu0 %v3201_v21, %s4663_s21  ;;  %3254 = vrot.lane.b32.xlu1 %v3207_v44, %s4663_s21  ;;  %v2674_v26 = vmax.f32 %v2658_v22, 0.0  ;;  %v3042_v14 = vmul.f32 %v6047_v38, %v3022_v48  ;;  %v2948_v58 = vpop.xlane.xlu0 %2947  ;;  %v2975_v21 = vmul.f32 0.03125, %v5953_v10  ;;  %v2994_v44 = vadd.f32 1e-05, %v2978_v57 }
 0x6f8   : > { %v2980_v54 = vmul.f32 0.03125, %v2948_v58  ;;  %4509 = vrsqrt.f32 %v2992_v36  ;;  %v2977_v22 = vmul.f32 0.03125, %v2939_v3  ;;  %v2979_v10 = vmul.f32 0.03125, %v2945_v49 }
 0x6f9   : > { %v3205_v18 = vmul.f32 %v5642_v23, %v2674_v26  ;;  %v3062_v16 = vadd.f32 %v6053_v40, %v3042_v14  ;;  %v2957_v43 = vpop.xlane.xlu1 %2956  ;;  %v2991_v55 = vadd.f32 1e-05, %v2975_v21  ;;  %4511 = vrsqrt.f32 %v2994_v44 }
 0x6fa   : > { %v2996_v1 = vadd.f32 1e-05, %v2980_v54  ;;  %v2983_v58 = vmul.f32 0.03125, %v2957_v43 }
 0x6fb   : > { %3252 = vrot.lane.b32.xlu0 %v3206_v39, %s4663_s21  ;;  %v3078_v46 = vmax.f32 %v3062_v16, 0.0  ;;  %v2954_v53 = vpop.xlane.xlu0 %2953  ;;  %4513 = vrsqrt.f32 %v2991_v55 }
 0x6fc   : > { %v2982_v6 = vmul.f32 0.03125, %v2954_v53  ;;  %4515 = vrsqrt.f32 %v2996_v1 }
 0x6fd   : > { %v3099_v12 = vmul.f32 %v6063_v24, %v3078_v46  ;;  %v6070_v20 = vpop.xlane.xlu1 %2962  ;;  %v2981_v46 = vmul.f32 0.03125, %v2951_v41 }
 0x6fe   : > { %v2998_v25 = vadd.f32 1e-05, %v2982_v6  ;;  %v2985_v43 = vmul.f32 0.03125, %v6070_v20 }
 0x6ff   : > { %3248 = vrot.lane.b32.xlu0 %v3204_v52, %s4663_s21  ;;  %v4508_v37 = vpop.eup %4507  ;;  %v3117_v63 = vsel %vm835_vm4, %v3099_v12, 0.0  ;;  %v2960_v59 = vpop.xlane.xlu0 %2959  ;;  %v2997_v47 = vadd.f32 1e-05, %v2981_v46 }
 0x700   : > { %v3021_v23 = vmul.f32 %v4508_v37, %v5832_v7  ;;  %v2984_v48 = vmul.f32 0.03125, %v2960_v59  ;;  %v3001_v20 = vadd.f32 1e-05, %v2985_v43 }
 0x701   : > { %v6073_v45 = vpop.xlane.xlu1 %2968 }
 0x702   : > { %v3041_v33 = vmul.f32 %v6047_v38, %v3021_v23 }
 0x703   : > { %3250 = vrot.lane.b32.xlu0 %v3205_v18, %s4663_s21  ;;  %v2966_v9 = vpop.xlane.xlu0 %2965  ;;  %v2993_v18 = vadd.f32 1e-05, %v2977_v22 }
 0x704   : > { %v3061_v11 = vadd.f32 %v6053_v40, %v3041_v33  ;;  %v4510_v33 = vpop.eup %4509 }
 0x705   : > { %4517 = vrsqrt.f32 %v2993_v18  ;;  %v4512_v12 = vpop.eup %4511  ;;  %v3024_v49 = vmul.f32 %v4510_v33, %v5829_v62  ;;  %v2999_v62 = vadd.f32 1e-05, %v2983_v58 }
 0x706   : > { %v3077_v7 = vmax.f32 %v3061_v11, 0.0  ;;  %v2995_v11 = vadd.f32 1e-05, %v2979_v10  ;;  %4519 = vrsqrt.f32 %v2998_v25  ;;  %v3026_v41 = vmul.f32 %v4512_v12, %v5871_v19  ;;  %v4514_v53 = vpop.eup %4513 }
 0x707   : > { %v2972_v8 = vpop.xlane.xlu0 %2971  ;;  %v4516_v21 = vpop.eup %4515  ;;  %v3044_v54 = vmul.f32 %v6047_v38, %v3024_v49 }
 0x708   : > { %v3098_v32 = vmul.f32 %v6063_v24, %v3077_v7  ;;  %v3000_v7 = vadd.f32 1e-05, %v2984_v48  ;;  %4521 = vrsqrt.f32 %v2995_v11  ;;  %v2988_v5 = vmul.f32 0.03125, %v2972_v8 }
 0x709   : > { %v3046_v19 = vmul.f32 %v6047_v38, %v3026_v41  ;;  %v3028_v1 = vmul.f32 %v4516_v21, %v5906_v13  ;;  %v3064_v18 = vadd.f32 %v6053_v40, %v3044_v54 }
 0x70a   : > { %v3114_v51 = vsel %vm835_vm4, %v3098_v32, 0.0  ;;  %4523 = vrsqrt.f32 %v3000_v7 }
 0x70b   : > { %4525 = vrsqrt.f32 %v2997_v47  ;;  %v3066_v10 = vadd.f32 %v6053_v40, %v3046_v19  ;;  %v3048_v13 = vmul.f32 %v6047_v38, %v3028_v1  ;;  %v3080_v46 = vmax.f32 %v3064_v18, 0.0 }
 0x70d   : > { %v3082_v12 = vmax.f32 %v3066_v10, 0.0  ;;  %v3101_v47 = vmul.f32 %v6063_v24, %v3080_v46 }
 0x70f   : > { %v4518_v8 = vpop.eup %4517 }
 0x710   : > { %v4520_v6 = vpop.eup %4519 }
 0x71b   : > { %3118 = vadd.xlane.f32.xlu1 %v3117_v63  ;;  %v2986_v63 = vmul.f32 0.03125, %v2966_v9 }
 0x71d   : > { %v3002_v59 = vadd.f32 1e-05, %v2986_v63 }
 0x71f   : > { %4527 = vrsqrt.f32 %v3002_v59 }
 0x720   : > { %4529 = vrsqrt.f32 %v2999_v62 }
 0x722   : > { %3115 = vadd.xlane.f32.xlu0 %v3114_v51 }
 0x74d   : > { %v3229_v0 = vpop.permute.xlu1 %3228 }
 0x74e   : > { %v3278_v39 = vsel %vm835_vm4, %v3229_v0, 0.0  ;;  %v3023_v0 = vmul.f32 %v4514_v53, %v5824_v61  ;;  %v2987_v61 = vmul.f32 0.03125, %v6073_v45  ;;  %v3103_v53 = vmul.f32 %v6063_v24, %v3082_v12 }
 0x74f   : > { %3279 = vadd.xlane.f32.xlu0 %v3278_v39  ;;  %v3004_v39 = vadd.f32 1e-05, %v2988_v5 }
 0x750   : > { %v3043_v25 = vmul.f32 %v6047_v38, %v3023_v0  ;;  %v3003_v45 = vadd.f32 1e-05, %v2987_v61 }
 0x751   : > { %v3225_v52 = vpop.permute.xlu0 %3224  ;;  %4531 = vrsqrt.f32 %v3004_v39 }
 0x752   : > { %v3272_v26 = vsel %vm835_vm4, %v3225_v52, 0.0  ;;  %4533 = vrsqrt.f32 %v3001_v20  ;;  %v3063_v7 = vadd.f32 %v6053_v40, %v3043_v25 }
 0x753   : > { %3273 = vadd.xlane.f32.xlu0 %v3272_v26  ;;  %4535 = vrsqrt.f32 %v3003_v45 }
 0x754   : > { %v3079_v59 = vmax.f32 %v3063_v7, 0.0 }
 0x755   : > { %v3231_v37 = vpop.permute.xlu1 %3230  ;;  %v3227_v14 = vpop.permute.xlu0 %3226 }
 0x756   : > { %v3281_v23 = vsel %vm835_vm4, %v3231_v37, 0.0  ;;  %v3275_v16 = vsel %vm835_vm4, %v3227_v14, 0.0  ;;  %v3030_v37 = vmul.f32 %v4520_v6, %v5920_v29  ;;  %v3025_v14 = vmul.f32 %v4518_v8, %v5882_v42 }
 0x757   : > { %3282 = vadd.xlane.f32.xlu0 %v3281_v23  ;;  %3276 = vadd.xlane.f32.xlu1 %v3275_v16  ;;  %v4522_v23 = vpop.eup %4521  ;;  %v3068_v29 = vadd.f32 %v6053_v40, %v3048_v13  ;;  %v3100_v0 = vmul.f32 %v6063_v24, %v3079_v59 }
 0x758   : > { %v4524_v11 = vpop.eup %4523  ;;  %v3050_v42 = vmul.f32 %v6047_v38, %v3030_v37 }
 0x759   : > { %v3237_v32 = vpop.permute.xlu1 %3236  ;;  %v3233_v51 = vpop.permute.xlu0 %3232  ;;  %v3032_v58 = vmul.f32 %v4524_v11, %v5929_v31  ;;  %v3084_v21 = vmax.f32 %v3068_v29, 0.0  ;;  %v3123_v31 = vsel %vm835_vm4, %v3101_v47, 0.0 }
 0x75a   : > { %v3290_v3 = vsel %vm835_vm4, %v3237_v32, 0.0  ;;  %v3284_v9 = vsel %vm835_vm4, %v3233_v51, 0.0  ;;  %v4526_v63 = vpop.eup %4525  ;;  %v3045_v51 = vmul.f32 %v6047_v38, %v3025_v14 }
 0x75b   : > { %3291 = vadd.xlane.f32.xlu0 %v3290_v3  ;;  %v3027_v3 = vmul.f32 %v4522_v23, %v5892_v15  ;;  %v4528_v41 = vpop.eup %4527  ;;  %v3029_v5 = vmul.f32 %v4526_v63, %v5876_v35  ;;  %v3052_v62 = vmul.f32 %v6047_v38, %v3032_v58  ;;  %v3129_v35 = vsel %vm835_vm4, %v3103_v53, 0.0 }
 0x75c   : > { %v3065_v15 = vadd.f32 %v6053_v40, %v3045_v51  ;;  %v3034_v43 = vmul.f32 %v4528_v41, %v5938_v56 }
 0x75d   : > { %v3239_v57 = vpop.permute.xlu1 %3238  ;;  %v3235_v36 = vpop.permute.xlu0 %3234  ;;  %v3049_v8 = vmul.f32 %v6047_v38, %v3029_v5  ;;  %v3072_v18 = vadd.f32 %v6053_v40, %v3052_v62 }
 0x75e   : > { %v3293_v44 = vsel %vm835_vm4, %v3239_v57, 0.0  ;;  %v3287_v52 = vsel %vm835_vm4, %v3235_v36, 0.0  ;;  %v4530_v57 = vpop.eup %4529  ;;  %v3081_v6 = vmax.f32 %v3065_v15, 0.0  ;;  %v3054_v20 = vmul.f32 %v6047_v38, %v3034_v43  ;;  %v6157_v15 = vld [vmem:[%s4735_s18] sm:$0xff] }
 0x75f   : > { %3294 = vadd.xlane.f32.xlu1 %v3293_v44  ;;  %3285 = vadd.xlane.f32.xlu0 %v3284_v9  ;;  %v3070_v9 = vadd.f32 %v6053_v40, %v3050_v42  ;;  %v3047_v44 = vmul.f32 %v6047_v38, %v3027_v3  ;;  %v4532_v19 = vpop.eup %4531  ;;  %v3031_v39 = vmul.f32 %v4530_v57, %v5886_v60  ;;  %v3120_v60 = vsel %vm835_vm4, %v3100_v0, 0.0 }
 0x760   : > { %v3036_v61 = vmul.f32 %v4532_v19, %v5944_v28  ;;  %v3069_v10 = vadd.f32 %v6053_v40, %v3049_v8  ;;  %v3102_v13 = vmul.f32 %v6063_v24, %v3081_v6  ;;  %v3074_v28 = vadd.f32 %v6053_v40, %v3054_v20  ;;  %v6164_v19 = vld [vmem:[%s4735_s18 + $0x8] sm:$0xff] }
 0x761   : > { %v3245_v55 = vpop.permute.xlu1 %3244  ;;  %v3241_v22 = vpop.permute.xlu0 %3240  ;;  %v3086_v1 = vmax.f32 %v3070_v9, 0.0  ;;  %v3051_v25 = vmul.f32 %v6047_v38, %v3031_v39 }
 0x762   : > { %v3302_v26 = vsel %vm835_vm4, %v3245_v55, 0.0  ;;  %v3296_v16 = vsel %vm835_vm4, %v3241_v22, 0.0  ;;  %v3105_v22 = vmul.f32 %v6063_v24, %v3084_v21  ;;  %v3056_v46 = vmul.f32 %v6047_v38, %v3036_v61 }
 0x763   : > { %3303 = vadd.xlane.f32.xlu0 %v3302_v26  ;;  %3288 = vadd.xlane.f32.xlu1 %v3287_v52  ;;  %v3067_v52 = vadd.f32 %v6053_v40, %v3047_v44  ;;  %v4534_v26 = vpop.eup %4533  ;;  %v3085_v11 = vmax.f32 %v3069_v10, 0.0  ;;  %v3071_v45 = vadd.f32 %v6053_v40, %v3051_v25  ;;  %v3126_v12 = vsel %vm835_vm4, %v3102_v13, 0.0 }
 0x764   : > { %v3033_v14 = vmul.f32 %v4534_v26, %v5900_v50  ;;  %v4536_v23 = vpop.eup %4535  ;;  %v3090_v42 = vmax.f32 %v3074_v28, 0.0  ;;  %v3076_v51 = vadd.f32 %v6053_v40, %v3056_v46  ;;  %v3566_v44 = vadd.f32 1.0, %v6157_v15 }
 0x765   : > { %v3247_v48 = vpop.permute.xlu0 %3246  ;;  %v3083_v37 = vmax.f32 %v3067_v52, 0.0  ;;  %v3035_v50 = vmul.f32 %v4536_v23, %v5913_v2  ;;  %v3106_v3 = vmul.f32 %v6063_v24, %v3085_v11  ;;  %v6178_v52 = vld [vmem:[%s4735_s18 + $0x28] sm:$0xff] }
 0x766   : > { %v3305_v33 = vsel %vm835_vm4, %v3247_v48, 0.0  ;;  %v3135_v48 = vsel %vm835_vm4, %v3105_v22, 0.0  ;;  %v3053_v63 = vmul.f32 %v6047_v38, %v3033_v14  ;;  %v3111_v53 = vmul.f32 %v6063_v24, %v3090_v42 }
 0x767   : > { %3297 = vadd.xlane.f32.xlu0 %v3296_v16  ;;  %3306 = vadd.xlane.f32.xlu1 %v3305_v33  ;;  %v3107_v16 = vmul.f32 %v6063_v24, %v3086_v1  ;;  %v3088_v33 = vmax.f32 %v3072_v18, 0.0  ;;  %v3104_v7 = vmul.f32 %v6063_v24, %v3083_v37  ;;  %v3055_v58 = vmul.f32 %v6047_v38, %v3035_v50 }
 0x768   : > { %v3073_v47 = vadd.f32 %v6053_v40, %v3053_v63  ;;  %v3092_v59 = vmax.f32 %v3076_v51, 0.0  ;;  %v3138_v5 = vsel %vm835_vm4, %v3106_v3, 0.0  ;;  %v6211_v3 = vld [vmem:[%s4735_s18 + $0x38] sm:$0xff] }
 0x769   : > { %v3243_v32 = vpop.permute.xlu0 %3242  ;;  %v3109_v29 = vmul.f32 %v6063_v24, %v3088_v33  ;;  %v3132_v2 = vsel %vm835_vm4, %v3104_v7, 0.0  ;;  %v3075_v38 = vadd.f32 %v6053_v40, %v3055_v58  ;;  %v3582_v40 = vmul.f32 %v6157_v15, %v3566_v44  ;;  %v3255_v11 = vpop.permute.xlu1 %3254  ;;  %v6216_v58 = vld [vmem:[%s4735_s18 + $0x40] sm:$0xff] }
 0x76a   : > { %v3299_v49 = vsel %vm835_vm4, %v3243_v32, 0.0  ;;  %v3141_v32 = vsel %vm835_vm4, %v3107_v16, 0.0  ;;  %v3113_v21 = vmul.f32 %v6063_v24, %v3092_v59  ;;  %v3089_v9 = vmax.f32 %v3073_v47, 0.0 }
 0x76b   : > { %3300 = vadd.xlane.f32.xlu1 %v3299_v49  ;;  %v3087_v49 = vmax.f32 %v3071_v45, 0.0  ;;  %v3147_v41 = vsel %vm835_vm4, %v3109_v29, 0.0  ;;  %v3091_v43 = vmax.f32 %v3075_v38, 0.0  ;;  %4537 = vrcp.f32 %v3582_v40  ;;  %v6206_v29 = vld [vmem:[%s4735_s18 + $0x20] sm:$0xff] }
 0x76c   : > { %v3110_v62 = vmul.f32 %v6063_v24, %v3089_v9  ;;  %v3317_v45 = vsel %vm835_vm4, %v3255_v11, 0.0  ;;  %v3570_v42 = vadd.f32 1.0, %v6206_v29 }
 0x76d   : > { %v3253_v36 = vpop.permute.xlu0 %3252  ;;  %v3108_v57 = vmul.f32 %v6063_v24, %v3087_v49  ;;  %v3112_v8 = vmul.f32 %v6063_v24, %v3091_v43  ;;  %v3571_v24 = vadd.f32 1.0, %v6178_v52  ;;  %v3573_v49 = vadd.f32 1.0, %v6211_v3  ;;  %v6237_v43 = vld [vmem:[%s6409_s6 + $0x10] ss:$0 sm:$0xff] }
 0x76e   : > { %v3314_v54 = vsel %vm835_vm4, %v3253_v36, 0.0  ;;  %v3153_v36 = vsel %vm835_vm4, %v3111_v53, 0.0  ;;  %v3150_v0 = vsel %vm835_vm4, %v3110_v62, 0.0  ;;  %v3586_v51 = vmul.f32 %v6206_v29, %v3570_v42  ;;  %v6221_v53 = vld [vmem:[%s4735_s18 + $0x58] sm:$0xff] }
 0x76f   : > { %3124 = vadd.xlane.f32.xlu1 %v3123_v31  ;;  %3315 = vadd.xlane.f32.xlu0 %v3314_v54  ;;  %v3159_v54 = vsel %vm835_vm4, %v3113_v21, 0.0  ;;  %v3144_v31 = vsel %vm835_vm4, %v3108_v57, 0.0  ;;  %v3156_v1 = vsel %vm835_vm4, %v3112_v8, 0.0  ;;  %v3587_v26 = vmul.f32 %v6178_v52, %v3571_v24  ;;  %v6225_v57 = vld [vmem:[%s4735_s18 + $0x60] sm:$0xff] }
 0x770   : > { %v3589_v47 = vmul.f32 %v6211_v3, %v3573_v49  ;;  %v3577_v59 = vadd.f32 1.0, %v6221_v53 }
 0x771   : > { %v3249_v55 = vpop.permute.xlu0 %3248 }
 0x772   : > { %v3308_v56 = vsel %vm835_vm4, %v3249_v55, 0.0  ;;  %v6172_v55 = vld [vmem:[%s4735_s18 + $0x10] sm:$0xff]  ;;  %v3593_v21 = vmul.f32 %v6221_v53, %v3577_v59 }
 0x773   : > { %3130 = vadd.xlane.f32.xlu1 %v3129_v35  ;;  %3309 = vadd.xlane.f32.xlu0 %v3308_v56  ;;  %v3567_v35 = vadd.f32 1.0, %v6164_v19  ;;  %v3568_v22 = vadd.f32 1.0, %v6172_v55  ;;  %v6183_v56 = vld [vmem:[%s4735_s18 + $0x30] sm:$0xff] }
 0x774   : > { %v3572_v18 = vadd.f32 1.0, %v6183_v56 }
 0x775   : > { %v3583_v39 = vmul.f32 %v6164_v19, %v3567_v35  ;;  %v3584_v6 = vmul.f32 %v6172_v55, %v3568_v22  ;;  %v4538_v20 = vpop.eup %4537  ;;  %v3251_v63 = vpop.permute.xlu0 %3250 }
 0x776   : > { %v3588_v61 = vmul.f32 %v6183_v56, %v3572_v18  ;;  %v3311_v50 = vsel %vm835_vm4, %v3251_v63, 0.0 }
 0x777   : > { %3136 = vadd.xlane.f32.xlu1 %v3135_v48  ;;  %3121 = vadd.xlane.f32.xlu0 %v3120_v60  ;;  %4539 = vrcp.f32 %v3583_v39  ;;  %v6188_v60 = vld [vmem:[%s4735_s18 + $0x48] sm:$0xff]  ;;  %v6192_v48 = vld [vmem:[%s4735_s18 + $0x50] sm:$0xff] }
 0x778   : > { %4541 = vrcp.f32 %v3584_v6  ;;  %v3575_v10 = vadd.f32 1.0, %v6188_v60  ;;  %v3576_v13 = vadd.f32 1.0, %v6192_v48 }
 0x779   : > { %4543 = vrcp.f32 %v3587_v26 }
 0x77a   : > { %4545 = vrcp.f32 %v3588_v61  ;;  %v3591_v37 = vmul.f32 %v6188_v60, %v3575_v10  ;;  %v3592_v23 = vmul.f32 %v6192_v48, %v3576_v13 }
 0x77b   : > { %3142 = vadd.xlane.f32.xlu1 %v3141_v32  ;;  %3127 = vadd.xlane.f32.xlu0 %v3126_v12  ;;  %v6200_v12 = vld [vmem:[%s4735_s18 + $0x18] sm:$0xff] }
 0x77c   : > { %4547 = vrcp.f32 %v3591_v37  ;;  %v3569_v7 = vadd.f32 1.0, %v6200_v12 }
 0x77d   : > { %4549 = vrcp.f32 %v3592_v23 }
 0x77e   : > { %v3585_v32 = vmul.f32 %v6200_v12, %v3569_v7 }
 0x77f   : > { %3148 = vadd.xlane.f32.xlu1 %v3147_v41  ;;  %3133 = vadd.xlane.f32.xlu0 %v3132_v2  ;;  %v3574_v41 = vadd.f32 1.0, %v6216_v58 }
 0x780   : > { %4551 = vrcp.f32 %v3585_v32 }
 0x781   : > { %v4540_v25 = vpop.eup %4539  ;;  %4553 = vrcp.f32 %v3586_v51  ;;  %v3590_v2 = vmul.f32 %v6216_v58, %v3574_v41 }
 0x782   : > { %v4542_v14 = vpop.eup %4541  ;;  %4555 = vrcp.f32 %v3589_v47 }
 0x783   : > { %3154 = vadd.xlane.f32.xlu1 %v3153_v36  ;;  %3139 = vadd.xlane.f32.xlu0 %v3138_v5  ;;  %v4544_v16 = vpop.eup %4543  ;;  %4557 = vrcp.f32 %v3590_v2  ;;  %v3578_v36 = vadd.f32 1.0, %v6225_v57 }
 0x784   : > { %v4546_v33 = vpop.eup %4545  ;;  %4559 = vrcp.f32 %v3593_v21  ;;  %v6253_v21 = vld [vmem:[%s6409_s6 + $0xf] ss:$0 sm:$0xff] }
 0x785   : > { %v3594_v44 = vmul.f32 %v6225_v57, %v3578_v36 }
 0x786   : > { %v4548_v28 = vpop.eup %4547 }
 0x787   : > { %3160 = vadd.xlane.f32.xlu1 %v3159_v54  ;;  %3145 = vadd.xlane.f32.xlu0 %v3144_v31  ;;  %v4550_v46 = vpop.eup %4549  ;;  %4561 = vrcp.f32 %v3594_v44 }
 0x78a   : > { %v4552_v5 = vpop.eup %4551 }
 0x78b   : > { %3151 = vadd.xlane.f32.xlu0 %v3150_v0  ;;  %v4554_v38 = vpop.eup %4553 }
 0x78c   : > { %v4556_v31 = vpop.eup %4555 }
 0x78d   : > { %v4558_v0 = vpop.eup %4557 }
 0x78e   : > { %v4560_v24 = vpop.eup %4559 }
 0x78f   : > { %3157 = vadd.xlane.f32.xlu0 %v3156_v1 }
 0x791   : > { %v4562_v10 = vpop.eup %4561 }
 0x798   : > { %3616 = vperm.xlu1 %4379, %v4538_v20  }
 0x79c   : > { %3621 = vperm.xlu1 %4379, %v4540_v25  }
 0x7a0   : > { %3626 = vperm.xlu1 %4379, %v4542_v14  }
 0x7a5   : > { %3641 = vperm.xlu0 %4380, %v4544_v16  }
 0x7a8   : > { %v6232_v62 = vpop.xlane.xlu1 %3118 }
 0x7a9   : > { %3646 = vperm.xlu0 %4380, %v4546_v33  }
 0x7ad   : > { %3661 = vperm.xlu0 %4380, %v4548_v28  }
 0x7af   : > { %v6229_v9 = vpop.xlane.xlu0 %3115 }
 0x7b0   : > { %v3167_v44 = vadd.f32 %v6253_v21, %v6229_v9 }
 0x7b1   : > { %3666 = vperm.xlu0 %4380, %v4550_v46  }
 0x7b5   : > { %4382 = vset.pattern.permute.xlu0 %v4659_v4 }
 0x7c4   : > { %3318 = vadd.xlane.f32.xlu1 %v3317_v45 }
 0x7c8   : > { %3312 = vadd.xlane.f32.xlu1 %v3311_v50 }
 0x7d9   : > { %3631 = vperm.xlu1 %4379, %v4552_v5  }
 0x7dc   : > { %v3280_v54 = vpop.xlane.xlu0 %3279 }
 0x7dd   : > { %3636 = vperm.xlu1 %4379, %v4554_v38   ;;  %v3327_v8 = vadd.f32 %v6237_v43, %v3280_v54 }
 0x7df   : > { %v4019_v26 = vmul.f32 -1.442695, %v3327_v8 }
 0x7e0   : > { %v3274_v35 = vpop.xlane.xlu0 %3273 }
 0x7e1   : > { %v3325_v40 = vadd.f32 %v6237_v43, %v3274_v35  ;;  %3651 = vperm.xlu1 %4379, %v4556_v31  }
 0x7e3   : > { %v4017_v39 = vmul.f32 -1.442695, %v3325_v40 }
 0x7e4   : > { %v3277_v22 = vpop.xlane.xlu1 %3276  ;;  %v3283_v1 = vpop.xlane.xlu0 %3282 }
 0x7e5   : > { %4563 = vpow2.f32 %v4017_v39  ;;  %v3328_v6 = vadd.f32 %v6237_v43, %v3283_v1  ;;  %3656 = vperm.xlu1 %4379, %v4558_v0   ;;  %v3326_v18 = vadd.f32 %v6237_v43, %v3277_v22 }
 0x7e6   : > { %4565 = vpow2.f32 %v4019_v26 }
 0x7e7   : > { %v4020_v61 = vmul.f32 -1.442695, %v3328_v6  ;;  %v4018_v25 = vmul.f32 -1.442695, %v3326_v18 }
 0x7e8   : > { %v3292_v20 = vpop.xlane.xlu0 %3291 }
 0x7e9   : > { %3671 = vperm.xlu1 %4379, %v4560_v24   ;;  %v3331_v13 = vadd.f32 %v6237_v43, %v3292_v20  ;;  %4567 = vpow2.f32 %v4020_v61 }
 0x7ea   : > { %4569 = vpow2.f32 %v4018_v25 }
 0x7eb   : > { %v4023_v33 = vmul.f32 -1.442695, %v3331_v13 }
 0x7ec   : > { %v3295_v37 = vpop.xlane.xlu1 %3294  ;;  %v3286_v14 = vpop.xlane.xlu0 %3285 }
 0x7ed   : > { %3676 = vperm.xlu1 %4379, %v4562_v10   ;;  %v3329_v45 = vadd.f32 %v6237_v43, %v3286_v14  ;;  %v3332_v32 = vadd.f32 %v6237_v43, %v3295_v37  ;;  %v6261_v14 = vld [vmem:[%s4735_s18 + $0x68] sm:$0xff] }
 0x7ef   : > { %v4564_v23 = vpop.eup %4563  ;;  %v4021_v51 = vmul.f32 -1.442695, %v3329_v45  ;;  %v4024_v5 = vmul.f32 -1.442695, %v3332_v32 }
 0x7f0   : > { %v3389_v16 = vadd.f32 1.0, %v4564_v23  ;;  %v3289_v28 = vpop.xlane.xlu1 %3288  ;;  %v3304_v46 = vpop.xlane.xlu0 %3303  ;;  %v3579_v23 = vadd.f32 1.0, %v6261_v14 }
 0x7f1   : > { %v3330_v11 = vadd.f32 %v6237_v43, %v3289_v28  ;;  %4381 = vset.pattern.permute.xlu1 %v4659_v4  ;;  %v4566_v50 = vpop.eup %4565  ;;  %v3335_v36 = vadd.f32 %v6237_v43, %v3304_v46 }
 0x7f2   : > { %4571 = vrcp.f32 %v3389_v16  ;;  %v3391_v2 = vadd.f32 1.0, %v4566_v50 }
 0x7f3   : > { %v4022_v7 = vmul.f32 -1.442695, %v3330_v11  ;;  %4573 = vpow2.f32 %v4023_v33  ;;  %v4568_v47 = vpop.eup %4567  ;;  %v4027_v0 = vmul.f32 -1.442695, %v3335_v36 }
 0x7f4   : > { %v3298_v63 = vpop.xlane.xlu0 %3297  ;;  %v3307_v49 = vpop.xlane.xlu1 %3306  ;;  %v3392_v38 = vadd.f32 1.0, %v4568_v47 }
 0x7f5   : > { %4575 = vpow2.f32 %v4022_v7  ;;  %v3333_v42 = vadd.f32 %v6237_v43, %v3298_v63  ;;  %v4570_v59 = vpop.eup %4569  ;;  %v3336_v8 = vadd.f32 %v6237_v43, %v3307_v49 }
 0x7f6   : > { %4577 = vpow2.f32 %v4021_v51  ;;  %v3390_v31 = vadd.f32 1.0, %v4570_v59  ;;  %v3595_v51 = vmul.f32 %v6261_v14, %v3579_v23 }
 0x7f7   : > { %v4025_v41 = vmul.f32 -1.442695, %v3333_v42  ;;  %v4028_v9 = vmul.f32 -1.442695, %v3336_v8 }
 0x7f8   : > { %v3301_v35 = vpop.xlane.xlu1 %3300 }
 0x7f9   : > { %4579 = vpow2.f32 %v4025_v41  ;;  %v3334_v26 = vadd.f32 %v6237_v43, %v3301_v35 }
 0x7fa   : > { %4581 = vrcp.f32 %v3391_v2 }
 0x7fb   : > { %4583 = vpow2.f32 %v4024_v5  ;;  %v4026_v16 = vmul.f32 -1.442695, %v3334_v26 }
 0x7fc   : > { %v4572_v54 = vpop.eup %4571  ;;  %v3316_v40 = vpop.xlane.xlu0 %3315  ;;  %4585 = vrcp.f32 %v3392_v38 }
 0x7fd   : > { %v3437_v39 = vmul.f32 %v4572_v54, %v3167_v44  ;;  %v4574_v22 = vpop.eup %4573  ;;  %4587 = vrcp.f32 %v3390_v31  ;;  %v3125_v61 = vpop.xlane.xlu1 %3124  ;;  %v3339_v45 = vadd.f32 %v6237_v43, %v3316_v40  ;;  %v3168_v54 = vadd.f32 %v6253_v21, %v6232_v62 }
 0x7fe   : > { %4589 = vpow2.f32 %v4027_v0  ;;  %v3395_v20 = vadd.f32 1.0, %v4574_v22  ;;  %v3170_v49 = vadd.f32 %v6253_v21, %v3125_v61 }
 0x7ff   : > { %v4576_v1 = vpop.eup %4575  ;;  %3472 = vperm.xlu0 %4382, %v3437_v39   ;;  %v4031_v5 = vmul.f32 -1.442695, %v3339_v45 }
 0x800   : > { %v3394_v6 = vadd.f32 1.0, %v4576_v1  ;;  %v3310_v24 = vpop.xlane.xlu0 %3309  ;;  %v4578_v25 = vpop.eup %4577 }
 0x801   : > { %v3337_v18 = vadd.f32 %v6237_v43, %v3310_v24  ;;  %v3393_v50 = vadd.f32 1.0, %v4578_v25  ;;  %v3131_v32 = vpop.xlane.xlu1 %3130 }
 0x802   : > { %4591 = vrcp.f32 %v3394_v6  ;;  %v3172_v36 = vadd.f32 %v6253_v21, %v3131_v32  ;;  %v6273_v6 = vld [vmem:[%s4735_s18 + $0x70] sm:$0xff] }
 0x803   : > { %v4029_v10 = vmul.f32 -1.442695, %v3337_v18  ;;  %v4580_v37 = vpop.eup %4579  ;;  %4593 = vpow2.f32 %v4028_v9  ;;  %v3580_v24 = vadd.f32 1.0, %v6273_v6 }
 0x804   : > { %v3122_v13 = vpop.xlane.xlu0 %3121  ;;  %v4582_v28 = vpop.eup %4581  ;;  %4595 = vrcp.f32 %v3395_v20  ;;  %v3397_v46 = vadd.f32 1.0, %v4580_v37 }
 0x805   : > { %v3169_v33 = vadd.f32 %v6253_v21, %v3122_v13  ;;  %v4584_v11 = vpop.eup %4583  ;;  %4597 = vpow2.f32 %v4029_v10  ;;  %v3137_v20 = vpop.xlane.xlu1 %3136  ;;  %v3596_v23 = vmul.f32 %v6273_v6, %v3580_v24 }
 0x806   : > { %v4586_v63 = vpop.eup %4585  ;;  %4599 = vrcp.f32 %v3397_v46  ;;  %v3396_v41 = vadd.f32 1.0, %v4584_v11 }
 0x807   : > { %v3439_v7 = vmul.f32 %v4582_v28, %v3169_v33  ;;  %4601 = vpow2.f32 %v4026_v16  ;;  %v4588_v47 = vpop.eup %4587  ;;  %v3440_v59 = vmul.f32 %v4586_v63, %v3170_v49 }
 0x808   : > { %v3128_v42 = vpop.xlane.xlu0 %3127  ;;  %v4590_v2 = vpop.eup %4589  ;;  %4603 = vrcp.f32 %v3393_v50  ;;  %v3438_v8 = vmul.f32 %v4588_v47, %v3168_v54  ;;  %v3174_v50 = vadd.f32 %v6253_v21, %v3137_v20 }
 0x809   : > { %3482 = vperm.xlu1 %4381, %v3439_v7   ;;  %4605 = vrcp.f32 %v3595_v51  ;;  %v3399_v40 = vadd.f32 1.0, %v4590_v2  ;;  %v3171_v10 = vadd.f32 %v6253_v21, %v3128_v42  ;;  %v3143_v45 = vpop.xlane.xlu1 %3142  ;;  %v4665_v7 = vmov 0.0|0.0  }
 0x80a   : > { %4607 = vrcp.f32 %v3396_v41  ;;  %4312 = vmatprep.subr.bf16.mxu1 %v4665_v7 }
 0x80b   : > { %4609 = vpow2.f32 %v4031_v5 }
 0x80c   : > { %v4592_v38 = vpop.eup %4591  ;;  %v3134_v44 = vpop.xlane.xlu0 %3133  ;;  %4611 = vrcp.f32 %v3399_v40 }
 0x80d   : > { %v3442_v31 = vmul.f32 %v4592_v38, %v3172_v36  ;;  %3487 = vperm.xlu1 %4381, %v3440_v59   ;;  %v4594_v35 = vpop.eup %4593  ;;  %v3173_v0 = vadd.f32 %v6253_v21, %v3134_v44  ;;  %v3149_v59 = vpop.xlane.xlu1 %3148 }
 0x80e   : > { %v4596_v39 = vpop.eup %4595  ;;  %v3400_v26 = vadd.f32 1.0, %v4594_v35  ;;  %v3178_v44 = vadd.f32 %v6253_v21, %v3149_v59 }
 0x80f   : > { %3497 = vperm.xlu0 %4382, %v3442_v31   ;;  %v4598_v1 = vpop.eup %4597  ;;  %v3443_v25 = vmul.f32 %v4596_v39, %v3173_v0  ;;  %v3176_v0 = vadd.f32 %v6253_v21, %v3143_v45 }
 0x810   : > { %v3140_v22 = vpop.xlane.xlu0 %3139  ;;  %v4600_v62 = vpop.eup %4599  ;;  %v3401_v18 = vadd.f32 1.0, %v4598_v1 }
 0x811   : > { %v3175_v9 = vadd.f32 %v6253_v21, %v3140_v22  ;;  %3477 = vperm.xlu1 %4381, %v3438_v8   ;;  %v4602_v61 = vpop.eup %4601  ;;  %v3155_v1 = vpop.xlane.xlu1 %3154 }
 0x812   : > { %4613 = vrcp.f32 %v3401_v18  ;;  %v4604_v16 = vpop.eup %4603  ;;  %v3398_v33 = vadd.f32 1.0, %v4602_v61 }
 0x813   : > { %v3445_v13 = vmul.f32 %v4600_v62, %v3175_v9  ;;  %4615 = vrcp.f32 %v3400_v26  ;;  %v4606_v28 = vpop.eup %4605  ;;  %v3441_v46 = vmul.f32 %v4604_v16, %v3171_v10 }
 0x814   : > { %v3146_v37 = vpop.xlane.xlu0 %3145  ;;  %v4608_v11 = vpop.eup %4607  ;;  %4617 = vrcp.f32 %v3596_v23 }
 0x815   : > { %3502 = vperm.xlu1 %4381, %v3443_v25   ;;  %3512 = vperm.xlu0 %4382, %v3445_v13   ;;  %v4610_v63 = vpop.eup %4609  ;;  %4619 = vrcp.f32 %v3398_v33  ;;  %v3444_v42 = vmul.f32 %v4608_v11, %v3174_v50  ;;  %v3177_v51 = vadd.f32 %v6253_v21, %v3146_v37  ;;  %v3161_v24 = vpop.xlane.xlu1 %3160 }
 0x816   : > { %v3403_v49 = vadd.f32 1.0, %v4610_v63  ;;  %v4612_v47 = vpop.eup %4611 }
 0x817   : > { %v3447_v5 = vmul.f32 %v4612_v47, %v3177_v51 }
 0x818   : > { %v3152_v32 = vpop.xlane.xlu0 %3151  ;;  %4621 = vrcp.f32 %v3403_v49  ;;  %v3182_v49 = vadd.f32 %v6253_v21, %v3161_v24 }
 0x819   : > { %3492 = vperm.xlu1 %4381, %v3441_v46   ;;  %4383 = vset.pattern.permute.xlu0 %v4664_v17  ;;  %v3179_v41 = vadd.f32 %v6253_v21, %v3152_v32  ;;  %v3617_v9 = vpop.permute.xlu1 %3616  ;;  %v6294_v46 = vld [vmem:[%s4735_s18 + $0x78] sm:$0xff] }
 0x81a   : > { %3681 = vperm.xlu0 %4383, %v4606_v28   ;;  %v3581_v11 = vadd.f32 1.0, %v6294_v46 }
 0x81c   : > { %v4614_v2 = vpop.eup %4613  ;;  %v3158_v40 = vpop.xlane.xlu0 %3157  ;;  %v3597_v45 = vmul.f32 %v6294_v46, %v3581_v11 }
 0x81d   : > { %3507 = vperm.xlu1 %4381, %v3444_v42   ;;  %v3449_v36 = vmul.f32 %v4614_v2, %v3179_v41  ;;  %v4616_v38 = vpop.eup %4615  ;;  %v3622_v62 = vpop.permute.xlu1 %3621 }
 0x81e   : > { %4384 = vset.pattern.permute.xlu0 %v4659_v4  ;;  %v4618_v54 = vpop.eup %4617  ;;  %v3448_v31 = vmul.f32 %v4616_v38, %v3178_v44  ;;  %v3181_v4 = vadd.f32 %v6253_v21, %v3158_v40  ;;  %v3457_v40 = vsel %vm3453_vm5, %v6200_v12, 0.0 }
 0x81f   : > { %3532 = vperm.xlu0 %4384, %v3449_v36   ;;  %v4620_v35 = vpop.eup %4619 }
 0x820   : > { %v3446_v8 = vmul.f32 %v4620_v35, %v3176_v0  ;;  %v3455_v0 = vsel %vm3453_vm5, %v6164_v19, 0.0  ;;  %v3458_v19 = vsel %vm3453_vm5, %v6206_v29, 0.0 }
 0x821   : > { %3522 = vperm.xlu1 %4381, %v3447_v5   ;;  %v6289_v26 = vpop.permute.xlu1 %3626 }
 0x822   : > { %v4622_v39 = vpop.eup %4621 }
 0x823   : > { %4385 = vset.pattern.permute.xlu0 %v4664_v17  ;;  %v3451_v22 = vmul.f32 %v4622_v39, %v3181_v4  ;;  %v3456_v4 = vsel %vm3453_vm5, %v6172_v55, 0.0 }
 0x824   : > { %3686 = vperm.xlu0 %4385, %v4618_v54   ;;  %v3642_v47 = vpop.permute.xlu0 %3641 }
 0x825   : > { %3527 = vperm.xlu1 %4381, %v3448_v31   ;;  %v3454_v31 = vsel %vm3453_vm5, %v6157_v15, 0.0 }
 0x828   : > { %v3647_v5 = vpop.permute.xlu0 %3646 }
 0x829   : > { %3517 = vperm.xlu1 %4381, %v3446_v8  }
 0x82c   : > { %v6305_v38 = vpop.permute.xlu0 %3661 }
 0x82d   : > { %3542 = vperm.xlu1 %4381, %v3451_v22  }
 0x830   : > { %v3667_v44 = vpop.permute.xlu0 %3666 }
 0x851   : > { %v3319_v18 = vpop.xlane.xlu1 %3318 }
 0x852   : > { %v3340_v20 = vadd.f32 %v6237_v43, %v3319_v18 }
 0x854   : > { %v4032_v61 = vmul.f32 -1.442695, %v3340_v20  ;;  %v3459_v20 = vsel %vm3453_vm5, %v6178_v52, 0.0 }
 0x855   : > { %v3313_v10 = vpop.xlane.xlu1 %3312 }
 0x856   : > { %v3338_v25 = vadd.f32 %v6237_v43, %v3313_v10  ;;  %4623 = vpow2.f32 %v4032_v61  ;;  %v3180_v43 = vadd.f32 %v6253_v21, %v3155_v1 }
 0x858   : > { %v4030_v13 = vmul.f32 -1.442695, %v3338_v25 }
 0x859   : > { %v3632_v28 = vpop.permute.xlu1 %3631 }
 0x85a   : > { %4625 = vpow2.f32 %v4030_v13 }
 0x85d   : > { %v3637_v63 = vpop.permute.xlu1 %3636 }
 0x860   : > { %v4624_v37 = vpop.eup %4623 }
 0x861   : > { %v3404_v16 = vadd.f32 1.0, %v4624_v37  ;;  %v3652_v32 = vpop.permute.xlu1 %3651 }
 0x864   : > { %v4626_v23 = vpop.eup %4625 }
 0x865   : > { %v3402_v33 = vadd.f32 1.0, %v4626_v23  ;;  %v6300_v2 = vpop.permute.xlu1 %3656  ;;  %v3461_v23 = vsel %vm3453_vm5, %v6211_v3, 0.0  ;;  %v3462_v3 = vsel %vm3453_vm5, %v6216_v58, 0.0 }
 0x867   : > { %4627 = vrcp.f32 %v3402_v33 }
 0x868   : > { %4629 = vrcp.f32 %v3404_v16 }
 0x869   : > { %4631 = vrcp.f32 %v3597_v45  ;;  %v6303_v36 = vpop.permute.xlu1 %3671 }
 0x86d   : > { %v6309_v21 = vpop.permute.xlu1 %3676 }
 0x871   : > { %v4628_v50 = vpop.eup %4627 }
 0x872   : > { %v3450_v42 = vmul.f32 %v4628_v50, %v3180_v43  ;;  %v4630_v51 = vpop.eup %4629 }
 0x873   : > { %v3452_v41 = vmul.f32 %v4630_v51, %v3182_v49  ;;  %v4632_v59 = vpop.eup %4631  ;;  %v3465_v51 = vsel %vm3453_vm5, %v6221_v53, 0.0 }
 0x874   : > { %3537 = vperm.xlu1 %4381, %v3450_v42  }
 0x878   : > { %3547 = vperm.xlu1 %4381, %v3452_v41  }
 0x87c   : > { %4386 = vset.pattern.permute.xlu1 %v4664_v17 }
 0x87d   : > { %3691 = vperm.xlu1 %4386, %v4632_v59  }
 0x87e   : > { %v3473_v17 = vpop.permute.xlu0 %3472 }
 0x87f   : > { %v3550_v8 = vmul.f32 %v3473_v17, %v3454_v31 }
 0x881   : > { %v3694_v24 = vmul.f32 %v3617_v9, %v3550_v8  ;;  %v3460_v9 = vsel %vm3453_vm5, %v6183_v56, 0.0 }
 0x888   : > { %v3483_v54 = vpop.permute.xlu1 %3482 }
 0x889   : > { %v3552_v15 = vmul.f32 %v3483_v54, %v3456_v4 }
 0x88b   : > { %v3696_v55 = vmul.f32 %v6289_v26, %v3552_v15 }
 0x88c   : > { %v3488_v35 = vpop.permute.xlu1 %3487 }
 0x88d   : > { %v3553_v22 = vmul.f32 %v3488_v35, %v3457_v40  ;;  %v3466_v40 = vsel %vm3453_vm5, %v6225_v57, 0.0  ;;  %v3469_v57 = vsel %vm3453_vm5, %v6294_v46, 0.0  ;;  %v4667_v46 = vmov 1.0  }
 0x88e   : > { %v3498_v12 = vpop.permute.xlu0 %3497 }
 0x88f   : > { %v3697_v10 = vmul.f32 %v3632_v28, %v3553_v22  ;;  %v3555_v13 = vmul.f32 %v3498_v12, %v3459_v20 }
 0x890   : > { %v3478_v39 = vpop.permute.xlu1 %3477 }
 0x891   : > { %v3551_v1 = vmul.f32 %v3478_v39, %v3455_v0  ;;  %v4316_v52 = vpack.c.bf16 %v3697_v10, %v3696_v55  ;;  %v3699_v16 = vmul.f32 %v3642_v47, %v3555_v13  ;;  %v3464_v47 = vsel %vm3453_vm5, %v6192_v48, 0.0  ;;  %v3729_v13 = vld [vmem:[%s6410_s7 + $0x8] sm:$0xff] }
 0x892   : > { %v3468_v39 = vsel %vm3453_vm5, %v6273_v6, 0.0  ;;  %v4033_v6 = vld [vmem:[%s311_s30] ss:$0 sm:$0xff] }
 0x893   : > { %v3695_v18 = vmul.f32 %v3622_v62, %v3551_v1 }
 0x894   : > { %v3503_v61 = vpop.permute.xlu1 %3502  ;;  %v3513_v42 = vpop.permute.xlu0 %3512 }
 0x895   : > { %v4313_v25 = vpack.c.bf16 %v3695_v18, %v3694_v24  ;;  %v3556_v33 = vmul.f32 %v3503_v61, %v3460_v9  ;;  %v3558_v49 = vmul.f32 %v3513_v42, %v3462_v3  ;;  %v3711_v61 = vshrl.u32 %v349_v27, 7  ;;  %v3728_v27 = vld [vmem:[%s6410_s7] sm:$0xff] }
 0x897   : > { %4314 = vmatpush3.bf16.msra.mxu1 %v4313_v25  ;;  %v3700_v45 = vmul.f32 %v3647_v5, %v3556_v33  ;;  %v3702_v5 = vmul.f32 %v6300_v2, %v3558_v49  ;;  %vm3719_vm6 = vcmp.eq.s32.totalorder %v3711_v61, %v4033_v6  ;;  %v3712_v30 = vadd.s32 8, %v3711_v61 }
 0x898   : > { %v3493_v62 = vpop.permute.xlu1 %3492  ;;  %4315 = vmatprep.subr.bf16.mxu1 %v4665_v7 }
 0x899   : > { %v3554_v37 = vmul.f32 %v3493_v62, %v3458_v19  ;;  %v3682_v48 = vpop.permute.xlu0 %3681  ;;  %vm3720_vm7 = vcmp.eq.s32.totalorder %v3712_v30, %v4033_v6 }
 0x89b   : > { %v3698_v29 = vmul.f32 %v3637_v63, %v3554_v37  ;;  %4317 = vmatpush3.bf16.msra.mxu1 %v4316_v52  ;;  %v3730_v52 = vld [vmem:[%s6410_s7 + $0x10] sm:$0xff] }
 0x89c   : > { %v3508_v26 = vpop.permute.xlu1 %3507  ;;  %4318 = vmatprep.subr.bf16.mxu1 %v4665_v7 }
 0x89d   : > { %v4319_v28 = vpack.c.bf16 %v3699_v16, %v3698_v29  ;;  %v3557_v11 = vmul.f32 %v3508_v26, %v3461_v23 }
 0x89e   : > { %v3533_v2 = vpop.permute.xlu0 %3532 }
 0x89f   : > { %v3701_v56 = vmul.f32 %v3652_v32, %v3557_v11  ;;  %4320 = vmatpush3.bf16.msra.mxu1 %v4319_v28  ;;  %v3463_v32 = vsel %vm3453_vm5, %v6188_v60, 0.0 }
 0x8a0   : > { %v3523_v43 = vpop.permute.xlu1 %3522  ;;  %4321 = vmatprep.subr.bf16.mxu1 %v4665_v7 }
 0x8a1   : > { %v4322_v50 = vpack.c.bf16 %v3701_v56, %v3700_v45  ;;  %v3560_v54 = vmul.f32 %v3523_v43, %v3464_v47 }
 0x8a3   : > { %4323 = vmatpush3.bf16.msra.mxu1 %v4322_v50  ;;  %v3704_v35 = vmul.f32 %v3667_v44, %v3560_v54  ;;  %v3687_v18 = vpop.permute.xlu0 %3686 }
 0x8a4   : > { %v3528_v63 = vpop.permute.xlu1 %3527  ;;  %4324 = vmatprep.subr.bf16.mxu1 %v4665_v7 }
 0x8a5   : > { %v3561_v59 = vmul.f32 %v3528_v63, %v3465_v51 }
 0x8a7   : > { %v3705_v17 = vmul.f32 %v6303_v36, %v3561_v59  ;;  %v3467_v36 = vsel %vm3453_vm5, %v6261_v14, 0.0 }
 0x8a8   : > { %v3518_v41 = vpop.permute.xlu1 %3517 }
 0x8a9   : > { %v3559_v58 = vmul.f32 %v3518_v41, %v3463_v32  ;;  %v4328_v60 = vpack.c.bf16 %v3705_v17, %v3704_v35 }
 0x8ab   : > { %v3703_v31 = vmul.f32 %v6305_v38, %v3559_v58  ;;  %v3562_v38 = vmul.f32 %v3533_v2, %v3466_v40 }
 0x8ac   : > { %v3543_v0 = vpop.permute.xlu1 %3542 }
 0x8ad   : > { %v4325_v53 = vpack.c.bf16 %v3703_v31, %v3702_v5  ;;  %v3706_v4 = vmul.f32 %v6309_v21, %v3562_v38  ;;  %v3564_v15 = vmul.f32 %v3543_v0, %v3468_v39 }
 0x8af   : > { %4326 = vmatpush3.bf16.msra.mxu1 %v4325_v53  ;;  %v3708_v12 = vmul.f32 %v3687_v18, %v3564_v15 }
 0x8b0   : > { %4327 = vmatprep.subr.bf16.mxu1 %v4665_v7 }
 0x8b3   : > { %4329 = vmatpush3.bf16.msra.mxu1 %v4328_v60 }
 0x8b4   : > { %4330 = vmatprep.subr.bf16.mxu1 %v4665_v7 }
 0x8f3   : > { %v3538_v44 = vpop.permute.xlu1 %3537 }
 0x8f4   : > { %v3563_v8 = vmul.f32 %v3538_v44, %v3467_v36 }
 0x8f6   : > { %v3707_v22 = vmul.f32 %v3682_v48, %v3563_v8 }
 0x8f7   : > { %v3548_v1 = vpop.permute.xlu1 %3547 }
 0x8f8   : > { %v4331_v24 = vpack.c.bf16 %v3707_v22, %v3706_v4  ;;  %v3565_v14 = vmul.f32 %v3548_v1, %v3469_v57 }
 0x8fa   : > { %4332 = vmatpush3.bf16.msra.mxu1 %v4331_v24 }
 0x8fb   : > { %4333 = vmatprep.subr.bf16.mxu1 %v4665_v7  ;;  %v3713_v7 = vadd.s32 16, %v3711_v61 }
 0x8fc   : > { %v3692_v20 = vpop.permute.xlu1 %3691 }
 0x8fd   : > { %v3709_v21 = vmul.f32 %v3692_v20, %v3565_v14  ;;  %vm3721_vm9 = vcmp.eq.s32.totalorder %v3713_v7, %v4033_v6 }
 0x8ff   : > { %v4334_v10 = vpack.c.bf16 %v3709_v21, %v3708_v12 }
 0x901   : > { %4335 = vmatpush3.bf16.msra.mxu1 %v4334_v10 }
 0x904   : > { %4304 = vmatmul.mubr.msk.f32.vlgmr.msra.gmra.mrb[52].mxu1 %vm3719_vm6, %v4667_v46 }
 0x905   : > { %4306 = vmatprep.mubr.msk.f32.mxu1 %vm4666_vm8, %v4660_v34 }
 0x908   : > { %4307 = vmatmul.mubr.msk.f32.gmra.mrb[54].mxu1 %vm3720_vm7, %v4667_v46 }
 0x909   : > { %4309 = vmatprep.mubr.msk.f32.mxu1 %vm4666_vm8, %v4660_v34 }
 0x90c   : > { %4310 = vmatmul.mubr.msk.f32.gmra.mrb[56].mxu1 %vm3721_vm9, %v4667_v46 }
 0x9d7   : > { %v3797_v25 = vpop.f32.mrb[52].mxu1 }
 0x9d8   : > { %v3811_v19 = vadd.f32 %v3797_v25, %v3728_v27  ;;  %v4305_v55 = vpop.f32.mrb[53].mxu1 }
 0x9da   : > { %3815 = vst.msk [vmem:[%s6410_s7] sm:$0xff] %vm3814_vm10, %v3811_v19 }
 0x9db   : > { %v3802_v9 = vpop.f32.mrb[54].mxu1 }
 0x9dc   : > { %v3812_v34 = vadd.f32 %v3802_v9, %v3729_v13  ;;  %v4308_v62 = vpop.f32.mrb[55].mxu1 }
 0x9de   : > { %3816 = vst.msk [vmem:[%s6410_s7 + $0x8] sm:$0xff] %vm3814_vm10, %v3812_v34 }
 0x9df   : > { %v3807_v37 = vpop.f32.mrb[56].mxu1 }
 0x9e0   : > { %v3813_v23 = vadd.f32 %v3807_v37, %v3730_v52  ;;  %v4311_v16 = vpop.f32.mrb[57].mxu1 }
 0x9e2   : > { %3817 = vst.msk [vmem:[%s6410_s7 + $0x10] sm:$0xff] %vm3814_vm10, %v3813_v23 }
 0x9e3 PF: > { %s17_s24 = sadd.s32 1, %s4655_s24  }
 0x9e4   : > { %p14_p6 = scmp.ge.s32.totalorder %s17_s24, 5  }
 0x9e6   :  { %16 = sbr.rel (!%p14_p6) target bundleno = 1 (0x1), region = 87 }

</bundles_post_ra>
